<compile_context>
chip_gen: v7x
topology: tpu7x:2x2x1
jax: 0.10.0
libtpu: 0.0.40
codegen_flags: <defaults>
</compile_context>

<pallas_src>
import functools

import jax
import jax.numpy as jnp
import numpy as np
from jax.experimental import pallas as pl
from jax.experimental.pallas import tpu as pltpu


def _round_up(x, m):
    return ((x + m - 1) // m) * m


# ----------------------------- Pallas kernel -------------------------------

def make_kernel(num_layers: int, hidden_dim: int, seq_len: int, batch_chunk: int):
    H = hidden_dim
    T = seq_len
    Bc = batch_chunk
    n_w = 2 + 4 * num_layers + 2   # conv(w,b) + per-layer(wih_cat,b_cat,whh_f,whh_b) + fc(w,b)

    def kernel(*refs):
        x_ref = refs[0]                     # (T, Bc, E) embedded tokens, time-major
        wrefs = refs[1:1 + n_w]
        o_ref = refs[1 + n_w]               # (T, Bc, L_pad)
        hf_scr = refs[2 + n_w]              # (T*Bc, H) forward-direction outputs
        hb_scr = refs[3 + n_w]              # (T*Bc, H) backward-direction outputs

        w_conv = wrefs[0][...]              # (3E, F)  im2col conv weight
        b_conv = wrefs[1][...]              # (1, F)
        layer_w = []
        idx = 2
        for _ in range(num_layers):
            layer_w.append((wrefs[idx][...],        # (D_in, 8H)  [fwd | bwd], gates i,f,o,g
                            wrefs[idx + 1][...],    # (1, 8H)
                            wrefs[idx + 2][...],    # (H, 4H) fwd recurrent
                            wrefs[idx + 3][...]))   # (H, 4H) bwd recurrent
            idx += 4
        w_fc = wrefs[idx][...]              # (2H, L_pad)
        b_fc = wrefs[idx + 1][...]          # (1, L_pad)

        x = x_ref[...]                      # (T, Bc, E)
        E = x.shape[-1]

        # --- Conv1d(k=3, padding=1) as ONE batched im2col matmul -----------
        zrow = jnp.zeros((1, Bc, E), jnp.float32)
        x_prev = jnp.concatenate([zrow, x[:-1]], axis=0)      # x[t-1]
        x_next = jnp.concatenate([x[1:], zrow], axis=0)       # x[t+1]
        conv_in = jnp.concatenate([x_prev, x, x_next], axis=-1)       # (T, Bc, 3E)
        conv_in = conv_in.reshape(T * Bc, 3 * E)
        # h_seq lives flat as (T*Bc, feat); row index = t*Bc + b
        h_seq = jnp.dot(conv_in, w_conv, preferred_element_type=jnp.float32) + b_conv

        def cell(g, c):
            # g: (Bc, 4H) gate pre-activations, gate order [i, f, o, g]
            sig = jax.nn.sigmoid(g[:, :3 * H])                 # i, f, o in one EUP op
            g_t = jnp.tanh(g[:, 3 * H:])
            i_g = sig[:, :H]
            f_g = sig[:, H:2 * H]
            o_g = sig[:, 2 * H:3 * H]
            c_new = f_g * c + i_g * g_t
            h_new = o_g * jnp.tanh(c_new)
            return h_new, c_new

        # --- stacked bidirectional LSTM -------------------------------------
        for l in range(num_layers):
            w_ih_cat, b_cat, w_hh_f, w_hh_b = layer_w[l]

            # hoisted input projection (+ bias) for BOTH directions at once
            gates_in = jnp.dot(h_seq, w_ih_cat,
                               preferred_element_type=jnp.float32) + b_cat   # (T*Bc, 8H)

            # forward direction (T is small & static -> unrolled; use
            # lax.fori_loop writing into scratch if T grows large)
            h = jnp.zeros((Bc, H), jnp.float32)
            c = jnp.zeros((Bc, H), jnp.float32)
            for t in range(T):
                g = gates_in[t * Bc:(t + 1) * Bc, :4 * H] + jnp.dot(
                    h, w_hh_f, preferred_element_type=jnp.float32)
                h, c = cell(g, c)
                hf_scr[t * Bc:(t + 1) * Bc, :] = h

            # backward direction
            h = jnp.zeros((Bc, H), jnp.float32)
            c = jnp.zeros((Bc, H), jnp.float32)
            for t in range(T - 1, -1, -1):
                g = gates_in[t * Bc:(t + 1) * Bc, 4 * H:] + jnp.dot(
                    h, w_hh_b, preferred_element_type=jnp.float32)
                h, c = cell(g, c)
                hb_scr[t * Bc:(t + 1) * Bc, :] = h

            h_seq = jnp.concatenate([hf_scr[...], hb_scr[...]], axis=-1)     # (T*Bc, 2H)

        # --- final Linear (output columns pre-padded to 128 -> lane-dense store)
        out = jnp.dot(h_seq, w_fc, preferred_element_type=jnp.float32) + b_fc
        o_ref[...] = out.reshape(T, Bc, -1).astype(o_ref.dtype)

    return kernel


# ----------------------------- wrapper --------------------------------------

def _reorder_gates(w, H):
    # last-dim gate order [i, f, g, o] (PyTorch) -> [i, f, o, g]
    return jnp.concatenate([w[..., :2 * H], w[..., 3 * H:4 * H], w[..., 2 * H:3 * H]],
                           axis=-1)


def cnn_bilstm_pallas(tokens, params, *, num_layers, hidden_dim, max_batch_chunk=128):
    H = hidden_dim
    # Embedding gather (glue, plain JAX).
    emb = jnp.take(params["embedding"], tokens, axis=0).astype(jnp.float32)   # (B, T, E)
    B, T, E = emb.shape
    L = params["b_fc"].shape[-1]
    L_pad = _round_up(L, 128)

    # Batch chunking: pad B so every kernel block is full; grid over chunks.
    Bc = min(max_batch_chunk, _round_up(B, 8))
    B_pad = _round_up(B, Bc)
    num_chunks = B_pad // Bc

    # (B, T, E) -> time-major (T, B_pad, E): batch sits on sublanes in the kernel.
    emb_t = jnp.transpose(emb, (1, 0, 2))
    if B_pad > B:
        emb_t = jnp.pad(emb_t, ((0, 0), (0, B_pad - B), (0, 0)))

    # ---- kernel-layout weights ---------------------------------------------
    weight_list = [params["w_conv_mat"], params["b_conv"]]
    for l in range(num_layers):
        wih_f = _reorder_gates(params[f"wih_l{l}_d0"], H)
        wih_b = _reorder_gates(params[f"wih_l{l}_d1"], H)
        b_f = _reorder_gates(params[f"b_l{l}_d0"], H)
        b_b = _reorder_gates(params[f"b_l{l}_d1"], H)
        weight_list += [
            jnp.concatenate([wih_f, wih_b], axis=-1),       # (D_in, 8H)
            jnp.concatenate([b_f, b_b], axis=-1),           # (1, 8H)
            _reorder_gates(params[f"whh_l{l}_d0"], H),      # (H, 4H)
            _reorder_gates(params[f"whh_l{l}_d1"], H),      # (H, 4H)
        ]
    w_fc_pad = jnp.pad(params["w_fc"], ((0, 0), (0, L_pad - L)))
    b_fc_pad = jnp.pad(params["b_fc"], ((0, 0), (0, L_pad - L)))
    weight_list += [w_fc_pad, b_fc_pad]

    in_specs = [pl.BlockSpec((T, Bc, E), lambda b: (0, b, 0))]
    for w in weight_list:
        in_specs.append(pl.BlockSpec(w.shape, lambda b: (0, 0)))
    out_spec = pl.BlockSpec((T, Bc, L_pad), lambda b: (0, b, 0))

    kernel = make_kernel(num_layers, hidden_dim, T, Bc)
    out = pl.pallas_call(
        kernel,
        grid=(num_chunks,),
        in_specs=in_specs,
        out_specs=out_spec,
        out_shape=jax.ShapeDtypeStruct((T, B_pad, L_pad), jnp.float32),
        scratch_shapes=[pltpu.VMEM((T * Bc, H), jnp.float32),
                        pltpu.VMEM((T * Bc, H), jnp.float32)],
        compiler_params=pltpu.CompilerParams(dimension_semantics=("parallel",)),
    )(emb_t, *weight_list)

    # strip batch / label padding, back to (B, T, L)
    return jnp.transpose(out[:, :B, :L], (1, 0, 2))


# ----------------------------- reference (plain JAX) ------------------------

def reference_forward(tokens, params, *, num_layers, hidden_dim):
    emb = jnp.take(params["embedding"], tokens, axis=0)
    B, T, E = emb.shape
    H = hidden_dim
    outs = []
    for bi in range(B):
        x = emb[bi]
        zrow = jnp.zeros((1, E), x.dtype)
        conv_in = jnp.concatenate(
            [jnp.concatenate([zrow, x[:-1]], 0), x,
             jnp.concatenate([x[1:], zrow], 0)], axis=-1)
        h_seq = conv_in @ params["w_conv_mat"] + params["b_conv"]
        for l in range(num_layers):
            dirs = []
            for d in range(2):
                k = f"l{l}_d{d}"
                wih, whh, b = params[f"wih_{k}"], params[f"whh_{k}"], params[f"b_{k}"]
                h = jnp.zeros((1, H)); c = jnp.zeros((1, H))
                res = [None] * T
                order = range(T) if d == 0 else range(T - 1, -1, -1)
                for t in order:
                    g = h_seq[t:t + 1] @ wih + h @ whh + b
                    i_g = jax.nn.sigmoid(g[:, :H]); f_g = jax.nn.sigmoid(g[:, H:2 * H])
                    g_g = jnp.tanh(g[:, 2 * H:3 * H]); o_g = jax.nn.sigmoid(g[:, 3 * H:])
                    c = f_g * c + i_g * g_g
                    h = o_g * jnp.tanh(c)
                    res[t] = h
                dirs.append(jnp.concatenate(res, 0))
            h_seq = jnp.concatenate(dirs, -1)
        outs.append(h_seq @ params["w_fc"] + params["b_fc"])
    return jnp.stack(outs, 0)


# ----------------------------- param init -----------------------------------

def init_params(key, *, vocab_size, embed_dim, num_labels, num_filters,
                hidden_dim, num_layers):
    keys = iter(jax.random.split(key, 64))
    p = {}
    s = 0.1
    p["embedding"] = s * jax.random.normal(next(keys), (vocab_size, embed_dim), jnp.float32)

    # Conv1d weight (F, E, K=3) -> im2col matrix (3E, F) with index k*E + e.
    w_conv = s * jax.random.normal(next(keys), (num_filters, embed_dim, 3), jnp.float32)
    p["w_conv_mat"] = jnp.transpose(w_conv, (2, 1, 0)).reshape(3 * embed_dim, num_filters)
    p["b_conv"] = (s * jax.random.normal(next(keys), (num_filters,), jnp.float32)).reshape(1, -1)

    # LSTM weights (PyTorch layout: W_ih (4H, D_in), W_hh (4H, H), gate order i,f,g,o).
    for l in range(num_layers):
        d_in = num_filters if l == 0 else 2 * hidden_dim
        for d in range(2):
            k = f"l{l}_d{d}"
            w_ih = s * jax.random.normal(next(keys), (4 * hidden_dim, d_in), jnp.float32)
            w_hh = s * jax.random.normal(next(keys), (4 * hidden_dim, hidden_dim), jnp.float32)
            b_ih = s * jax.random.normal(next(keys), (4 * hidden_dim,), jnp.float32)
            b_hh = s * jax.random.normal(next(keys), (4 * hidden_dim,), jnp.float32)
            p[f"wih_{k}"] = w_ih.T                       # (D_in, 4H)
            p[f"whh_{k}"] = w_hh.T                       # (H, 4H)
            p[f"b_{k}"] = (b_ih + b_hh).reshape(1, -1)   # (1, 4H)

    w_fc = s * jax.random.normal(next(keys), (num_labels, 2 * hidden_dim), jnp.float32)
    b_fc = s * jax.random.normal(next(keys), (num_labels,), jnp.float32)
    p["w_fc"] = w_fc.T                                   # (2H, L)
    p["b_fc"] = b_fc.reshape(1, -1)                      # (1, L)
    return p


# ----------------------------- main ------------------------------------------

if __name__ == "__main__":
    VOCAB_SIZE = 20
    EMBED_DIM = 16
    NUM_LABELS = 6
    NUM_FILTERS = 32
    HIDDEN_DIM = 32
    NUM_LAYERS = 2
    B, T = 2, 8

    root = jax.random.PRNGKey(0)
    k_tok, k_par = jax.random.split(root)
    tokens = jax.random.randint(k_tok, (B, T), 0, VOCAB_SIZE, dtype=jnp.int32)
    params = init_params(k_par, vocab_size=VOCAB_SIZE, embed_dim=EMBED_DIM,
                         num_labels=NUM_LABELS, num_filters=NUM_FILTERS,
                         hidden_dim=HIDDEN_DIM, num_layers=NUM_LAYERS)

    fwd = functools.partial(cnn_bilstm_pallas, num_layers=NUM_LAYERS,
                            hidden_dim=HIDDEN_DIM)
    out = jax.jit(fwd)(tokens, params)
    out = jax.block_until_ready(out)

    ref = reference_forward(tokens, params, num_layers=NUM_LAYERS,
                            hidden_dim=HIDDEN_DIM)
    ref = jax.block_until_ready(ref)

    assert out.shape == (B, T, NUM_LABELS), out.shape
    assert bool(jnp.all(jnp.isfinite(out)))
    np.testing.assert_allclose(np.asarray(out), np.asarray(ref), rtol=1e-2, atol=1e-2)
    print("KERNEL_OK")
</pallas_src>

<mosaic_0001>
module attributes {stable_mosaic.version = 11 : i64} {
  func.func @kernel(%arg0: i32, %arg1: memref<8x8x16xf32, #tpu.memory_space<vmem>>, %arg2: memref<48x32xf32, #tpu.memory_space<vmem>>, %arg3: memref<1x32xf32, #tpu.memory_space<vmem>>, %arg4: memref<32x256xf32, #tpu.memory_space<vmem>>, %arg5: memref<1x256xf32, #tpu.memory_space<vmem>>, %arg6: memref<32x128xf32, #tpu.memory_space<vmem>>, %arg7: memref<32x128xf32, #tpu.memory_space<vmem>>, %arg8: memref<64x256xf32, #tpu.memory_space<vmem>>, %arg9: memref<1x256xf32, #tpu.memory_space<vmem>>, %arg10: memref<32x128xf32, #tpu.memory_space<vmem>>, %arg11: memref<32x128xf32, #tpu.memory_space<vmem>>, %arg12: memref<64x128xf32, #tpu.memory_space<vmem>>, %arg13: memref<1x128xf32, #tpu.memory_space<vmem>>, %arg14: memref<8x8x128xf32, #tpu.memory_space<vmem>>, %arg15: memref<64x32xf32, #tpu.memory_space<vmem>>, %arg16: memref<64x32xf32, #tpu.memory_space<vmem>>) attributes {dimension_semantics = [#tpu.dimension_semantics<parallel>], iteration_bounds = array<i64: 1>, scalar_prefetch = 0 : i64, scratch_operands = 2 : i64, tpu.core_type = #tpu.core_type<tc>, window_params = [{transform_indices = @transform_0, window_bounds = array<i64: 8, 8, 16>}, {pipeline_mode = #tpu.pipeline_mode<synchronous>, transform_indices = @transform_1, window_bounds = array<i64: 48, 32>}, {pipeline_mode = #tpu.pipeline_mode<synchronous>, transform_indices = @transform_2, window_bounds = array<i64: 1, 32>}, {pipeline_mode = #tpu.pipeline_mode<synchronous>, transform_indices = @transform_3, window_bounds = array<i64: 32, 256>}, {pipeline_mode = #tpu.pipeline_mode<synchronous>, transform_indices = @transform_4, window_bounds = array<i64: 1, 256>}, {pipeline_mode = #tpu.pipeline_mode<synchronous>, transform_indices = @transform_5, window_bounds = array<i64: 32, 128>}, {pipeline_mode = #tpu.pipeline_mode<synchronous>, transform_indices = @transform_6, window_bounds = array<i64: 32, 128>}, {pipeline_mode = #tpu.pipeline_mode<synchronous>, transform_indices = @transform_7, window_bounds = array<i64: 64, 256>}, {pipeline_mode = #tpu.pipeline_mode<synchronous>, transform_indices = @transform_8, window_bounds = array<i64: 1, 256>}, {pipeline_mode = #tpu.pipeline_mode<synchronous>, transform_indices = @transform_9, window_bounds = array<i64: 32, 128>}, {pipeline_mode = #tpu.pipeline_mode<synchronous>, transform_indices = @transform_10, window_bounds = array<i64: 32, 128>}, {pipeline_mode = #tpu.pipeline_mode<synchronous>, transform_indices = @transform_11, window_bounds = array<i64: 64, 128>}, {pipeline_mode = #tpu.pipeline_mode<synchronous>, transform_indices = @transform_12, window_bounds = array<i64: 1, 128>}, {transform_indices = @transform_13, window_bounds = array<i64: 8, 8, 128>}]} {
    %c0 = arith.constant 0 : index
    %c0_0 = arith.constant 0 : index
    %0 = vector.load %arg2[%c0, %c0_0] : memref<48x32xf32, #tpu.memory_space<vmem>>, vector<48x32xf32>
    %c0_1 = arith.constant 0 : index
    %c0_2 = arith.constant 0 : index
    %1 = vector.load %arg3[%c0_1, %c0_2] : memref<1x32xf32, #tpu.memory_space<vmem>>, vector<1x32xf32>
    %c0_3 = arith.constant 0 : index
    %c0_4 = arith.constant 0 : index
    %2 = vector.load %arg4[%c0_3, %c0_4] : memref<32x256xf32, #tpu.memory_space<vmem>>, vector<32x256xf32>
    %c0_5 = arith.constant 0 : index
    %c0_6 = arith.constant 0 : index
    %3 = vector.load %arg5[%c0_5, %c0_6] : memref<1x256xf32, #tpu.memory_space<vmem>>, vector<1x256xf32>
    %c0_7 = arith.constant 0 : index
    %c0_8 = arith.constant 0 : index
    %4 = vector.load %arg6[%c0_7, %c0_8] : memref<32x128xf32, #tpu.memory_space<vmem>>, vector<32x128xf32>
    %c0_9 = arith.constant 0 : index
    %c0_10 = arith.constant 0 : index
    %5 = vector.load %arg7[%c0_9, %c0_10] : memref<32x128xf32, #tpu.memory_space<vmem>>, vector<32x128xf32>
    %c0_11 = arith.constant 0 : index
    %c0_12 = arith.constant 0 : index
    %6 = vector.load %arg8[%c0_11, %c0_12] : memref<64x256xf32, #tpu.memory_space<vmem>>, vector<64x256xf32>
    %c0_13 = arith.constant 0 : index
    %c0_14 = arith.constant 0 : index
    %7 = vector.load %arg9[%c0_13, %c0_14] : memref<1x256xf32, #tpu.memory_space<vmem>>, vector<1x256xf32>
    %c0_15 = arith.constant 0 : index
    %c0_16 = arith.constant 0 : index
    %8 = vector.load %arg10[%c0_15, %c0_16] : memref<32x128xf32, #tpu.memory_space<vmem>>, vector<32x128xf32>
    %c0_17 = arith.constant 0 : index
    %c0_18 = arith.constant 0 : index
    %9 = vector.load %arg11[%c0_17, %c0_18] : memref<32x128xf32, #tpu.memory_space<vmem>>, vector<32x128xf32>
    %c0_19 = arith.constant 0 : index
    %c0_20 = arith.constant 0 : index
    %10 = vector.load %arg12[%c0_19, %c0_20] : memref<64x128xf32, #tpu.memory_space<vmem>>, vector<64x128xf32>
    %c0_21 = arith.constant 0 : index
    %c0_22 = arith.constant 0 : index
    %11 = vector.load %arg13[%c0_21, %c0_22] : memref<1x128xf32, #tpu.memory_space<vmem>>, vector<1x128xf32>
    %c0_23 = arith.constant 0 : index
    %c0_24 = arith.constant 0 : index
    %c0_25 = arith.constant 0 : index
    %12 = vector.load %arg1[%c0_23, %c0_24, %c0_25] : memref<8x8x16xf32, #tpu.memory_space<vmem>>, vector<8x8x16xf32>
    %cst = arith.constant 0.000000e+00 : f32
    %13 = vector.broadcast %cst : f32 to vector<1x8x16xf32>
    %14 = vector.extract_strided_slice %12 {offsets = [0, 0, 0], sizes = [7, 8, 16], strides = [1, 1, 1]} : vector<8x8x16xf32> to vector<7x8x16xf32>
    %15 = tpu.concatenate %13, %14 in 0 : vector<1x8x16xf32>, vector<7x8x16xf32> -> vector<8x8x16xf32>
    %16 = vector.extract_strided_slice %12 {offsets = [1, 0, 0], sizes = [7, 8, 16], strides = [1, 1, 1]} : vector<8x8x16xf32> to vector<7x8x16xf32>
    %17 = tpu.concatenate %16, %13 in 0 : vector<7x8x16xf32>, vector<1x8x16xf32> -> vector<8x8x16xf32>
    %18 = tpu.concatenate %15, %12, %17 in 2 : vector<8x8x16xf32>, vector<8x8x16xf32>, vector<8x8x16xf32> -> vector<8x8x48xf32>
    %19 = vector.shape_cast %18 : vector<8x8x48xf32> to vector<64x48xf32>
    %cst_26 = arith.constant dense<0.000000e+00> : vector<64x32xf32>
    %20 = tpu.matmul %19, %0, %cst_26 {dimension_numbers = #tpu.dot_dimension_numbers<[1], [0], [0], [1], [0, 0, 1, 1], [], []>} : vector<64x48xf32>, vector<48x32xf32>, vector<64x32xf32> -> vector<64x32xf32>
    %21 = vector.broadcast %1 : vector<1x32xf32> to vector<64x32xf32>
    %22 = arith.addf %20, %21 : vector<64x32xf32>
    %cst_27 = arith.constant dense<0.000000e+00> : vector<64x256xf32>
    %23 = tpu.matmul %22, %2, %cst_27 {dimension_numbers = #tpu.dot_dimension_numbers<[1], [0], [0], [1], [0, 0, 1, 1], [], []>} : vector<64x32xf32>, vector<32x256xf32>, vector<64x256xf32> -> vector<64x256xf32>
    %24 = vector.broadcast %3 : vector<1x256xf32> to vector<64x256xf32>
    %25 = arith.addf %23, %24 : vector<64x256xf32>
    %cst_28 = arith.constant 0.000000e+00 : f32
    %26 = vector.broadcast %cst_28 : f32 to vector<8x32xf32>
    %cst_29 = arith.constant 0.000000e+00 : f32
    %27 = vector.broadcast %cst_29 : f32 to vector<8x32xf32>
    %28 = vector.extract_strided_slice %25 {offsets = [0, 0], sizes = [8, 128], strides = [1, 1]} : vector<64x256xf32> to vector<8x128xf32>
    %cst_30 = arith.constant dense<0.000000e+00> : vector<8x128xf32>
    %29 = tpu.matmul %26, %4, %cst_30 {dimension_numbers = #tpu.dot_dimension_numbers<[1], [0], [0], [1], [0, 0, 1, 1], [], []>} : vector<8x32xf32>, vector<32x128xf32>, vector<8x128xf32> -> vector<8x128xf32>
    %30 = arith.addf %28, %29 : vector<8x128xf32>
    %31 = vector.extract_strided_slice %30 {offsets = [0, 0], sizes = [8, 96], strides = [1, 1]} : vector<8x128xf32> to vector<8x96xf32>
    %32 = arith.negf %31 : vector<8x96xf32>
    %33 = math.exp %32 : vector<8x96xf32>
    %cst_31 = arith.constant 1.000000e+00 : f32
    %34 = vector.broadcast %cst_31 : f32 to vector<8x96xf32>
    %35 = arith.addf %34, %33 : vector<8x96xf32>
    %36 = arith.divf %34, %35 : vector<8x96xf32>
    %37 = vector.extract_strided_slice %30 {offsets = [0, 96], sizes = [8, 32], strides = [1, 1]} : vector<8x128xf32> to vector<8x32xf32>
    %38 = math.tanh %37 : vector<8x32xf32>
    %39 = vector.extract_strided_slice %36 {offsets = [0, 0], sizes = [8, 32], strides = [1, 1]} : vector<8x96xf32> to vector<8x32xf32>
    %40 = vector.extract_strided_slice %36 {offsets = [0, 32], sizes = [8, 32], strides = [1, 1]} : vector<8x96xf32> to vector<8x32xf32>
    %41 = vector.extract_strided_slice %36 {offsets = [0, 64], sizes = [8, 32], strides = [1, 1]} : vector<8x96xf32> to vector<8x32xf32>
    %42 = arith.mulf %40, %27 : vector<8x32xf32>
    %43 = arith.mulf %39, %38 : vector<8x32xf32>
    %44 = arith.addf %42, %43 : vector<8x32xf32>
    %45 = math.tanh %44 : vector<8x32xf32>
    %46 = arith.mulf %41, %45 : vector<8x32xf32>
    %c0_32 = arith.constant 0 : index
    %c0_33 = arith.constant 0 : index
    %47 = vector.load %arg15[%c0_32, %c0_33] : memref<64x32xf32, #tpu.memory_space<vmem>>, vector<8x32xf32>
    tpu.vector_store %arg15[%c0_32, %c0_33], %46 {strides = array<i32>} : memref<64x32xf32, #tpu.memory_space<vmem>>, vector<8x32xf32>,
    %48 = vector.extract_strided_slice %25 {offsets = [8, 0], sizes = [8, 128], strides = [1, 1]} : vector<64x256xf32> to vector<8x128xf32>
    %cst_34 = arith.constant dense<0.000000e+00> : vector<8x128xf32>
    %49 = tpu.matmul %46, %4, %cst_34 {dimension_numbers = #tpu.dot_dimension_numbers<[1], [0], [0], [1], [0, 0, 1, 1], [], []>} : vector<8x32xf32>, vector<32x128xf32>, vector<8x128xf32> -> vector<8x128xf32>
    %50 = arith.addf %48, %49 : vector<8x128xf32>
    %51 = vector.extract_strided_slice %50 {offsets = [0, 0], sizes = [8, 96], strides = [1, 1]} : vector<8x128xf32> to vector<8x96xf32>
    %52 = arith.negf %51 : vector<8x96xf32>
    %53 = math.exp %52 : vector<8x96xf32>
    %cst_35 = arith.constant 1.000000e+00 : f32
    %54 = vector.broadcast %cst_35 : f32 to vector<8x96xf32>
    %55 = arith.addf %54, %53 : vector<8x96xf32>
    %56 = arith.divf %54, %55 : vector<8x96xf32>
    %57 = vector.extract_strided_slice %50 {offsets = [0, 96], sizes = [8, 32], strides = [1, 1]} : vector<8x128xf32> to vector<8x32xf32>
    %58 = math.tanh %57 : vector<8x32xf32>
    %59 = vector.extract_strided_slice %56 {offsets = [0, 0], sizes = [8, 32], strides = [1, 1]} : vector<8x96xf32> to vector<8x32xf32>
    %60 = vector.extract_strided_slice %56 {offsets = [0, 32], sizes = [8, 32], strides = [1, 1]} : vector<8x96xf32> to vector<8x32xf32>
    %61 = vector.extract_strided_slice %56 {offsets = [0, 64], sizes = [8, 32], strides = [1, 1]} : vector<8x96xf32> to vector<8x32xf32>
    %62 = arith.mulf %60, %44 : vector<8x32xf32>
    %63 = arith.mulf %59, %58 : vector<8x32xf32>
    %64 = arith.addf %62, %63 : vector<8x32xf32>
    %65 = math.tanh %64 : vector<8x32xf32>
    %66 = arith.mulf %61, %65 : vector<8x32xf32>
    %c8 = arith.constant 8 : index
    %c0_36 = arith.constant 0 : index
    %67 = vector.load %arg15[%c8, %c0_36] : memref<64x32xf32, #tpu.memory_space<vmem>>, vector<8x32xf32>
    tpu.vector_store %arg15[%c8, %c0_36], %66 {strides = array<i32>} : memref<64x32xf32, #tpu.memory_space<vmem>>, vector<8x32xf32>,
    %68 = vector.extract_strided_slice %25 {offsets = [16, 0], sizes = [8, 128], strides = [1, 1]} : vector<64x256xf32> to vector<8x128xf32>
    %cst_37 = arith.constant dense<0.000000e+00> : vector<8x128xf32>
    %69 = tpu.matmul %66, %4, %cst_37 {dimension_numbers = #tpu.dot_dimension_numbers<[1], [0], [0], [1], [0, 0, 1, 1], [], []>} : vector<8x32xf32>, vector<32x128xf32>, vector<8x128xf32> -> vector<8x128xf32>
    %70 = arith.addf %68, %69 : vector<8x128xf32>
    %71 = vector.extract_strided_slice %70 {offsets = [0, 0], sizes = [8, 96], strides = [1, 1]} : vector<8x128xf32> to vector<8x96xf32>
    %72 = arith.negf %71 : vector<8x96xf32>
    %73 = math.exp %72 : vector<8x96xf32>
    %cst_38 = arith.constant 1.000000e+00 : f32
    %74 = vector.broadcast %cst_38 : f32 to vector<8x96xf32>
    %75 = arith.addf %74, %73 : vector<8x96xf32>
    %76 = arith.divf %74, %75 : vector<8x96xf32>
    %77 = vector.extract_strided_slice %70 {offsets = [0, 96], sizes = [8, 32], strides = [1, 1]} : vector<8x128xf32> to vector<8x32xf32>
    %78 = math.tanh %77 : vector<8x32xf32>
    %79 = vector.extract_strided_slice %76 {offsets = [0, 0], sizes = [8, 32], strides = [1, 1]} : vector<8x96xf32> to vector<8x32xf32>
    %80 = vector.extract_strided_slice %76 {offsets = [0, 32], sizes = [8, 32], strides = [1, 1]} : vector<8x96xf32> to vector<8x32xf32>
    %81 = vector.extract_strided_slice %76 {offsets = [0, 64], sizes = [8, 32], strides = [1, 1]} : vector<8x96xf32> to vector<8x32xf32>
    %82 = arith.mulf %80, %64 : vector<8x32xf32>
    %83 = arith.mulf %79, %78 : vector<8x32xf32>
    %84 = arith.addf %82, %83 : vector<8x32xf32>
    %85 = math.tanh %84 : vector<8x32xf32>
    %86 = arith.mulf %81, %85 : vector<8x32xf32>
    %c16 = arith.constant 16 : index
    %c0_39 = arith.constant 0 : index
    %87 = vector.load %arg15[%c16, %c0_39] : memref<64x32xf32, #tpu.memory_space<vmem>>, vector<8x32xf32>
    tpu.vector_store %arg15[%c16, %c0_39], %86 {strides = array<i32>} : memref<64x32xf32, #tpu.memory_space<vmem>>, vector<8x32xf32>,
    %88 = vector.extract_strided_slice %25 {offsets = [24, 0], sizes = [8, 128], strides = [1, 1]} : vector<64x256xf32> to vector<8x128xf32>
    %cst_40 = arith.constant dense<0.000000e+00> : vector<8x128xf32>
    %89 = tpu.matmul %86, %4, %cst_40 {dimension_numbers = #tpu.dot_dimension_numbers<[1], [0], [0], [1], [0, 0, 1, 1], [], []>} : vector<8x32xf32>, vector<32x128xf32>, vector<8x128xf32> -> vector<8x128xf32>
    %90 = arith.addf %88, %89 : vector<8x128xf32>
    %91 = vector.extract_strided_slice %90 {offsets = [0, 0], sizes = [8, 96], strides = [1, 1]} : vector<8x128xf32> to vector<8x96xf32>
    %92 = arith.negf %91 : vector<8x96xf32>
    %93 = math.exp %92 : vector<8x96xf32>
    %cst_41 = arith.constant 1.000000e+00 : f32
    %94 = vector.broadcast %cst_41 : f32 to vector<8x96xf32>
    %95 = arith.addf %94, %93 : vector<8x96xf32>
    %96 = arith.divf %94, %95 : vector<8x96xf32>
    %97 = vector.extract_strided_slice %90 {offsets = [0, 96], sizes = [8, 32], strides = [1, 1]} : vector<8x128xf32> to vector<8x32xf32>
    %98 = math.tanh %97 : vector<8x32xf32>
    %99 = vector.extract_strided_slice %96 {offsets = [0, 0], sizes = [8, 32], strides = [1, 1]} : vector<8x96xf32> to vector<8x32xf32>
    %100 = vector.extract_strided_slice %96 {offsets = [0, 32], sizes = [8, 32], strides = [1, 1]} : vector<8x96xf32> to vector<8x32xf32>
    %101 = vector.extract_strided_slice %96 {offsets = [0, 64], sizes = [8, 32], strides = [1, 1]} : vector<8x96xf32> to vector<8x32xf32>
    %102 = arith.mulf %100, %84 : vector<8x32xf32>
    %103 = arith.mulf %99, %98 : vector<8x32xf32>
    %104 = arith.addf %102, %103 : vector<8x32xf32>
    %105 = math.tanh %104 : vector<8x32xf32>
    %106 = arith.mulf %101, %105 : vector<8x32xf32>
    %c24 = arith.constant 24 : index
    %c0_42 = arith.constant 0 : index
    %107 = vector.load %arg15[%c24, %c0_42] : memref<64x32xf32, #tpu.memory_space<vmem>>, vector<8x32xf32>
    tpu.vector_store %arg15[%c24, %c0_42], %106 {strides = array<i32>} : memref<64x32xf32, #tpu.memory_space<vmem>>, vector<8x32xf32>,
    %108 = vector.extract_strided_slice %25 {offsets = [32, 0], sizes = [8, 128], strides = [1, 1]} : vector<64x256xf32> to vector<8x128xf32>
    %cst_43 = arith.constant dense<0.000000e+00> : vector<8x128xf32>
    %109 = tpu.matmul %106, %4, %cst_43 {dimension_numbers = #tpu.dot_dimension_numbers<[1], [0], [0], [1], [0, 0, 1, 1], [], []>} : vector<8x32xf32>, vector<32x128xf32>, vector<8x128xf32> -> vector<8x128xf32>
    %110 = arith.addf %108, %109 : vector<8x128xf32>
    %111 = vector.extract_strided_slice %110 {offsets = [0, 0], sizes = [8, 96], strides = [1, 1]} : vector<8x128xf32> to vector<8x96xf32>
    %112 = arith.negf %111 : vector<8x96xf32>
    %113 = math.exp %112 : vector<8x96xf32>
    %cst_44 = arith.constant 1.000000e+00 : f32
    %114 = vector.broadcast %cst_44 : f32 to vector<8x96xf32>
    %115 = arith.addf %114, %113 : vector<8x96xf32>
    %116 = arith.divf %114, %115 : vector<8x96xf32>
    %117 = vector.extract_strided_slice %110 {offsets = [0, 96], sizes = [8, 32], strides = [1, 1]} : vector<8x128xf32> to vector<8x32xf32>
    %118 = math.tanh %117 : vector<8x32xf32>
    %119 = vector.extract_strided_slice %116 {offsets = [0, 0], sizes = [8, 32], strides = [1, 1]} : vector<8x96xf32> to vector<8x32xf32>
    %120 = vector.extract_strided_slice %116 {offsets = [0, 32], sizes = [8, 32], strides = [1, 1]} : vector<8x96xf32> to vector<8x32xf32>
    %121 = vector.extract_strided_slice %116 {offsets = [0, 64], sizes = [8, 32], strides = [1, 1]} : vector<8x96xf32> to vector<8x32xf32>
    %122 = arith.mulf %120, %104 : vector<8x32xf32>
    %123 = arith.mulf %119, %118 : vector<8x32xf32>
    %124 = arith.addf %122, %123 : vector<8x32xf32>
    %125 = math.tanh %124 : vector<8x32xf32>
    %126 = arith.mulf %121, %125 : vector<8x32xf32>
    %c32 = arith.constant 32 : index
    %c0_45 = arith.constant 0 : index
    %127 = vector.load %arg15[%c32, %c0_45] : memref<64x32xf32, #tpu.memory_space<vmem>>, vector<8x32xf32>
    tpu.vector_store %arg15[%c32, %c0_45], %126 {strides = array<i32>} : memref<64x32xf32, #tpu.memory_space<vmem>>, vector<8x32xf32>,
    %128 = vector.extract_strided_slice %25 {offsets = [40, 0], sizes = [8, 128], strides = [1, 1]} : vector<64x256xf32> to vector<8x128xf32>
    %cst_46 = arith.constant dense<0.000000e+00> : vector<8x128xf32>
    %129 = tpu.matmul %126, %4, %cst_46 {dimension_numbers = #tpu.dot_dimension_numbers<[1], [0], [0], [1], [0, 0, 1, 1], [], []>} : vector<8x32xf32>, vector<32x128xf32>, vector<8x128xf32> -> vector<8x128xf32>
    %130 = arith.addf %128, %129 : vector<8x128xf32>
    %131 = vector.extract_strided_slice %130 {offsets = [0, 0], sizes = [8, 96], strides = [1, 1]} : vector<8x128xf32> to vector<8x96xf32>
    %132 = arith.negf %131 : vector<8x96xf32>
    %133 = math.exp %132 : vector<8x96xf32>
    %cst_47 = arith.constant 1.000000e+00 : f32
    %134 = vector.broadcast %cst_47 : f32 to vector<8x96xf32>
    %135 = arith.addf %134, %133 : vector<8x96xf32>
    %136 = arith.divf %134, %135 : vector<8x96xf32>
    %137 = vector.extract_strided_slice %130 {offsets = [0, 96], sizes = [8, 32], strides = [1, 1]} : vector<8x128xf32> to vector<8x32xf32>
    %138 = math.tanh %137 : vector<8x32xf32>
    %139 = vector.extract_strided_slice %136 {offsets = [0, 0], sizes = [8, 32], strides = [1, 1]} : vector<8x96xf32> to vector<8x32xf32>
    %140 = vector.extract_strided_slice %136 {offsets = [0, 32], sizes = [8, 32], strides = [1, 1]} : vector<8x96xf32> to vector<8x32xf32>
    %141 = vector.extract_strided_slice %136 {offsets = [0, 64], sizes = [8, 32], strides = [1, 1]} : vector<8x96xf32> to vector<8x32xf32>
    %142 = arith.mulf %140, %124 : vector<8x32xf32>
    %143 = arith.mulf %139, %138 : vector<8x32xf32>
    %144 = arith.addf %142, %143 : vector<8x32xf32>
    %145 = math.tanh %144 : vector<8x32xf32>
    %146 = arith.mulf %141, %145 : vector<8x32xf32>
    %c40 = arith.constant 40 : index
    %c0_48 = arith.constant 0 : index
    %147 = vector.load %arg15[%c40, %c0_48] : memref<64x32xf32, #tpu.memory_space<vmem>>, vector<8x32xf32>
    tpu.vector_store %arg15[%c40, %c0_48], %146 {strides = array<i32>} : memref<64x32xf32, #tpu.memory_space<vmem>>, vector<8x32xf32>,
    %148 = vector.extract_strided_slice %25 {offsets = [48, 0], sizes = [8, 128], strides = [1, 1]} : vector<64x256xf32> to vector<8x128xf32>
    %cst_49 = arith.constant dense<0.000000e+00> : vector<8x128xf32>
    %149 = tpu.matmul %146, %4, %cst_49 {dimension_numbers = #tpu.dot_dimension_numbers<[1], [0], [0], [1], [0, 0, 1, 1], [], []>} : vector<8x32xf32>, vector<32x128xf32>, vector<8x128xf32> -> vector<8x128xf32>
    %150 = arith.addf %148, %149 : vector<8x128xf32>
    %151 = vector.extract_strided_slice %150 {offsets = [0, 0], sizes = [8, 96], strides = [1, 1]} : vector<8x128xf32> to vector<8x96xf32>
    %152 = arith.negf %151 : vector<8x96xf32>
    %153 = math.exp %152 : vector<8x96xf32>
    %cst_50 = arith.constant 1.000000e+00 : f32
    %154 = vector.broadcast %cst_50 : f32 to vector<8x96xf32>
    %155 = arith.addf %154, %153 : vector<8x96xf32>
    %156 = arith.divf %154, %155 : vector<8x96xf32>
    %157 = vector.extract_strided_slice %150 {offsets = [0, 96], sizes = [8, 32], strides = [1, 1]} : vector<8x128xf32> to vector<8x32xf32>
    %158 = math.tanh %157 : vector<8x32xf32>
    %159 = vector.extract_strided_slice %156 {offsets = [0, 0], sizes = [8, 32], strides = [1, 1]} : vector<8x96xf32> to vector<8x32xf32>
    %160 = vector.extract_strided_slice %156 {offsets = [0, 32], sizes = [8, 32], strides = [1, 1]} : vector<8x96xf32> to vector<8x32xf32>
    %161 = vector.extract_strided_slice %156 {offsets = [0, 64], sizes = [8, 32], strides = [1, 1]} : vector<8x96xf32> to vector<8x32xf32>
    %162 = arith.mulf %160, %144 : vector<8x32xf32>
    %163 = arith.mulf %159, %158 : vector<8x32xf32>
    %164 = arith.addf %162, %163 : vector<8x32xf32>
    %165 = math.tanh %164 : vector<8x32xf32>
    %166 = arith.mulf %161, %165 : vector<8x32xf32>
    %c48 = arith.constant 48 : index
    %c0_51 = arith.constant 0 : index
    %167 = vector.load %arg15[%c48, %c0_51] : memref<64x32xf32, #tpu.memory_space<vmem>>, vector<8x32xf32>
    tpu.vector_store %arg15[%c48, %c0_51], %166 {strides = array<i32>} : memref<64x32xf32, #tpu.memory_space<vmem>>, vector<8x32xf32>,
    %168 = vector.extract_strided_slice %25 {offsets = [56, 0], sizes = [8, 128], strides = [1, 1]} : vector<64x256xf32> to vector<8x128xf32>
    %cst_52 = arith.constant dense<0.000000e+00> : vector<8x128xf32>
    %169 = tpu.matmul %166, %4, %cst_52 {dimension_numbers = #tpu.dot_dimension_numbers<[1], [0], [0], [1], [0, 0, 1, 1], [], []>} : vector<8x32xf32>, vector<32x128xf32>, vector<8x128xf32> -> vector<8x128xf32>
    %170 = arith.addf %168, %169 : vector<8x128xf32>
    %171 = vector.extract_strided_slice %170 {offsets = [0, 0], sizes = [8, 96], strides = [1, 1]} : vector<8x128xf32> to vector<8x96xf32>
    %172 = arith.negf %171 : vector<8x96xf32>
    %173 = math.exp %172 : vector<8x96xf32>
    %cst_53 = arith.constant 1.000000e+00 : f32
    %174 = vector.broadcast %cst_53 : f32 to vector<8x96xf32>
    %175 = arith.addf %174, %173 : vector<8x96xf32>
    %176 = arith.divf %174, %175 : vector<8x96xf32>
    %177 = vector.extract_strided_slice %170 {offsets = [0, 96], sizes = [8, 32], strides = [1, 1]} : vector<8x128xf32> to vector<8x32xf32>
    %178 = math.tanh %177 : vector<8x32xf32>
    %179 = vector.extract_strided_slice %176 {offsets = [0, 0], sizes = [8, 32], strides = [1, 1]} : vector<8x96xf32> to vector<8x32xf32>
    %180 = vector.extract_strided_slice %176 {offsets = [0, 32], sizes = [8, 32], strides = [1, 1]} : vector<8x96xf32> to vector<8x32xf32>
    %181 = vector.extract_strided_slice %176 {offsets = [0, 64], sizes = [8, 32], strides = [1, 1]} : vector<8x96xf32> to vector<8x32xf32>
    %182 = arith.mulf %180, %164 : vector<8x32xf32>
    %183 = arith.mulf %179, %178 : vector<8x32xf32>
    %184 = arith.addf %182, %183 : vector<8x32xf32>
    %185 = math.tanh %184 : vector<8x32xf32>
    %186 = arith.mulf %181, %185 : vector<8x32xf32>
    %c56 = arith.constant 56 : index
    %c0_54 = arith.constant 0 : index
    %187 = vector.load %arg15[%c56, %c0_54] : memref<64x32xf32, #tpu.memory_space<vmem>>, vector<8x32xf32>
    tpu.vector_store %arg15[%c56, %c0_54], %186 {strides = array<i32>} : memref<64x32xf32, #tpu.memory_space<vmem>>, vector<8x32xf32>,
    %cst_55 = arith.constant 0.000000e+00 : f32
    %188 = vector.broadcast %cst_55 : f32 to vector<8x32xf32>
    %cst_56 = arith.constant 0.000000e+00 : f32
    %189 = vector.broadcast %cst_56 : f32 to vector<8x32xf32>
    %190 = vector.extract_strided_slice %25 {offsets = [56, 128], sizes = [8, 128], strides = [1, 1]} : vector<64x256xf32> to vector<8x128xf32>
    %cst_57 = arith.constant dense<0.000000e+00> : vector<8x128xf32>
    %191 = tpu.matmul %188, %5, %cst_57 {dimension_numbers = #tpu.dot_dimension_numbers<[1], [0], [0], [1], [0, 0, 1, 1], [], []>} : vector<8x32xf32>, vector<32x128xf32>, vector<8x128xf32> -> vector<8x128xf32>
    %192 = arith.addf %190, %191 : vector<8x128xf32>
    %193 = vector.extract_strided_slice %192 {offsets = [0, 0], sizes = [8, 96], strides = [1, 1]} : vector<8x128xf32> to vector<8x96xf32>
    %194 = arith.negf %193 : vector<8x96xf32>
    %195 = math.exp %194 : vector<8x96xf32>
    %cst_58 = arith.constant 1.000000e+00 : f32
    %196 = vector.broadcast %cst_58 : f32 to vector<8x96xf32>
    %197 = arith.addf %196, %195 : vector<8x96xf32>
    %198 = arith.divf %196, %197 : vector<8x96xf32>
    %199 = vector.extract_strided_slice %192 {offsets = [0, 96], sizes = [8, 32], strides = [1, 1]} : vector<8x128xf32> to vector<8x32xf32>
    %200 = math.tanh %199 : vector<8x32xf32>
    %201 = vector.extract_strided_slice %198 {offsets = [0, 0], sizes = [8, 32], strides = [1, 1]} : vector<8x96xf32> to vector<8x32xf32>
    %202 = vector.extract_strided_slice %198 {offsets = [0, 32], sizes = [8, 32], strides = [1, 1]} : vector<8x96xf32> to vector<8x32xf32>
    %203 = vector.extract_strided_slice %198 {offsets = [0, 64], sizes = [8, 32], strides = [1, 1]} : vector<8x96xf32> to vector<8x32xf32>
    %204 = arith.mulf %202, %189 : vector<8x32xf32>
    %205 = arith.mulf %201, %200 : vector<8x32xf32>
    %206 = arith.addf %204, %205 : vector<8x32xf32>
    %207 = math.tanh %206 : vector<8x32xf32>
    %208 = arith.mulf %203, %207 : vector<8x32xf32>
    %c56_59 = arith.constant 56 : index
    %c0_60 = arith.constant 0 : index
    %209 = vector.load %arg16[%c56_59, %c0_60] : memref<64x32xf32, #tpu.memory_space<vmem>>, vector<8x32xf32>
    tpu.vector_store %arg16[%c56_59, %c0_60], %208 {strides = array<i32>} : memref<64x32xf32, #tpu.memory_space<vmem>>, vector<8x32xf32>,
    %210 = vector.extract_strided_slice %25 {offsets = [48, 128], sizes = [8, 128], strides = [1, 1]} : vector<64x256xf32> to vector<8x128xf32>
    %cst_61 = arith.constant dense<0.000000e+00> : vector<8x128xf32>
    %211 = tpu.matmul %208, %5, %cst_61 {dimension_numbers = #tpu.dot_dimension_numbers<[1], [0], [0], [1], [0, 0, 1, 1], [], []>} : vector<8x32xf32>, vector<32x128xf32>, vector<8x128xf32> -> vector<8x128xf32>
    %212 = arith.addf %210, %211 : vector<8x128xf32>
    %213 = vector.extract_strided_slice %212 {offsets = [0, 0], sizes = [8, 96], strides = [1, 1]} : vector<8x128xf32> to vector<8x96xf32>
    %214 = arith.negf %213 : vector<8x96xf32>
    %215 = math.exp %214 : vector<8x96xf32>
    %cst_62 = arith.constant 1.000000e+00 : f32
    %216 = vector.broadcast %cst_62 : f32 to vector<8x96xf32>
    %217 = arith.addf %216, %215 : vector<8x96xf32>
    %218 = arith.divf %216, %217 : vector<8x96xf32>
    %219 = vector.extract_strided_slice %212 {offsets = [0, 96], sizes = [8, 32], strides = [1, 1]} : vector<8x128xf32> to vector<8x32xf32>
    %220 = math.tanh %219 : vector<8x32xf32>
    %221 = vector.extract_strided_slice %218 {offsets = [0, 0], sizes = [8, 32], strides = [1, 1]} : vector<8x96xf32> to vector<8x32xf32>
    %222 = vector.extract_strided_slice %218 {offsets = [0, 32], sizes = [8, 32], strides = [1, 1]} : vector<8x96xf32> to vector<8x32xf32>
    %223 = vector.extract_strided_slice %218 {offsets = [0, 64], sizes = [8, 32], strides = [1, 1]} : vector<8x96xf32> to vector<8x32xf32>
    %224 = arith.mulf %222, %206 : vector<8x32xf32>
    %225 = arith.mulf %221, %220 : vector<8x32xf32>
    %226 = arith.addf %224, %225 : vector<8x32xf32>
    %227 = math.tanh %226 : vector<8x32xf32>
    %228 = arith.mulf %223, %227 : vector<8x32xf32>
    %c48_63 = arith.constant 48 : index
    %c0_64 = arith.constant 0 : index
    %229 = vector.load %arg16[%c48_63, %c0_64] : memref<64x32xf32, #tpu.memory_space<vmem>>, vector<8x32xf32>
    tpu.vector_store %arg16[%c48_63, %c0_64], %228 {strides = array<i32>} : memref<64x32xf32, #tpu.memory_space<vmem>>, vector<8x32xf32>,
    %230 = vector.extract_strided_slice %25 {offsets = [40, 128], sizes = [8, 128], strides = [1, 1]} : vector<64x256xf32> to vector<8x128xf32>
    %cst_65 = arith.constant dense<0.000000e+00> : vector<8x128xf32>
    %231 = tpu.matmul %228, %5, %cst_65 {dimension_numbers = #tpu.dot_dimension_numbers<[1], [0], [0], [1], [0, 0, 1, 1], [], []>} : vector<8x32xf32>, vector<32x128xf32>, vector<8x128xf32> -> vector<8x128xf32>
    %232 = arith.addf %230, %231 : vector<8x128xf32>
    %233 = vector.extract_strided_slice %232 {offsets = [0, 0], sizes = [8, 96], strides = [1, 1]} : vector<8x128xf32> to vector<8x96xf32>
    %234 = arith.negf %233 : vector<8x96xf32>
    %235 = math.exp %234 : vector<8x96xf32>
    %cst_66 = arith.constant 1.000000e+00 : f32
    %236 = vector.broadcast %cst_66 : f32 to vector<8x96xf32>
    %237 = arith.addf %236, %235 : vector<8x96xf32>
    %238 = arith.divf %236, %237 : vector<8x96xf32>
    %239 = vector.extract_strided_slice %232 {offsets = [0, 96], sizes = [8, 32], strides = [1, 1]} : vector<8x128xf32> to vector<8x32xf32>
    %240 = math.tanh %239 : vector<8x32xf32>
    %241 = vector.extract_strided_slice %238 {offsets = [0, 0], sizes = [8, 32], strides = [1, 1]} : vector<8x96xf32> to vector<8x32xf32>
    %242 = vector.extract_strided_slice %238 {offsets = [0, 32], sizes = [8, 32], strides = [1, 1]} : vector<8x96xf32> to vector<8x32xf32>
    %243 = vector.extract_strided_slice %238 {offsets = [0, 64], sizes = [8, 32], strides = [1, 1]} : vector<8x96xf32> to vector<8x32xf32>
    %244 = arith.mulf %242, %226 : vector<8x32xf32>
    %245 = arith.mulf %241, %240 : vector<8x32xf32>
    %246 = arith.addf %244, %245 : vector<8x32xf32>
    %247 = math.tanh %246 : vector<8x32xf32>
    %248 = arith.mulf %243, %247 : vector<8x32xf32>
    %c40_67 = arith.constant 40 : index
    %c0_68 = arith.constant 0 : index
    %249 = vector.load %arg16[%c40_67, %c0_68] : memref<64x32xf32, #tpu.memory_space<vmem>>, vector<8x32xf32>
    tpu.vector_store %arg16[%c40_67, %c0_68], %248 {strides = array<i32>} : memref<64x32xf32, #tpu.memory_space<vmem>>, vector<8x32xf32>,
    %250 = vector.extract_strided_slice %25 {offsets = [32, 128], sizes = [8, 128], strides = [1, 1]} : vector<64x256xf32> to vector<8x128xf32>
    %cst_69 = arith.constant dense<0.000000e+00> : vector<8x128xf32>
    %251 = tpu.matmul %248, %5, %cst_69 {dimension_numbers = #tpu.dot_dimension_numbers<[1], [0], [0], [1], [0, 0, 1, 1], [], []>} : vector<8x32xf32>, vector<32x128xf32>, vector<8x128xf32> -> vector<8x128xf32>
    %252 = arith.addf %250, %251 : vector<8x128xf32>
    %253 = vector.extract_strided_slice %252 {offsets = [0, 0], sizes = [8, 96], strides = [1, 1]} : vector<8x128xf32> to vector<8x96xf32>
    %254 = arith.negf %253 : vector<8x96xf32>
    %255 = math.exp %254 : vector<8x96xf32>
    %cst_70 = arith.constant 1.000000e+00 : f32
    %256 = vector.broadcast %cst_70 : f32 to vector<8x96xf32>
    %257 = arith.addf %256, %255 : vector<8x96xf32>
    %258 = arith.divf %256, %257 : vector<8x96xf32>
    %259 = vector.extract_strided_slice %252 {offsets = [0, 96], sizes = [8, 32], strides = [1, 1]} : vector<8x128xf32> to vector<8x32xf32>
    %260 = math.tanh %259 : vector<8x32xf32>
    %261 = vector.extract_strided_slice %258 {offsets = [0, 0], sizes = [8, 32], strides = [1, 1]} : vector<8x96xf32> to vector<8x32xf32>
    %262 = vector.extract_strided_slice %258 {offsets = [0, 32], sizes = [8, 32], strides = [1, 1]} : vector<8x96xf32> to vector<8x32xf32>
    %263 = vector.extract_strided_slice %258 {offsets = [0, 64], sizes = [8, 32], strides = [1, 1]} : vector<8x96xf32> to vector<8x32xf32>
    %264 = arith.mulf %262, %246 : vector<8x32xf32>
    %265 = arith.mulf %261, %260 : vector<8x32xf32>
    %266 = arith.addf %264, %265 : vector<8x32xf32>
    %267 = math.tanh %266 : vector<8x32xf32>
    %268 = arith.mulf %263, %267 : vector<8x32xf32>
    %c32_71 = arith.constant 32 : index
    %c0_72 = arith.constant 0 : index
    %269 = vector.load %arg16[%c32_71, %c0_72] : memref<64x32xf32, #tpu.memory_space<vmem>>, vector<8x32xf32>
    tpu.vector_store %arg16[%c32_71, %c0_72], %268 {strides = array<i32>} : memref<64x32xf32, #tpu.memory_space<vmem>>, vector<8x32xf32>,
    %270 = vector.extract_strided_slice %25 {offsets = [24, 128], sizes = [8, 128], strides = [1, 1]} : vector<64x256xf32> to vector<8x128xf32>
    %cst_73 = arith.constant dense<0.000000e+00> : vector<8x128xf32>
    %271 = tpu.matmul %268, %5, %cst_73 {dimension_numbers = #tpu.dot_dimension_numbers<[1], [0], [0], [1], [0, 0, 1, 1], [], []>} : vector<8x32xf32>, vector<32x128xf32>, vector<8x128xf32> -> vector<8x128xf32>
    %272 = arith.addf %270, %271 : vector<8x128xf32>
    %273 = vector.extract_strided_slice %272 {offsets = [0, 0], sizes = [8, 96], strides = [1, 1]} : vector<8x128xf32> to vector<8x96xf32>
    %274 = arith.negf %273 : vector<8x96xf32>
    %275 = math.exp %274 : vector<8x96xf32>
    %cst_74 = arith.constant 1.000000e+00 : f32
    %276 = vector.broadcast %cst_74 : f32 to vector<8x96xf32>
    %277 = arith.addf %276, %275 : vector<8x96xf32>
    %278 = arith.divf %276, %277 : vector<8x96xf32>
    %279 = vector.extract_strided_slice %272 {offsets = [0, 96], sizes = [8, 32], strides = [1, 1]} : vector<8x128xf32> to vector<8x32xf32>
    %280 = math.tanh %279 : vector<8x32xf32>
    %281 = vector.extract_strided_slice %278 {offsets = [0, 0], sizes = [8, 32], strides = [1, 1]} : vector<8x96xf32> to vector<8x32xf32>
    %282 = vector.extract_strided_slice %278 {offsets = [0, 32], sizes = [8, 32], strides = [1, 1]} : vector<8x96xf32> to vector<8x32xf32>
    %283 = vector.extract_strided_slice %278 {offsets = [0, 64], sizes = [8, 32], strides = [1, 1]} : vector<8x96xf32> to vector<8x32xf32>
    %284 = arith.mulf %282, %266 : vector<8x32xf32>
    %285 = arith.mulf %281, %280 : vector<8x32xf32>
    %286 = arith.addf %284, %285 : vector<8x32xf32>
    %287 = math.tanh %286 : vector<8x32xf32>
    %288 = arith.mulf %283, %287 : vector<8x32xf32>
    %c24_75 = arith.constant 24 : index
    %c0_76 = arith.constant 0 : index
    %289 = vector.load %arg16[%c24_75, %c0_76] : memref<64x32xf32, #tpu.memory_space<vmem>>, vector<8x32xf32>
    tpu.vector_store %arg16[%c24_75, %c0_76], %288 {strides = array<i32>} : memref<64x32xf32, #tpu.memory_space<vmem>>, vector<8x32xf32>,
    %290 = vector.extract_strided_slice %25 {offsets = [16, 128], sizes = [8, 128], strides = [1, 1]} : vector<64x256xf32> to vector<8x128xf32>
    %cst_77 = arith.constant dense<0.000000e+00> : vector<8x128xf32>
    %291 = tpu.matmul %288, %5, %cst_77 {dimension_numbers = #tpu.dot_dimension_numbers<[1], [0], [0], [1], [0, 0, 1, 1], [], []>} : vector<8x32xf32>, vector<32x128xf32>, vector<8x128xf32> -> vector<8x128xf32>
    %292 = arith.addf %290, %291 : vector<8x128xf32>
    %293 = vector.extract_strided_slice %292 {offsets = [0, 0], sizes = [8, 96], strides = [1, 1]} : vector<8x128xf32> to vector<8x96xf32>
    %294 = arith.negf %293 : vector<8x96xf32>
    %295 = math.exp %294 : vector<8x96xf32>
    %cst_78 = arith.constant 1.000000e+00 : f32
    %296 = vector.broadcast %cst_78 : f32 to vector<8x96xf32>
    %297 = arith.addf %296, %295 : vector<8x96xf32>
    %298 = arith.divf %296, %297 : vector<8x96xf32>
    %299 = vector.extract_strided_slice %292 {offsets = [0, 96], sizes = [8, 32], strides = [1, 1]} : vector<8x128xf32> to vector<8x32xf32>
    %300 = math.tanh %299 : vector<8x32xf32>
    %301 = vector.extract_strided_slice %298 {offsets = [0, 0], sizes = [8, 32], strides = [1, 1]} : vector<8x96xf32> to vector<8x32xf32>
    %302 = vector.extract_strided_slice %298 {offsets = [0, 32], sizes = [8, 32], strides = [1, 1]} : vector<8x96xf32> to vector<8x32xf32>
    %303 = vector.extract_strided_slice %298 {offsets = [0, 64], sizes = [8, 32], strides = [1, 1]} : vector<8x96xf32> to vector<8x32xf32>
    %304 = arith.mulf %302, %286 : vector<8x32xf32>
    %305 = arith.mulf %301, %300 : vector<8x32xf32>
    %306 = arith.addf %304, %305 : vector<8x32xf32>
    %307 = math.tanh %306 : vector<8x32xf32>
    %308 = arith.mulf %303, %307 : vector<8x32xf32>
    %c16_79 = arith.constant 16 : index
    %c0_80 = arith.constant 0 : index
    %309 = vector.load %arg16[%c16_79, %c0_80] : memref<64x32xf32, #tpu.memory_space<vmem>>, vector<8x32xf32>
    tpu.vector_store %arg16[%c16_79, %c0_80], %308 {strides = array<i32>} : memref<64x32xf32, #tpu.memory_space<vmem>>, vector<8x32xf32>,
    %310 = vector.extract_strided_slice %25 {offsets = [8, 128], sizes = [8, 128], strides = [1, 1]} : vector<64x256xf32> to vector<8x128xf32>
    %cst_81 = arith.constant dense<0.000000e+00> : vector<8x128xf32>
    %311 = tpu.matmul %308, %5, %cst_81 {dimension_numbers = #tpu.dot_dimension_numbers<[1], [0], [0], [1], [0, 0, 1, 1], [], []>} : vector<8x32xf32>, vector<32x128xf32>, vector<8x128xf32> -> vector<8x128xf32>
    %312 = arith.addf %310, %311 : vector<8x128xf32>
    %313 = vector.extract_strided_slice %312 {offsets = [0, 0], sizes = [8, 96], strides = [1, 1]} : vector<8x128xf32> to vector<8x96xf32>
    %314 = arith.negf %313 : vector<8x96xf32>
    %315 = math.exp %314 : vector<8x96xf32>
    %cst_82 = arith.constant 1.000000e+00 : f32
    %316 = vector.broadcast %cst_82 : f32 to vector<8x96xf32>
    %317 = arith.addf %316, %315 : vector<8x96xf32>
    %318 = arith.divf %316, %317 : vector<8x96xf32>
    %319 = vector.extract_strided_slice %312 {offsets = [0, 96], sizes = [8, 32], strides = [1, 1]} : vector<8x128xf32> to vector<8x32xf32>
    %320 = math.tanh %319 : vector<8x32xf32>
    %321 = vector.extract_strided_slice %318 {offsets = [0, 0], sizes = [8, 32], strides = [1, 1]} : vector<8x96xf32> to vector<8x32xf32>
    %322 = vector.extract_strided_slice %318 {offsets = [0, 32], sizes = [8, 32], strides = [1, 1]} : vector<8x96xf32> to vector<8x32xf32>
    %323 = vector.extract_strided_slice %318 {offsets = [0, 64], sizes = [8, 32], strides = [1, 1]} : vector<8x96xf32> to vector<8x32xf32>
    %324 = arith.mulf %322, %306 : vector<8x32xf32>
    %325 = arith.mulf %321, %320 : vector<8x32xf32>
    %326 = arith.addf %324, %325 : vector<8x32xf32>
    %327 = math.tanh %326 : vector<8x32xf32>
    %328 = arith.mulf %323, %327 : vector<8x32xf32>
    %c8_83 = arith.constant 8 : index
    %c0_84 = arith.constant 0 : index
    %329 = vector.load %arg16[%c8_83, %c0_84] : memref<64x32xf32, #tpu.memory_space<vmem>>, vector<8x32xf32>
    tpu.vector_store %arg16[%c8_83, %c0_84], %328 {strides = array<i32>} : memref<64x32xf32, #tpu.memory_space<vmem>>, vector<8x32xf32>,
    %330 = vector.extract_strided_slice %25 {offsets = [0, 128], sizes = [8, 128], strides = [1, 1]} : vector<64x256xf32> to vector<8x128xf32>
    %cst_85 = arith.constant dense<0.000000e+00> : vector<8x128xf32>
    %331 = tpu.matmul %328, %5, %cst_85 {dimension_numbers = #tpu.dot_dimension_numbers<[1], [0], [0], [1], [0, 0, 1, 1], [], []>} : vector<8x32xf32>, vector<32x128xf32>, vector<8x128xf32> -> vector<8x128xf32>
    %332 = arith.addf %330, %331 : vector<8x128xf32>
    %333 = vector.extract_strided_slice %332 {offsets = [0, 0], sizes = [8, 96], strides = [1, 1]} : vector<8x128xf32> to vector<8x96xf32>
    %334 = arith.negf %333 : vector<8x96xf32>
    %335 = math.exp %334 : vector<8x96xf32>
    %cst_86 = arith.constant 1.000000e+00 : f32
    %336 = vector.broadcast %cst_86 : f32 to vector<8x96xf32>
    %337 = arith.addf %336, %335 : vector<8x96xf32>
    %338 = arith.divf %336, %337 : vector<8x96xf32>
    %339 = vector.extract_strided_slice %332 {offsets = [0, 96], sizes = [8, 32], strides = [1, 1]} : vector<8x128xf32> to vector<8x32xf32>
    %340 = math.tanh %339 : vector<8x32xf32>
    %341 = vector.extract_strided_slice %338 {offsets = [0, 0], sizes = [8, 32], strides = [1, 1]} : vector<8x96xf32> to vector<8x32xf32>
    %342 = vector.extract_strided_slice %338 {offsets = [0, 32], sizes = [8, 32], strides = [1, 1]} : vector<8x96xf32> to vector<8x32xf32>
    %343 = vector.extract_strided_slice %338 {offsets = [0, 64], sizes = [8, 32], strides = [1, 1]} : vector<8x96xf32> to vector<8x32xf32>
    %344 = arith.mulf %342, %326 : vector<8x32xf32>
    %345 = arith.mulf %341, %340 : vector<8x32xf32>
    %346 = arith.addf %344, %345 : vector<8x32xf32>
    %347 = math.tanh %346 : vector<8x32xf32>
    %348 = arith.mulf %343, %347 : vector<8x32xf32>
    %c0_87 = arith.constant 0 : index
    %c0_88 = arith.constant 0 : index
    %349 = vector.load %arg16[%c0_87, %c0_88] : memref<64x32xf32, #tpu.memory_space<vmem>>, vector<8x32xf32>
    tpu.vector_store %arg16[%c0_87, %c0_88], %348 {strides = array<i32>} : memref<64x32xf32, #tpu.memory_space<vmem>>, vector<8x32xf32>,
    %c0_89 = arith.constant 0 : index
    %c0_90 = arith.constant 0 : index
    %350 = vector.load %arg15[%c0_89, %c0_90] : memref<64x32xf32, #tpu.memory_space<vmem>>, vector<64x32xf32>
    %c0_91 = arith.constant 0 : index
    %c0_92 = arith.constant 0 : index
    %351 = vector.load %arg16[%c0_91, %c0_92] : memref<64x32xf32, #tpu.memory_space<vmem>>, vector<64x32xf32>
    %352 = tpu.concatenate %350, %351 in 1 : vector<64x32xf32>, vector<64x32xf32> -> vector<64x64xf32>
    %cst_93 = arith.constant dense<0.000000e+00> : vector<64x256xf32>
    %353 = tpu.matmul %352, %6, %cst_93 {dimension_numbers = #tpu.dot_dimension_numbers<[1], [0], [0], [1], [0, 0, 1, 1], [], []>} : vector<64x64xf32>, vector<64x256xf32>, vector<64x256xf32> -> vector<64x256xf32>
    %354 = vector.broadcast %7 : vector<1x256xf32> to vector<64x256xf32>
    %355 = arith.addf %353, %354 : vector<64x256xf32>
    %cst_94 = arith.constant 0.000000e+00 : f32
    %356 = vector.broadcast %cst_94 : f32 to vector<8x32xf32>
    %cst_95 = arith.constant 0.000000e+00 : f32
    %357 = vector.broadcast %cst_95 : f32 to vector<8x32xf32>
    %358 = vector.extract_strided_slice %355 {offsets = [0, 0], sizes = [8, 128], strides = [1, 1]} : vector<64x256xf32> to vector<8x128xf32>
    %cst_96 = arith.constant dense<0.000000e+00> : vector<8x128xf32>
    %359 = tpu.matmul %356, %8, %cst_96 {dimension_numbers = #tpu.dot_dimension_numbers<[1], [0], [0], [1], [0, 0, 1, 1], [], []>} : vector<8x32xf32>, vector<32x128xf32>, vector<8x128xf32> -> vector<8x128xf32>
    %360 = arith.addf %358, %359 : vector<8x128xf32>
    %361 = vector.extract_strided_slice %360 {offsets = [0, 0], sizes = [8, 96], strides = [1, 1]} : vector<8x128xf32> to vector<8x96xf32>
    %362 = arith.negf %361 : vector<8x96xf32>
    %363 = math.exp %362 : vector<8x96xf32>
    %cst_97 = arith.constant 1.000000e+00 : f32
    %364 = vector.broadcast %cst_97 : f32 to vector<8x96xf32>
    %365 = arith.addf %364, %363 : vector<8x96xf32>
    %366 = arith.divf %364, %365 : vector<8x96xf32>
    %367 = vector.extract_strided_slice %360 {offsets = [0, 96], sizes = [8, 32], strides = [1, 1]} : vector<8x128xf32> to vector<8x32xf32>
    %368 = math.tanh %367 : vector<8x32xf32>
    %369 = vector.extract_strided_slice %366 {offsets = [0, 0], sizes = [8, 32], strides = [1, 1]} : vector<8x96xf32> to vector<8x32xf32>
    %370 = vector.extract_strided_slice %366 {offsets = [0, 32], sizes = [8, 32], strides = [1, 1]} : vector<8x96xf32> to vector<8x32xf32>
    %371 = vector.extract_strided_slice %366 {offsets = [0, 64], sizes = [8, 32], strides = [1, 1]} : vector<8x96xf32> to vector<8x32xf32>
    %372 = arith.mulf %370, %357 : vector<8x32xf32>
    %373 = arith.mulf %369, %368 : vector<8x32xf32>
    %374 = arith.addf %372, %373 : vector<8x32xf32>
    %375 = math.tanh %374 : vector<8x32xf32>
    %376 = arith.mulf %371, %375 : vector<8x32xf32>
    %c0_98 = arith.constant 0 : index
    %c0_99 = arith.constant 0 : index
    %377 = vector.load %arg15[%c0_98, %c0_99] : memref<64x32xf32, #tpu.memory_space<vmem>>, vector<8x32xf32>
    tpu.vector_store %arg15[%c0_98, %c0_99], %376 {strides = array<i32>} : memref<64x32xf32, #tpu.memory_space<vmem>>, vector<8x32xf32>,
    %378 = vector.extract_strided_slice %355 {offsets = [8, 0], sizes = [8, 128], strides = [1, 1]} : vector<64x256xf32> to vector<8x128xf32>
    %cst_100 = arith.constant dense<0.000000e+00> : vector<8x128xf32>
    %379 = tpu.matmul %376, %8, %cst_100 {dimension_numbers = #tpu.dot_dimension_numbers<[1], [0], [0], [1], [0, 0, 1, 1], [], []>} : vector<8x32xf32>, vector<32x128xf32>, vector<8x128xf32> -> vector<8x128xf32>
    %380 = arith.addf %378, %379 : vector<8x128xf32>
    %381 = vector.extract_strided_slice %380 {offsets = [0, 0], sizes = [8, 96], strides = [1, 1]} : vector<8x128xf32> to vector<8x96xf32>
    %382 = arith.negf %381 : vector<8x96xf32>
    %383 = math.exp %382 : vector<8x96xf32>
    %cst_101 = arith.constant 1.000000e+00 : f32
    %384 = vector.broadcast %cst_101 : f32 to vector<8x96xf32>
    %385 = arith.addf %384, %383 : vector<8x96xf32>
    %386 = arith.divf %384, %385 : vector<8x96xf32>
    %387 = vector.extract_strided_slice %380 {offsets = [0, 96], sizes = [8, 32], strides = [1, 1]} : vector<8x128xf32> to vector<8x32xf32>
    %388 = math.tanh %387 : vector<8x32xf32>
    %389 = vector.extract_strided_slice %386 {offsets = [0, 0], sizes = [8, 32], strides = [1, 1]} : vector<8x96xf32> to vector<8x32xf32>
    %390 = vector.extract_strided_slice %386 {offsets = [0, 32], sizes = [8, 32], strides = [1, 1]} : vector<8x96xf32> to vector<8x32xf32>
    %391 = vector.extract_strided_slice %386 {offsets = [0, 64], sizes = [8, 32], strides = [1, 1]} : vector<8x96xf32> to vector<8x32xf32>
    %392 = arith.mulf %390, %374 : vector<8x32xf32>
    %393 = arith.mulf %389, %388 : vector<8x32xf32>
    %394 = arith.addf %392, %393 : vector<8x32xf32>
    %395 = math.tanh %394 : vector<8x32xf32>
    %396 = arith.mulf %391, %395 : vector<8x32xf32>
    %c8_102 = arith.constant 8 : index
    %c0_103 = arith.constant 0 : index
    %397 = vector.load %arg15[%c8_102, %c0_103] : memref<64x32xf32, #tpu.memory_space<vmem>>, vector<8x32xf32>
    tpu.vector_store %arg15[%c8_102, %c0_103], %396 {strides = array<i32>} : memref<64x32xf32, #tpu.memory_space<vmem>>, vector<8x32xf32>,
    %398 = vector.extract_strided_slice %355 {offsets = [16, 0], sizes = [8, 128], strides = [1, 1]} : vector<64x256xf32> to vector<8x128xf32>
    %cst_104 = arith.constant dense<0.000000e+00> : vector<8x128xf32>
    %399 = tpu.matmul %396, %8, %cst_104 {dimension_numbers = #tpu.dot_dimension_numbers<[1], [0], [0], [1], [0, 0, 1, 1], [], []>} : vector<8x32xf32>, vector<32x128xf32>, vector<8x128xf32> -> vector<8x128xf32>
    %400 = arith.addf %398, %399 : vector<8x128xf32>
    %401 = vector.extract_strided_slice %400 {offsets = [0, 0], sizes = [8, 96], strides = [1, 1]} : vector<8x128xf32> to vector<8x96xf32>
    %402 = arith.negf %401 : vector<8x96xf32>
    %403 = math.exp %402 : vector<8x96xf32>
    %cst_105 = arith.constant 1.000000e+00 : f32
    %404 = vector.broadcast %cst_105 : f32 to vector<8x96xf32>
    %405 = arith.addf %404, %403 : vector<8x96xf32>
    %406 = arith.divf %404, %405 : vector<8x96xf32>
    %407 = vector.extract_strided_slice %400 {offsets = [0, 96], sizes = [8, 32], strides = [1, 1]} : vector<8x128xf32> to vector<8x32xf32>
    %408 = math.tanh %407 : vector<8x32xf32>
    %409 = vector.extract_strided_slice %406 {offsets = [0, 0], sizes = [8, 32], strides = [1, 1]} : vector<8x96xf32> to vector<8x32xf32>
    %410 = vector.extract_strided_slice %406 {offsets = [0, 32], sizes = [8, 32], strides = [1, 1]} : vector<8x96xf32> to vector<8x32xf32>
    %411 = vector.extract_strided_slice %406 {offsets = [0, 64], sizes = [8, 32], strides = [1, 1]} : vector<8x96xf32> to vector<8x32xf32>
    %412 = arith.mulf %410, %394 : vector<8x32xf32>
    %413 = arith.mulf %409, %408 : vector<8x32xf32>
    %414 = arith.addf %412, %413 : vector<8x32xf32>
    %415 = math.tanh %414 : vector<8x32xf32>
    %416 = arith.mulf %411, %415 : vector<8x32xf32>
    %c16_106 = arith.constant 16 : index
    %c0_107 = arith.constant 0 : index
    %417 = vector.load %arg15[%c16_106, %c0_107] : memref<64x32xf32, #tpu.memory_space<vmem>>, vector<8x32xf32>
    tpu.vector_store %arg15[%c16_106, %c0_107], %416 {strides = array<i32>} : memref<64x32xf32, #tpu.memory_space<vmem>>, vector<8x32xf32>,
    %418 = vector.extract_strided_slice %355 {offsets = [24, 0], sizes = [8, 128], strides = [1, 1]} : vector<64x256xf32> to vector<8x128xf32>
    %cst_108 = arith.constant dense<0.000000e+00> : vector<8x128xf32>
    %419 = tpu.matmul %416, %8, %cst_108 {dimension_numbers = #tpu.dot_dimension_numbers<[1], [0], [0], [1], [0, 0, 1, 1], [], []>} : vector<8x32xf32>, vector<32x128xf32>, vector<8x128xf32> -> vector<8x128xf32>
    %420 = arith.addf %418, %419 : vector<8x128xf32>
    %421 = vector.extract_strided_slice %420 {offsets = [0, 0], sizes = [8, 96], strides = [1, 1]} : vector<8x128xf32> to vector<8x96xf32>
    %422 = arith.negf %421 : vector<8x96xf32>
    %423 = math.exp %422 : vector<8x96xf32>
    %cst_109 = arith.constant 1.000000e+00 : f32
    %424 = vector.broadcast %cst_109 : f32 to vector<8x96xf32>
    %425 = arith.addf %424, %423 : vector<8x96xf32>
    %426 = arith.divf %424, %425 : vector<8x96xf32>
    %427 = vector.extract_strided_slice %420 {offsets = [0, 96], sizes = [8, 32], strides = [1, 1]} : vector<8x128xf32> to vector<8x32xf32>
    %428 = math.tanh %427 : vector<8x32xf32>
    %429 = vector.extract_strided_slice %426 {offsets = [0, 0], sizes = [8, 32], strides = [1, 1]} : vector<8x96xf32> to vector<8x32xf32>
    %430 = vector.extract_strided_slice %426 {offsets = [0, 32], sizes = [8, 32], strides = [1, 1]} : vector<8x96xf32> to vector<8x32xf32>
    %431 = vector.extract_strided_slice %426 {offsets = [0, 64], sizes = [8, 32], strides = [1, 1]} : vector<8x96xf32> to vector<8x32xf32>
    %432 = arith.mulf %430, %414 : vector<8x32xf32>
    %433 = arith.mulf %429, %428 : vector<8x32xf32>
    %434 = arith.addf %432, %433 : vector<8x32xf32>
    %435 = math.tanh %434 : vector<8x32xf32>
    %436 = arith.mulf %431, %435 : vector<8x32xf32>
    %c24_110 = arith.constant 24 : index
    %c0_111 = arith.constant 0 : index
    %437 = vector.load %arg15[%c24_110, %c0_111] : memref<64x32xf32, #tpu.memory_space<vmem>>, vector<8x32xf32>
    tpu.vector_store %arg15[%c24_110, %c0_111], %436 {strides = array<i32>} : memref<64x32xf32, #tpu.memory_space<vmem>>, vector<8x32xf32>,
    %438 = vector.extract_strided_slice %355 {offsets = [32, 0], sizes = [8, 128], strides = [1, 1]} : vector<64x256xf32> to vector<8x128xf32>
    %cst_112 = arith.constant dense<0.000000e+00> : vector<8x128xf32>
    %439 = tpu.matmul %436, %8, %cst_112 {dimension_numbers = #tpu.dot_dimension_numbers<[1], [0], [0], [1], [0, 0, 1, 1], [], []>} : vector<8x32xf32>, vector<32x128xf32>, vector<8x128xf32> -> vector<8x128xf32>
    %440 = arith.addf %438, %439 : vector<8x128xf32>
    %441 = vector.extract_strided_slice %440 {offsets = [0, 0], sizes = [8, 96], strides = [1, 1]} : vector<8x128xf32> to vector<8x96xf32>
    %442 = arith.negf %441 : vector<8x96xf32>
    %443 = math.exp %442 : vector<8x96xf32>
    %cst_113 = arith.constant 1.000000e+00 : f32
    %444 = vector.broadcast %cst_113 : f32 to vector<8x96xf32>
    %445 = arith.addf %444, %443 : vector<8x96xf32>
    %446 = arith.divf %444, %445 : vector<8x96xf32>
    %447 = vector.extract_strided_slice %440 {offsets = [0, 96], sizes = [8, 32], strides = [1, 1]} : vector<8x128xf32> to vector<8x32xf32>
    %448 = math.tanh %447 : vector<8x32xf32>
    %449 = vector.extract_strided_slice %446 {offsets = [0, 0], sizes = [8, 32], strides = [1, 1]} : vector<8x96xf32> to vector<8x32xf32>
    %450 = vector.extract_strided_slice %446 {offsets = [0, 32], sizes = [8, 32], strides = [1, 1]} : vector<8x96xf32> to vector<8x32xf32>
    %451 = vector.extract_strided_slice %446 {offsets = [0, 64], sizes = [8, 32], strides = [1, 1]} : vector<8x96xf32> to vector<8x32xf32>
    %452 = arith.mulf %450, %434 : vector<8x32xf32>
    %453 = arith.mulf %449, %448 : vector<8x32xf32>
    %454 = arith.addf %452, %453 : vector<8x32xf32>
    %455 = math.tanh %454 : vector<8x32xf32>
    %456 = arith.mulf %451, %455 : vector<8x32xf32>
    %c32_114 = arith.constant 32 : index
    %c0_115 = arith.constant 0 : index
    %457 = vector.load %arg15[%c32_114, %c0_115] : memref<64x32xf32, #tpu.memory_space<vmem>>, vector<8x32xf32>
    tpu.vector_store %arg15[%c32_114, %c0_115], %456 {strides = array<i32>} : memref<64x32xf32, #tpu.memory_space<vmem>>, vector<8x32xf32>,
    %458 = vector.extract_strided_slice %355 {offsets = [40, 0], sizes = [8, 128], strides = [1, 1]} : vector<64x256xf32> to vector<8x128xf32>
    %cst_116 = arith.constant dense<0.000000e+00> : vector<8x128xf32>
    %459 = tpu.matmul %456, %8, %cst_116 {dimension_numbers = #tpu.dot_dimension_numbers<[1], [0], [0], [1], [0, 0, 1, 1], [], []>} : vector<8x32xf32>, vector<32x128xf32>, vector<8x128xf32> -> vector<8x128xf32>
    %460 = arith.addf %458, %459 : vector<8x128xf32>
    %461 = vector.extract_strided_slice %460 {offsets = [0, 0], sizes = [8, 96], strides = [1, 1]} : vector<8x128xf32> to vector<8x96xf32>
    %462 = arith.negf %461 : vector<8x96xf32>
    %463 = math.exp %462 : vector<8x96xf32>
    %cst_117 = arith.constant 1.000000e+00 : f32
    %464 = vector.broadcast %cst_117 : f32 to vector<8x96xf32>
    %465 = arith.addf %464, %463 : vector<8x96xf32>
    %466 = arith.divf %464, %465 : vector<8x96xf32>
    %467 = vector.extract_strided_slice %460 {offsets = [0, 96], sizes = [8, 32], strides = [1, 1]} : vector<8x128xf32> to vector<8x32xf32>
    %468 = math.tanh %467 : vector<8x32xf32>
    %469 = vector.extract_strided_slice %466 {offsets = [0, 0], sizes = [8, 32], strides = [1, 1]} : vector<8x96xf32> to vector<8x32xf32>
    %470 = vector.extract_strided_slice %466 {offsets = [0, 32], sizes = [8, 32], strides = [1, 1]} : vector<8x96xf32> to vector<8x32xf32>
    %471 = vector.extract_strided_slice %466 {offsets = [0, 64], sizes = [8, 32], strides = [1, 1]} : vector<8x96xf32> to vector<8x32xf32>
    %472 = arith.mulf %470, %454 : vector<8x32xf32>
    %473 = arith.mulf %469, %468 : vector<8x32xf32>
    %474 = arith.addf %472, %473 : vector<8x32xf32>
    %475 = math.tanh %474 : vector<8x32xf32>
    %476 = arith.mulf %471, %475 : vector<8x32xf32>
    %c40_118 = arith.constant 40 : index
    %c0_119 = arith.constant 0 : index
    %477 = vector.load %arg15[%c40_118, %c0_119] : memref<64x32xf32, #tpu.memory_space<vmem>>, vector<8x32xf32>
    tpu.vector_store %arg15[%c40_118, %c0_119], %476 {strides = array<i32>} : memref<64x32xf32, #tpu.memory_space<vmem>>, vector<8x32xf32>,
    %478 = vector.extract_strided_slice %355 {offsets = [48, 0], sizes = [8, 128], strides = [1, 1]} : vector<64x256xf32> to vector<8x128xf32>
    %cst_120 = arith.constant dense<0.000000e+00> : vector<8x128xf32>
    %479 = tpu.matmul %476, %8, %cst_120 {dimension_numbers = #tpu.dot_dimension_numbers<[1], [0], [0], [1], [0, 0, 1, 1], [], []>} : vector<8x32xf32>, vector<32x128xf32>, vector<8x128xf32> -> vector<8x128xf32>
    %480 = arith.addf %478, %479 : vector<8x128xf32>
    %481 = vector.extract_strided_slice %480 {offsets = [0, 0], sizes = [8, 96], strides = [1, 1]} : vector<8x128xf32> to vector<8x96xf32>
    %482 = arith.negf %481 : vector<8x96xf32>
    %483 = math.exp %482 : vector<8x96xf32>
    %cst_121 = arith.constant 1.000000e+00 : f32
    %484 = vector.broadcast %cst_121 : f32 to vector<8x96xf32>
    %485 = arith.addf %484, %483 : vector<8x96xf32>
    %486 = arith.divf %484, %485 : vector<8x96xf32>
    %487 = vector.extract_strided_slice %480 {offsets = [0, 96], sizes = [8, 32], strides = [1, 1]} : vector<8x128xf32> to vector<8x32xf32>
    %488 = math.tanh %487 : vector<8x32xf32>
    %489 = vector.extract_strided_slice %486 {offsets = [0, 0], sizes = [8, 32], strides = [1, 1]} : vector<8x96xf32> to vector<8x32xf32>
    %490 = vector.extract_strided_slice %486 {offsets = [0, 32], sizes = [8, 32], strides = [1, 1]} : vector<8x96xf32> to vector<8x32xf32>
    %491 = vector.extract_strided_slice %486 {offsets = [0, 64], sizes = [8, 32], strides = [1, 1]} : vector<8x96xf32> to vector<8x32xf32>
    %492 = arith.mulf %490, %474 : vector<8x32xf32>
    %493 = arith.mulf %489, %488 : vector<8x32xf32>
    %494 = arith.addf %492, %493 : vector<8x32xf32>
    %495 = math.tanh %494 : vector<8x32xf32>
    %496 = arith.mulf %491, %495 : vector<8x32xf32>
    %c48_122 = arith.constant 48 : index
    %c0_123 = arith.constant 0 : index
    %497 = vector.load %arg15[%c48_122, %c0_123] : memref<64x32xf32, #tpu.memory_space<vmem>>, vector<8x32xf32>
    tpu.vector_store %arg15[%c48_122, %c0_123], %496 {strides = array<i32>} : memref<64x32xf32, #tpu.memory_space<vmem>>, vector<8x32xf32>,
    %498 = vector.extract_strided_slice %355 {offsets = [56, 0], sizes = [8, 128], strides = [1, 1]} : vector<64x256xf32> to vector<8x128xf32>
    %cst_124 = arith.constant dense<0.000000e+00> : vector<8x128xf32>
    %499 = tpu.matmul %496, %8, %cst_124 {dimension_numbers = #tpu.dot_dimension_numbers<[1], [0], [0], [1], [0, 0, 1, 1], [], []>} : vector<8x32xf32>, vector<32x128xf32>, vector<8x128xf32> -> vector<8x128xf32>
    %500 = arith.addf %498, %499 : vector<8x128xf32>
    %501 = vector.extract_strided_slice %500 {offsets = [0, 0], sizes = [8, 96], strides = [1, 1]} : vector<8x128xf32> to vector<8x96xf32>
    %502 = arith.negf %501 : vector<8x96xf32>
    %503 = math.exp %502 : vector<8x96xf32>
    %cst_125 = arith.constant 1.000000e+00 : f32
    %504 = vector.broadcast %cst_125 : f32 to vector<8x96xf32>
    %505 = arith.addf %504, %503 : vector<8x96xf32>
    %506 = arith.divf %504, %505 : vector<8x96xf32>
    %507 = vector.extract_strided_slice %500 {offsets = [0, 96], sizes = [8, 32], strides = [1, 1]} : vector<8x128xf32> to vector<8x32xf32>
    %508 = math.tanh %507 : vector<8x32xf32>
    %509 = vector.extract_strided_slice %506 {offsets = [0, 0], sizes = [8, 32], strides = [1, 1]} : vector<8x96xf32> to vector<8x32xf32>
    %510 = vector.extract_strided_slice %506 {offsets = [0, 32], sizes = [8, 32], strides = [1, 1]} : vector<8x96xf32> to vector<8x32xf32>
    %511 = vector.extract_strided_slice %506 {offsets = [0, 64], sizes = [8, 32], strides = [1, 1]} : vector<8x96xf32> to vector<8x32xf32>
    %512 = arith.mulf %510, %494 : vector<8x32xf32>
    %513 = arith.mulf %509, %508 : vector<8x32xf32>
    %514 = arith.addf %512, %513 : vector<8x32xf32>
    %515 = math.tanh %514 : vector<8x32xf32>
    %516 = arith.mulf %511, %515 : vector<8x32xf32>
    %c56_126 = arith.constant 56 : index
    %c0_127 = arith.constant 0 : index
    %517 = vector.load %arg15[%c56_126, %c0_127] : memref<64x32xf32, #tpu.memory_space<vmem>>, vector<8x32xf32>
    tpu.vector_store %arg15[%c56_126, %c0_127], %516 {strides = array<i32>} : memref<64x32xf32, #tpu.memory_space<vmem>>, vector<8x32xf32>,
    %cst_128 = arith.constant 0.000000e+00 : f32
    %518 = vector.broadcast %cst_128 : f32 to vector<8x32xf32>
    %cst_129 = arith.constant 0.000000e+00 : f32
    %519 = vector.broadcast %cst_129 : f32 to vector<8x32xf32>
    %520 = vector.extract_strided_slice %355 {offsets = [56, 128], sizes = [8, 128], strides = [1, 1]} : vector<64x256xf32> to vector<8x128xf32>
    %cst_130 = arith.constant dense<0.000000e+00> : vector<8x128xf32>
    %521 = tpu.matmul %518, %9, %cst_130 {dimension_numbers = #tpu.dot_dimension_numbers<[1], [0], [0], [1], [0, 0, 1, 1], [], []>} : vector<8x32xf32>, vector<32x128xf32>, vector<8x128xf32> -> vector<8x128xf32>
    %522 = arith.addf %520, %521 : vector<8x128xf32>
    %523 = vector.extract_strided_slice %522 {offsets = [0, 0], sizes = [8, 96], strides = [1, 1]} : vector<8x128xf32> to vector<8x96xf32>
    %524 = arith.negf %523 : vector<8x96xf32>
    %525 = math.exp %524 : vector<8x96xf32>
    %cst_131 = arith.constant 1.000000e+00 : f32
    %526 = vector.broadcast %cst_131 : f32 to vector<8x96xf32>
    %527 = arith.addf %526, %525 : vector<8x96xf32>
    %528 = arith.divf %526, %527 : vector<8x96xf32>
    %529 = vector.extract_strided_slice %522 {offsets = [0, 96], sizes = [8, 32], strides = [1, 1]} : vector<8x128xf32> to vector<8x32xf32>
    %530 = math.tanh %529 : vector<8x32xf32>
    %531 = vector.extract_strided_slice %528 {offsets = [0, 0], sizes = [8, 32], strides = [1, 1]} : vector<8x96xf32> to vector<8x32xf32>
    %532 = vector.extract_strided_slice %528 {offsets = [0, 32], sizes = [8, 32], strides = [1, 1]} : vector<8x96xf32> to vector<8x32xf32>
    %533 = vector.extract_strided_slice %528 {offsets = [0, 64], sizes = [8, 32], strides = [1, 1]} : vector<8x96xf32> to vector<8x32xf32>
    %534 = arith.mulf %532, %519 : vector<8x32xf32>
    %535 = arith.mulf %531, %530 : vector<8x32xf32>
    %536 = arith.addf %534, %535 : vector<8x32xf32>
    %537 = math.tanh %536 : vector<8x32xf32>
    %538 = arith.mulf %533, %537 : vector<8x32xf32>
    %c56_132 = arith.constant 56 : index
    %c0_133 = arith.constant 0 : index
    %539 = vector.load %arg16[%c56_132, %c0_133] : memref<64x32xf32, #tpu.memory_space<vmem>>, vector<8x32xf32>
    tpu.vector_store %arg16[%c56_132, %c0_133], %538 {strides = array<i32>} : memref<64x32xf32, #tpu.memory_space<vmem>>, vector<8x32xf32>,
    %540 = vector.extract_strided_slice %355 {offsets = [48, 128], sizes = [8, 128], strides = [1, 1]} : vector<64x256xf32> to vector<8x128xf32>
    %cst_134 = arith.constant dense<0.000000e+00> : vector<8x128xf32>
    %541 = tpu.matmul %538, %9, %cst_134 {dimension_numbers = #tpu.dot_dimension_numbers<[1], [0], [0], [1], [0, 0, 1, 1], [], []>} : vector<8x32xf32>, vector<32x128xf32>, vector<8x128xf32> -> vector<8x128xf32>
    %542 = arith.addf %540, %541 : vector<8x128xf32>
    %543 = vector.extract_strided_slice %542 {offsets = [0, 0], sizes = [8, 96], strides = [1, 1]} : vector<8x128xf32> to vector<8x96xf32>
    %544 = arith.negf %543 : vector<8x96xf32>
    %545 = math.exp %544 : vector<8x96xf32>
    %cst_135 = arith.constant 1.000000e+00 : f32
    %546 = vector.broadcast %cst_135 : f32 to vector<8x96xf32>
    %547 = arith.addf %546, %545 : vector<8x96xf32>
    %548 = arith.divf %546, %547 : vector<8x96xf32>
    %549 = vector.extract_strided_slice %542 {offsets = [0, 96], sizes = [8, 32], strides = [1, 1]} : vector<8x128xf32> to vector<8x32xf32>
    %550 = math.tanh %549 : vector<8x32xf32>
    %551 = vector.extract_strided_slice %548 {offsets = [0, 0], sizes = [8, 32], strides = [1, 1]} : vector<8x96xf32> to vector<8x32xf32>
    %552 = vector.extract_strided_slice %548 {offsets = [0, 32], sizes = [8, 32], strides = [1, 1]} : vector<8x96xf32> to vector<8x32xf32>
    %553 = vector.extract_strided_slice %548 {offsets = [0, 64], sizes = [8, 32], strides = [1, 1]} : vector<8x96xf32> to vector<8x32xf32>
    %554 = arith.mulf %552, %536 : vector<8x32xf32>
    %555 = arith.mulf %551, %550 : vector<8x32xf32>
    %556 = arith.addf %554, %555 : vector<8x32xf32>
    %557 = math.tanh %556 : vector<8x32xf32>
    %558 = arith.mulf %553, %557 : vector<8x32xf32>
    %c48_136 = arith.constant 48 : index
    %c0_137 = arith.constant 0 : index
    %559 = vector.load %arg16[%c48_136, %c0_137] : memref<64x32xf32, #tpu.memory_space<vmem>>, vector<8x32xf32>
    tpu.vector_store %arg16[%c48_136, %c0_137], %558 {strides = array<i32>} : memref<64x32xf32, #tpu.memory_space<vmem>>, vector<8x32xf32>,
    %560 = vector.extract_strided_slice %355 {offsets = [40, 128], sizes = [8, 128], strides = [1, 1]} : vector<64x256xf32> to vector<8x128xf32>
    %cst_138 = arith.constant dense<0.000000e+00> : vector<8x128xf32>
    %561 = tpu.matmul %558, %9, %cst_138 {dimension_numbers = #tpu.dot_dimension_numbers<[1], [0], [0], [1], [0, 0, 1, 1], [], []>} : vector<8x32xf32>, vector<32x128xf32>, vector<8x128xf32> -> vector<8x128xf32>
    %562 = arith.addf %560, %561 : vector<8x128xf32>
    %563 = vector.extract_strided_slice %562 {offsets = [0, 0], sizes = [8, 96], strides = [1, 1]} : vector<8x128xf32> to vector<8x96xf32>
    %564 = arith.negf %563 : vector<8x96xf32>
    %565 = math.exp %564 : vector<8x96xf32>
    %cst_139 = arith.constant 1.000000e+00 : f32
    %566 = vector.broadcast %cst_139 : f32 to vector<8x96xf32>
    %567 = arith.addf %566, %565 : vector<8x96xf32>
    %568 = arith.divf %566, %567 : vector<8x96xf32>
    %569 = vector.extract_strided_slice %562 {offsets = [0, 96], sizes = [8, 32], strides = [1, 1]} : vector<8x128xf32> to vector<8x32xf32>
    %570 = math.tanh %569 : vector<8x32xf32>
    %571 = vector.extract_strided_slice %568 {offsets = [0, 0], sizes = [8, 32], strides = [1, 1]} : vector<8x96xf32> to vector<8x32xf32>
    %572 = vector.extract_strided_slice %568 {offsets = [0, 32], sizes = [8, 32], strides = [1, 1]} : vector<8x96xf32> to vector<8x32xf32>
    %573 = vector.extract_strided_slice %568 {offsets = [0, 64], sizes = [8, 32], strides = [1, 1]} : vector<8x96xf32> to vector<8x32xf32>
    %574 = arith.mulf %572, %556 : vector<8x32xf32>
    %575 = arith.mulf %571, %570 : vector<8x32xf32>
    %576 = arith.addf %574, %575 : vector<8x32xf32>
    %577 = math.tanh %576 : vector<8x32xf32>
    %578 = arith.mulf %573, %577 : vector<8x32xf32>
    %c40_140 = arith.constant 40 : index
    %c0_141 = arith.constant 0 : index
    %579 = vector.load %arg16[%c40_140, %c0_141] : memref<64x32xf32, #tpu.memory_space<vmem>>, vector<8x32xf32>
    tpu.vector_store %arg16[%c40_140, %c0_141], %578 {strides = array<i32>} : memref<64x32xf32, #tpu.memory_space<vmem>>, vector<8x32xf32>,
    %580 = vector.extract_strided_slice %355 {offsets = [32, 128], sizes = [8, 128], strides = [1, 1]} : vector<64x256xf32> to vector<8x128xf32>
    %cst_142 = arith.constant dense<0.000000e+00> : vector<8x128xf32>
    %581 = tpu.matmul %578, %9, %cst_142 {dimension_numbers = #tpu.dot_dimension_numbers<[1], [0], [0], [1], [0, 0, 1, 1], [], []>} : vector<8x32xf32>, vector<32x128xf32>, vector<8x128xf32> -> vector<8x128xf32>
    %582 = arith.addf %580, %581 : vector<8x128xf32>
    %583 = vector.extract_strided_slice %582 {offsets = [0, 0], sizes = [8, 96], strides = [1, 1]} : vector<8x128xf32> to vector<8x96xf32>
    %584 = arith.negf %583 : vector<8x96xf32>
    %585 = math.exp %584 : vector<8x96xf32>
    %cst_143 = arith.constant 1.000000e+00 : f32
    %586 = vector.broadcast %cst_143 : f32 to vector<8x96xf32>
    %587 = arith.addf %586, %585 : vector<8x96xf32>
    %588 = arith.divf %586, %587 : vector<8x96xf32>
    %589 = vector.extract_strided_slice %582 {offsets = [0, 96], sizes = [8, 32], strides = [1, 1]} : vector<8x128xf32> to vector<8x32xf32>
    %590 = math.tanh %589 : vector<8x32xf32>
    %591 = vector.extract_strided_slice %588 {offsets = [0, 0], sizes = [8, 32], strides = [1, 1]} : vector<8x96xf32> to vector<8x32xf32>
    %592 = vector.extract_strided_slice %588 {offsets = [0, 32], sizes = [8, 32], strides = [1, 1]} : vector<8x96xf32> to vector<8x32xf32>
    %593 = vector.extract_strided_slice %588 {offsets = [0, 64], sizes = [8, 32], strides = [1, 1]} : vector<8x96xf32> to vector<8x32xf32>
    %594 = arith.mulf %592, %576 : vector<8x32xf32>
    %595 = arith.mulf %591, %590 : vector<8x32xf32>
    %596 = arith.addf %594, %595 : vector<8x32xf32>
    %597 = math.tanh %596 : vector<8x32xf32>
    %598 = arith.mulf %593, %597 : vector<8x32xf32>
    %c32_144 = arith.constant 32 : index
    %c0_145 = arith.constant 0 : index
    %599 = vector.load %arg16[%c32_144, %c0_145] : memref<64x32xf32, #tpu.memory_space<vmem>>, vector<8x32xf32>
    tpu.vector_store %arg16[%c32_144, %c0_145], %598 {strides = array<i32>} : memref<64x32xf32, #tpu.memory_space<vmem>>, vector<8x32xf32>,
    %600 = vector.extract_strided_slice %355 {offsets = [24, 128], sizes = [8, 128], strides = [1, 1]} : vector<64x256xf32> to vector<8x128xf32>
    %cst_146 = arith.constant dense<0.000000e+00> : vector<8x128xf32>
    %601 = tpu.matmul %598, %9, %cst_146 {dimension_numbers = #tpu.dot_dimension_numbers<[1], [0], [0], [1], [0, 0, 1, 1], [], []>} : vector<8x32xf32>, vector<32x128xf32>, vector<8x128xf32> -> vector<8x128xf32>
    %602 = arith.addf %600, %601 : vector<8x128xf32>
    %603 = vector.extract_strided_slice %602 {offsets = [0, 0], sizes = [8, 96], strides = [1, 1]} : vector<8x128xf32> to vector<8x96xf32>
    %604 = arith.negf %603 : vector<8x96xf32>
    %605 = math.exp %604 : vector<8x96xf32>
    %cst_147 = arith.constant 1.000000e+00 : f32
    %606 = vector.broadcast %cst_147 : f32 to vector<8x96xf32>
    %607 = arith.addf %606, %605 : vector<8x96xf32>
    %608 = arith.divf %606, %607 : vector<8x96xf32>
    %609 = vector.extract_strided_slice %602 {offsets = [0, 96], sizes = [8, 32], strides = [1, 1]} : vector<8x128xf32> to vector<8x32xf32>
    %610 = math.tanh %609 : vector<8x32xf32>
    %611 = vector.extract_strided_slice %608 {offsets = [0, 0], sizes = [8, 32], strides = [1, 1]} : vector<8x96xf32> to vector<8x32xf32>
    %612 = vector.extract_strided_slice %608 {offsets = [0, 32], sizes = [8, 32], strides = [1, 1]} : vector<8x96xf32> to vector<8x32xf32>
    %613 = vector.extract_strided_slice %608 {offsets = [0, 64], sizes = [8, 32], strides = [1, 1]} : vector<8x96xf32> to vector<8x32xf32>
    %614 = arith.mulf %612, %596 : vector<8x32xf32>
    %615 = arith.mulf %611, %610 : vector<8x32xf32>
    %616 = arith.addf %614, %615 : vector<8x32xf32>
    %617 = math.tanh %616 : vector<8x32xf32>
    %618 = arith.mulf %613, %617 : vector<8x32xf32>
    %c24_148 = arith.constant 24 : index
    %c0_149 = arith.constant 0 : index
    %619 = vector.load %arg16[%c24_148, %c0_149] : memref<64x32xf32, #tpu.memory_space<vmem>>, vector<8x32xf32>
    tpu.vector_store %arg16[%c24_148, %c0_149], %618 {strides = array<i32>} : memref<64x32xf32, #tpu.memory_space<vmem>>, vector<8x32xf32>,
    %620 = vector.extract_strided_slice %355 {offsets = [16, 128], sizes = [8, 128], strides = [1, 1]} : vector<64x256xf32> to vector<8x128xf32>
    %cst_150 = arith.constant dense<0.000000e+00> : vector<8x128xf32>
    %621 = tpu.matmul %618, %9, %cst_150 {dimension_numbers = #tpu.dot_dimension_numbers<[1], [0], [0], [1], [0, 0, 1, 1], [], []>} : vector<8x32xf32>, vector<32x128xf32>, vector<8x128xf32> -> vector<8x128xf32>
    %622 = arith.addf %620, %621 : vector<8x128xf32>
    %623 = vector.extract_strided_slice %622 {offsets = [0, 0], sizes = [8, 96], strides = [1, 1]} : vector<8x128xf32> to vector<8x96xf32>
    %624 = arith.negf %623 : vector<8x96xf32>
    %625 = math.exp %624 : vector<8x96xf32>
    %cst_151 = arith.constant 1.000000e+00 : f32
    %626 = vector.broadcast %cst_151 : f32 to vector<8x96xf32>
    %627 = arith.addf %626, %625 : vector<8x96xf32>
    %628 = arith.divf %626, %627 : vector<8x96xf32>
    %629 = vector.extract_strided_slice %622 {offsets = [0, 96], sizes = [8, 32], strides = [1, 1]} : vector<8x128xf32> to vector<8x32xf32>
    %630 = math.tanh %629 : vector<8x32xf32>
    %631 = vector.extract_strided_slice %628 {offsets = [0, 0], sizes = [8, 32], strides = [1, 1]} : vector<8x96xf32> to vector<8x32xf32>
    %632 = vector.extract_strided_slice %628 {offsets = [0, 32], sizes = [8, 32], strides = [1, 1]} : vector<8x96xf32> to vector<8x32xf32>
    %633 = vector.extract_strided_slice %628 {offsets = [0, 64], sizes = [8, 32], strides = [1, 1]} : vector<8x96xf32> to vector<8x32xf32>
    %634 = arith.mulf %632, %616 : vector<8x32xf32>
    %635 = arith.mulf %631, %630 : vector<8x32xf32>
    %636 = arith.addf %634, %635 : vector<8x32xf32>
    %637 = math.tanh %636 : vector<8x32xf32>
    %638 = arith.mulf %633, %637 : vector<8x32xf32>
    %c16_152 = arith.constant 16 : index
    %c0_153 = arith.constant 0 : index
    %639 = vector.load %arg16[%c16_152, %c0_153] : memref<64x32xf32, #tpu.memory_space<vmem>>, vector<8x32xf32>
    tpu.vector_store %arg16[%c16_152, %c0_153], %638 {strides = array<i32>} : memref<64x32xf32, #tpu.memory_space<vmem>>, vector<8x32xf32>,
    %640 = vector.extract_strided_slice %355 {offsets = [8, 128], sizes = [8, 128], strides = [1, 1]} : vector<64x256xf32> to vector<8x128xf32>
    %cst_154 = arith.constant dense<0.000000e+00> : vector<8x128xf32>
    %641 = tpu.matmul %638, %9, %cst_154 {dimension_numbers = #tpu.dot_dimension_numbers<[1], [0], [0], [1], [0, 0, 1, 1], [], []>} : vector<8x32xf32>, vector<32x128xf32>, vector<8x128xf32> -> vector<8x128xf32>
    %642 = arith.addf %640, %641 : vector<8x128xf32>
    %643 = vector.extract_strided_slice %642 {offsets = [0, 0], sizes = [8, 96], strides = [1, 1]} : vector<8x128xf32> to vector<8x96xf32>
    %644 = arith.negf %643 : vector<8x96xf32>
    %645 = math.exp %644 : vector<8x96xf32>
    %cst_155 = arith.constant 1.000000e+00 : f32
    %646 = vector.broadcast %cst_155 : f32 to vector<8x96xf32>
    %647 = arith.addf %646, %645 : vector<8x96xf32>
    %648 = arith.divf %646, %647 : vector<8x96xf32>
    %649 = vector.extract_strided_slice %642 {offsets = [0, 96], sizes = [8, 32], strides = [1, 1]} : vector<8x128xf32> to vector<8x32xf32>
    %650 = math.tanh %649 : vector<8x32xf32>
    %651 = vector.extract_strided_slice %648 {offsets = [0, 0], sizes = [8, 32], strides = [1, 1]} : vector<8x96xf32> to vector<8x32xf32>
    %652 = vector.extract_strided_slice %648 {offsets = [0, 32], sizes = [8, 32], strides = [1, 1]} : vector<8x96xf32> to vector<8x32xf32>
    %653 = vector.extract_strided_slice %648 {offsets = [0, 64], sizes = [8, 32], strides = [1, 1]} : vector<8x96xf32> to vector<8x32xf32>
    %654 = arith.mulf %652, %636 : vector<8x32xf32>
    %655 = arith.mulf %651, %650 : vector<8x32xf32>
    %656 = arith.addf %654, %655 : vector<8x32xf32>
    %657 = math.tanh %656 : vector<8x32xf32>
    %658 = arith.mulf %653, %657 : vector<8x32xf32>
    %c8_156 = arith.constant 8 : index
    %c0_157 = arith.constant 0 : index
    %659 = vector.load %arg16[%c8_156, %c0_157] : memref<64x32xf32, #tpu.memory_space<vmem>>, vector<8x32xf32>
    tpu.vector_store %arg16[%c8_156, %c0_157], %658 {strides = array<i32>} : memref<64x32xf32, #tpu.memory_space<vmem>>, vector<8x32xf32>,
    %660 = vector.extract_strided_slice %355 {offsets = [0, 128], sizes = [8, 128], strides = [1, 1]} : vector<64x256xf32> to vector<8x128xf32>
    %cst_158 = arith.constant dense<0.000000e+00> : vector<8x128xf32>
    %661 = tpu.matmul %658, %9, %cst_158 {dimension_numbers = #tpu.dot_dimension_numbers<[1], [0], [0], [1], [0, 0, 1, 1], [], []>} : vector<8x32xf32>, vector<32x128xf32>, vector<8x128xf32> -> vector<8x128xf32>
    %662 = arith.addf %660, %661 : vector<8x128xf32>
    %663 = vector.extract_strided_slice %662 {offsets = [0, 0], sizes = [8, 96], strides = [1, 1]} : vector<8x128xf32> to vector<8x96xf32>
    %664 = arith.negf %663 : vector<8x96xf32>
    %665 = math.exp %664 : vector<8x96xf32>
    %cst_159 = arith.constant 1.000000e+00 : f32
    %666 = vector.broadcast %cst_159 : f32 to vector<8x96xf32>
    %667 = arith.addf %666, %665 : vector<8x96xf32>
    %668 = arith.divf %666, %667 : vector<8x96xf32>
    %669 = vector.extract_strided_slice %662 {offsets = [0, 96], sizes = [8, 32], strides = [1, 1]} : vector<8x128xf32> to vector<8x32xf32>
    %670 = math.tanh %669 : vector<8x32xf32>
    %671 = vector.extract_strided_slice %668 {offsets = [0, 0], sizes = [8, 32], strides = [1, 1]} : vector<8x96xf32> to vector<8x32xf32>
    %672 = vector.extract_strided_slice %668 {offsets = [0, 32], sizes = [8, 32], strides = [1, 1]} : vector<8x96xf32> to vector<8x32xf32>
    %673 = vector.extract_strided_slice %668 {offsets = [0, 64], sizes = [8, 32], strides = [1, 1]} : vector<8x96xf32> to vector<8x32xf32>
    %674 = arith.mulf %672, %656 : vector<8x32xf32>
    %675 = arith.mulf %671, %670 : vector<8x32xf32>
    %676 = arith.addf %674, %675 : vector<8x32xf32>
    %677 = math.tanh %676 : vector<8x32xf32>
    %678 = arith.mulf %673, %677 : vector<8x32xf32>
    %c0_160 = arith.constant 0 : index
    %c0_161 = arith.constant 0 : index
    %679 = vector.load %arg16[%c0_160, %c0_161] : memref<64x32xf32, #tpu.memory_space<vmem>>, vector<8x32xf32>
    tpu.vector_store %arg16[%c0_160, %c0_161], %678 {strides = array<i32>} : memref<64x32xf32, #tpu.memory_space<vmem>>, vector<8x32xf32>,
    %c0_162 = arith.constant 0 : index
    %c0_163 = arith.constant 0 : index
    %680 = vector.load %arg15[%c0_162, %c0_163] : memref<64x32xf32, #tpu.memory_space<vmem>>, vector<64x32xf32>
    %c0_164 = arith.constant 0 : index
    %c0_165 = arith.constant 0 : index
    %681 = vector.load %arg16[%c0_164, %c0_165] : memref<64x32xf32, #tpu.memory_space<vmem>>, vector<64x32xf32>
    %682 = tpu.concatenate %680, %681 in 1 : vector<64x32xf32>, vector<64x32xf32> -> vector<64x64xf32>
    %cst_166 = arith.constant dense<0.000000e+00> : vector<64x128xf32>
    %683 = tpu.matmul %682, %10, %cst_166 {dimension_numbers = #tpu.dot_dimension_numbers<[1], [0], [0], [1], [0, 0, 1, 1], [], []>} : vector<64x64xf32>, vector<64x128xf32>, vector<64x128xf32> -> vector<64x128xf32>
    %684 = vector.broadcast %11 : vector<1x128xf32> to vector<64x128xf32>
    %685 = arith.addf %683, %684 : vector<64x128xf32>
    %686 = vector.shape_cast %685 : vector<64x128xf32> to vector<8x8x128xf32>
    %c0_167 = arith.constant 0 : index
    %c0_168 = arith.constant 0 : index
    %c0_169 = arith.constant 0 : index
    %687 = vector.load %arg14[%c0_167, %c0_168, %c0_169] : memref<8x8x128xf32, #tpu.memory_space<vmem>>, vector<8x8x128xf32>
    tpu.vector_store %arg14[%c0_167, %c0_168, %c0_169], %686 {strides = array<i32>} : memref<8x8x128xf32, #tpu.memory_space<vmem>>, vector<8x8x128xf32>,
    return
  }
  func.func @transform_0(%arg0: i32) -> (i32, i32, i32) {
    %c0_i32 = arith.constant 0 : i32
    %c0_i32_0 = arith.constant 0 : i32
    %c0_i32_1 = arith.constant 0 : i32
    return %c0_i32, %arg0, %c0_i32_0 : i32, i32, i32
  }
  func.func @transform_1(%arg0: i32) -> (i32, i32) {
    %c0_i32 = arith.constant 0 : i32
    %c0_i32_0 = arith.constant 0 : i32
    %c0_i32_1 = arith.constant 0 : i32
    return %c0_i32, %c0_i32_0 : i32, i32
  }
  func.func @transform_2(%arg0: i32) -> (i32, i32) {
    %c0_i32 = arith.constant 0 : i32
    %c0_i32_0 = arith.constant 0 : i32
    %c0_i32_1 = arith.constant 0 : i32
    return %c0_i32, %c0_i32_0 : i32, i32
  }
  func.func @transform_3(%arg0: i32) -> (i32, i32) {
    %c0_i32 = arith.constant 0 : i32
    %c0_i32_0 = arith.constant 0 : i32
    %c0_i32_1 = arith.constant 0 : i32
    return %c0_i32, %c0_i32_0 : i32, i32
  }
  func.func @transform_4(%arg0: i32) -> (i32, i32) {
    %c0_i32 = arith.constant 0 : i32
    %c0_i32_0 = arith.constant 0 : i32
    %c0_i32_1 = arith.constant 0 : i32
    return %c0_i32, %c0_i32_0 : i32, i32
  }
  func.func @transform_5(%arg0: i32) -> (i32, i32) {
    %c0_i32 = arith.constant 0 : i32
    %c0_i32_0 = arith.constant 0 : i32
    %c0_i32_1 = arith.constant 0 : i32
    return %c0_i32, %c0_i32_0 : i32, i32
  }
  func.func @transform_6(%arg0: i32) -> (i32, i32) {
    %c0_i32 = arith.constant 0 : i32
    %c0_i32_0 = arith.constant 0 : i32
    %c0_i32_1 = arith.constant 0 : i32
    return %c0_i32, %c0_i32_0 : i32, i32
  }
  func.func @transform_7(%arg0: i32) -> (i32, i32) {
    %c0_i32 = arith.constant 0 : i32
    %c0_i32_0 = arith.constant 0 : i32
    %c0_i32_1 = arith.constant 0 : i32
    return %c0_i32, %c0_i32_0 : i32, i32
  }
  func.func @transform_8(%arg0: i32) -> (i32, i32) {
    %c0_i32 = arith.constant 0 : i32
    %c0_i32_0 = arith.constant 0 : i32
    %c0_i32_1 = arith.constant 0 : i32
    return %c0_i32, %c0_i32_0 : i32, i32
  }
  func.func @transform_9(%arg0: i32) -> (i32, i32) {
    %c0_i32 = arith.constant 0 : i32
    %c0_i32_0 = arith.constant 0 : i32
    %c0_i32_1 = arith.constant 0 : i32
    return %c0_i32, %c0_i32_0 : i32, i32
  }
  func.func @transform_10(%arg0: i32) -> (i32, i32) {
    %c0_i32 = arith.constant 0 : i32
    %c0_i32_0 = arith.constant 0 : i32
    %c0_i32_1 = arith.constant 0 : i32
    return %c0_i32, %c0_i32_0 : i32, i32
  }
  func.func @transform_11(%arg0: i32) -> (i32, i32) {
    %c0_i32 = arith.constant 0 : i32
    %c0_i32_0 = arith.constant 0 : i32
    %c0_i32_1 = arith.constant 0 : i32
    return %c0_i32, %c0_i32_0 : i32, i32
  }
  func.func @transform_12(%arg0: i32) -> (i32, i32) {
    %c0_i32 = arith.constant 0 : i32
    %c0_i32_0 = arith.constant 0 : i32
    %c0_i32_1 = arith.constant 0 : i32
    return %c0_i32, %c0_i32_0 : i32, i32
  }
  func.func @transform_13(%arg0: i32) -> (i32, i32, i32) {
    %c0_i32 = arith.constant 0 : i32
    %c0_i32_0 = arith.constant 0 : i32
    %c0_i32_1 = arith.constant 0 : i32
    return %c0_i32, %arg0, %c0_i32_0 : i32, i32, i32
  }
}

</mosaic_0001>

<bundles_post_ra>
// kernel: cnn_bilstm_pallas.1
= control target key start
LH: loop header
LB: loop body
LE: loop exit
PB: predicated region body
PF: predicated region fallthrough
CT: control target
= control target key end

     0   :  { %s5335_s29 = smov 16   ;;  %s5336_s30 = smov 32   ;;  %v5337_v18 = vmov 0.0|0.0   ;;  %v5338_v21 = vmov 0.0   ;;  %vm167_vm0 = vcmask 130048   ;;  %vm176_vm1 = vcmask 261120   ;;  %s6298_s0 = inlined_call_operand.vmem [shape: f32[8,8,16], index: 0, kind: input, shape index: {}]   ;;  %s6299_s1 = inlined_call_operand.vmem [shape: f32[48,32], index: 1, kind: input, shape index: {}]   ;;  %s6300_s3 = inlined_call_operand.vmem [shape: f32[32,256], index: 3, kind: input, shape index: {}]   ;;  %s6301_s5 = inlined_call_operand.vmem [shape: f32[32,128], index: 5, kind: input, shape index: {}]   ;;  %s6302_s2 = inlined_call_operand.vmem [shape: f32[1,32], index: 2, kind: input, shape index: {}]   ;;  %s6303_s4 = inlined_call_operand.vmem [shape: f32[1,256], index: 4, kind: input, shape index: {}]   ;;  %s6304_s6 = inlined_call_operand.vmem [shape: f32[32,128], index: 6, kind: input, shape index: {}]   ;;  %s6305_s7 = inlined_call_operand.vmem [shape: f32[64,256], index: 7, kind: input, shape index: {}]   ;;  %s6306_s9 = inlined_call_operand.vmem [shape: f32[32,128], index: 9, kind: input, shape index: {}]   ;;  %s6307_s8 = inlined_call_operand.vmem [shape: f32[1,256], index: 8, kind: input, shape index: {}]   ;;  %s6308_s10 = inlined_call_operand.vmem [shape: f32[32,128], index: 10, kind: input, shape index: {}]   ;;  %s6309_s11 = inlined_call_operand.vmem [shape: f32[64,128], index: 11, kind: input, shape index: {}]   ;;  %s6310_s12 = inlined_call_operand.vmem [shape: f32[1,128], index: 12, kind: input, shape index: {}]   ;;  %s6311_s13 = inlined_call_operand.vmem [shape: f32[8,8,128], index: 13, kind: output, shape index: {}]  }
   0x1   :  { %v5414_v0 = vld [vmem:[%s6298_s0] sm:$0xff]  ;;  %v5419_v1 = vld [vmem:[%s6298_s0 + $0x8] sm:$0xff]  ;;  %v5434_v4 = vld [vmem:[%s6298_s0 + $0x10] sm:$0xff]  ;;  %vm191_vm2 = vcmask 392192   ;;  %vm5339_vm3 = vmmov 0   ;;  %vm2166_vm4 = vcmask 523264  }
   0x2   :  { %118 = vrot.lane.b32.xlu0 %v5414_v0, %s5335_s29  ;;  %143 = vrot.lane.b32.xlu1 %v5419_v1, %s5336_s30  ;;  %v44_v2 = vld [vmem:[%s6299_s1] sm:$0xff]  ;;  %v45_v3 = vld [vmem:[%s6299_s1 + $0x8] sm:$0xff] }
   0x3   :  { %v4823_v5 = vpack.c.bf16 %v45_v3, %v44_v2  ;;  %v46_v6 = vld [vmem:[%s6299_s1 + $0x10] sm:$0xff]  ;;  %v47_v7 = vld [vmem:[%s6299_s1 + $0x18] sm:$0xff]  ;;  %v48_v9 = vld [vmem:[%s6299_s1 + $0x20] sm:$0xff] }
   0x4   :  { %v4827_v8 = vpack.c.bf16 %v47_v7, %v46_v6  ;;  %v49_v10 = vld [vmem:[%s6299_s1 + $0x28] sm:$0xff]  ;;  %v106_v11 = vld [vmem:[%s6298_s0 + $0x20] sm:$0xff]  ;;  %v5466_v14 = vld [vmem:[%s6298_s0 + $0x30] sm:$0xff] }
   0x5   :  { %4824 = vmatprep.subr.bf16.mxu0 %v4823_v5  ;;  %5067 = vmatprep.subr.bf16.mxu1 %v4823_v5  ;;  %v5458_v12 = vld [vmem:[%s6298_s0 + $0x28] sm:$0xff]  ;;  %v4831_v13 = vpack.c.bf16 %v49_v10, %v48_v9  ;;  %v109_v15 = vld [vmem:[%s6298_s0 + $0x38] sm:$0xff]  ;;  %v60_v25 = vld [vmem:[%s6301_s5] sm:$0xff] }
   0x6   :  { %120 = vrot.lane.b32.xlu0 %v5419_v1, %s5335_s29  ;;  %145 = vrot.lane.b32.xlu1 %v5434_v4, %s5336_s30  ;;  %v52_v16 = vld [vmem:[%s6300_s3 + $0x8] sm:$0xff]  ;;  %v54_v17 = vld [vmem:[%s6300_s3 + $0x18] sm:$0xff] }
   0x7   :  { %4826 = vmatpush3.bf16.msra.mxu0 %v4823_v5  ;;  %5070 = vmatpush3.bf16.msra.mxu1 %v4823_v5  ;;  %v4835_v19 = vpack.c.bf16 %v54_v17, %v52_v16  ;;  %v105_v20 = vld [vmem:[%s6298_s0 + $0x18] sm:$0xff]  ;;  %v61_v26 = vld [vmem:[%s6301_s5 + $0x8] sm:$0xff]  ;;  %v51_v35 = vld [vmem:[%s6300_s3] sm:$0xff] }
   0x8   :  { %4828 = vmatprep.subr.bf16.mxu0 %v4827_v8  ;;  %5068 = vmatprep.subr.bf16.mxu1 %v4827_v8  ;;  %v5505_v30 = vpack.c.bf16 %v61_v26, %v60_v25  ;;  %v53_v36 = vld [vmem:[%s6300_s3 + $0x10] sm:$0xff]  ;;  %v56_v39 = vld [vmem:[%s6300_s3 + $0x28] sm:$0xff]  ;;  %v58_v40 = vld [vmem:[%s6300_s3 + $0x38] sm:$0xff]  ;;  %v322_v26 = vlaneseq }
   0x9   :  { %v4837_v43 = vpack.c.bf16 %v53_v36, %v51_v35  ;;  %v4839_v46 = vpack.c.bf16 %v58_v40, %v56_v39  ;;  %v55_v63 = vld [vmem:[%s6300_s3 + $0x20] sm:$0xff]  ;;  %v62_v2 = vld [vmem:[%s6301_s5 + $0x10] sm:$0xff]  ;;  %v63_v3 = vld [vmem:[%s6301_s5 + $0x18] sm:$0xff] }
   0xa   :  { %126 = vrot.lane.b32.xlu0 %v106_v11, %s5335_s29  ;;  %128 = vrot.lane.b32.xlu1 %v5458_v12, %s5335_s29  ;;  %v4135_v5 = vld [vmem:[%s6302_s2] ss:$0 sm:$0xff] }
   0xb   :  { %4830 = vmatpush3.bf16.msra.mxu0 %v4827_v8  ;;  %5071 = vmatpush3.bf16.msra.mxu1 %v4827_v8 }
   0xc   :  { %4832 = vmatprep.subr.bf16.mxu0 %v4831_v13  ;;  %5069 = vmatprep.subr.bf16.mxu1 %v4831_v13 }
   0xe   :  { %151 = vrot.lane.b32.xlu0 %v5458_v12, %s5336_s30  ;;  %153 = vrot.lane.b32.xlu1 %v5466_v14, %s5336_s30 }
   0xf   :  { %4834 = vmatpush3.bf16.msra.mxu0 %v4831_v13  ;;  %5072 = vmatpush3.bf16.msra.mxu1 %v4831_v13 }
  0x10   :  { %4843 = vmatprep.subr.bf16.mxu0 %v5337_v18  ;;  %4836 = vmatprep.subr.bf16.mxu1 %v4835_v19 }
  0x12   :  { %130 = vrot.lane.b32.xlu0 %v5466_v14, %s5335_s29  ;;  %132 = vrot.lane.b32.xlu1 %v109_v15, %s5335_s29 }
  0x16   :  { %155 = vrot.lane.b32.xlu0 %v109_v15, %s5336_s30  ;;  %122 = vrot.lane.b32.xlu1 %v5434_v4, %s5335_s29 }
  0x1a   :  { %157 = vrot.lane.b32.xlu0 %v5338_v21, %s5336_s30  ;;  %124 = vrot.lane.b32.xlu1 %v105_v20, %s5335_s29 }
  0x1e   :  { %147 = vrot.lane.b32.xlu0 %v105_v20, %s5336_s30  ;;  %149 = vrot.lane.b32.xlu1 %v106_v11, %s5336_s30 }
  0x74   :  { %v119_v22 = vpop.permute.xlu0 %118  ;;  %v144_v23 = vpop.permute.xlu1 %143 }
  0x75   :  { %v168_v24 = vsel %vm167_vm0, 0.0, %v119_v22 }
  0x76   :  { %v177_v27 = vsel %vm176_vm1, %v168_v24, %v144_v23 }
  0x77   :  { %4431 = vmatprep.mubr.msk.f32.mxu0 %vm191_vm2, %v177_v27  ;;  %v5598_v27 = vshrl.u32 %v322_v26, 7 }
  0x78   :  { %v121_v28 = vpop.permute.xlu0 %120  ;;  %v146_v29 = vpop.permute.xlu1 %145 }
  0x79   :  { %v169_v31 = vsel %vm167_vm0, %v5414_v0, %v121_v28  ;;  %v57_v0 = vld [vmem:[%s6300_s3 + $0x30] sm:$0xff]  ;;  %v324_v28 = vsub.s32 0, %v5598_v27 }
  0x7a   :  { %v178_v32 = vsel %vm176_vm1, %v169_v31, %v146_v29  ;;  %v59_v29 = vld [vmem:[%s6303_s4] sm:$0x3]  ;;  %v328_v31 = vsub.s32 1, %v5598_v27  ;;  %s5340_s4 = smov 64  }
  0x7b   :  { %4432 = vmatmul.mubr.msk.f32.vlgmr.msra.gmra.mrb[0].mxu0 %vm191_vm2, %v178_v32  ;;  %v325_v32 = vrot.slane %v59_v29, %v324_v28 }
  0x7c   :  { %v127_v33 = vpop.permute.xlu0 %126  ;;  %v129_v34 = vpop.permute.xlu1 %128  ;;  %4845 = vmatpush3.bf16.msra.mxu0 %v5505_v30 }
  0x7d   :  { %4846 = vmatprep.subr.bf16.mxu0 %v5337_v18  ;;  %v172_v37 = vsel %vm167_vm0, %v105_v20, %v127_v33  ;;  %v173_v38 = vsel %vm167_vm0, %v106_v11, %v129_v34  ;;  %v5609_v33 = vrot.slane %v59_v29, %v328_v31 }
  0x80   :  { %v152_v41 = vpop.permute.xlu0 %151  ;;  %v154_v42 = vpop.permute.xlu1 %153 }
  0x81   :  { %v182_v44 = vsel %vm176_vm1, %v173_v38, %v154_v42  ;;  %v181_v45 = vsel %vm176_vm1, %v172_v37, %v152_v41 }
  0x82   :  { %4437 = vmatprep.mubr.msk.f32.mxu1 %vm191_vm2, %v181_v45 }
  0x83   :  { %4438 = vmatmul.mubr.msk.f32.vlgmr.msra.gmra.mrb[0].mxu1 %vm191_vm2, %v182_v44 }
  0x84   :  { %v131_v47 = vpop.permute.xlu0 %130  ;;  %v133_v48 = vpop.permute.xlu1 %132  ;;  %4838 = vmatpush1.bf16.msra.mxu1 %v4837_v43 }
  0x85   :  { %4840 = vmatprep.subr.bf16.mxu1 %v4839_v46  ;;  %v174_v49 = vsel %vm167_vm0, %v5458_v12, %v131_v47  ;;  %v175_v53 = vsel %vm167_vm0, %v5466_v14, %v133_v48 }
  0x88   :  { %v156_v50 = vpop.permute.xlu0 %155  ;;  %v123_v51 = vpop.permute.xlu1 %122 }
  0x89   :  { %v183_v52 = vsel %vm176_vm1, %v174_v49, %v156_v50  ;;  %v170_v57 = vsel %vm167_vm0, %v5419_v1, %v123_v51  ;;  %v4841_v1 = vpack.c.bf16 %v57_v0, %v55_v63 }
  0x8a   :  { %4440 = vmatprep.mubr.msk.f32.mxu1 %vm191_vm2, %v183_v52 }
  0x8b   :  { %4842 = vmatpush1.bf16.msra.mxu1 %v4841_v1 }
  0x8c   :  { %v158_v54 = vpop.permute.xlu0 %157  ;;  %v125_v55 = vpop.permute.xlu1 %124  ;;  %4855 = vmatprep.subr.bf16.mxu1 %v5337_v18 }
  0x8d   :  { %v184_v56 = vsel %vm176_vm1, %v175_v53, %v158_v54  ;;  %v171_v58 = vsel %vm167_vm0, %v5434_v4, %v125_v55  ;;  %v5560_v4 = vpack.c.bf16 %v63_v3, %v62_v2 }
  0x8e   :  { %4441 = vmatmul.mubr.msk.f32.gmra.mrb[2].mxu1 %vm191_vm2, %v184_v56 }
  0x8f   :  { %420 = vmatprep.mubr.f32.mxu1 %v5338_v21  ;;  %4848 = vmatpush3.bf16.msra.mxu0 %v5560_v4 }
  0x90   :  { %v148_v59 = vpop.permute.xlu0 %147  ;;  %v150_v60 = vpop.permute.xlu1 %149  ;;  %4849 = vmatprep.subr.bf16.mxu0 %v5337_v18 }
  0x91   :  { %v179_v61 = vsel %vm176_vm1, %v170_v57, %v148_v59  ;;  %v180_v62 = vsel %vm176_vm1, %v171_v58, %v150_v60 }
  0x92   :  { %4434 = vmatprep.mubr.msk.f32.mxu0 %vm191_vm2, %v179_v61 }
  0x93   :  { %4435 = vmatmul.mubr.msk.f32.gmra.mrb[2].mxu0 %vm191_vm2, %v180_v62 }
  0x94   :  { %4451 = vmatprep.mubr.msk.f32.mxu0 %vm5339_vm3, %v5338_v21 }
  0x97   :  { %4452 = vmatmul.mubr.f32.vlgmr.msra.gmra.mrb[4].mxu0 %v5338_v21 }
  0x98   :  { %4851 = vmatpush3.bf16.msra.mxu0 %v5505_v30  ;;  %4462 = vmatprep.mubr.msk.f32.mxu0 %vm5339_vm3, %v5338_v21 }
  0x99   :  { %4852 = vmatprep.subr.bf16.mxu0 %v5337_v18 }
  0x9c   :  { %4854 = vmatpush3.bf16.msra.mxu0 %v5560_v4 }
  0x9d   :  { %4861 = vmatprep.subr.bf16.mxu0 %v5337_v18 }
 0x14e   :  { %v4433_v6 = vpop.f32.mrb[0].mxu0 }
 0x14f   :  { %v282_v7 = vpop.f32.mrb[1].mxu0  ;;  %v288_v9 = vadd.f32 %v4433_v6, %v4135_v5 }
 0x150   :  { %v283_v8 = vadd.f32 %v4135_v5, %v282_v7 }
 0x152   :  { %4144 = vmatmul.mubr.msk.f32.vlgmr.msra.gmra.mrb[4].mxu1 %vm176_vm1, %v283_v8 }
 0x153   :  { %426 = vmatprep.mubr.f32.mxu1 %v5338_v21  ;;  %4857 = vmatpush3.bf16.msra.mxu1 %v5505_v30 }
 0x154   :  { %4858 = vmatprep.subr.bf16.mxu1 %v5337_v18 }
 0x156   :  { %4145 = vmatmul.mubr.msk.f32.gmra.mrb[6].mxu1 %vm176_vm1, %v288_v9  ;;  %v4439_v10 = vpop.f32.mrb[0].mxu1 }
 0x157   :  { %432 = vmatprep.mubr.f32.mxu1 %v5338_v21  ;;  %v302_v11 = vpop.f32.mrb[1].mxu1  ;;  %4860 = vmatpush3.bf16.msra.mxu1 %v5560_v4  ;;  %v308_v20 = vadd.f32 %v4439_v10, %v4135_v5 }
 0x158   :  { %4867 = vmatprep.subr.bf16.mxu1 %v5337_v18  ;;  %v303_v19 = vadd.f32 %v4135_v5, %v302_v11 }
 0x161   :  { %v4442_v12 = vpop.f32.mrb[2].mxu1 }
 0x162   :  { %v312_v13 = vpop.f32.mrb[3].mxu1  ;;  %v318_v23 = vadd.f32 %v4442_v12, %v4135_v5 }
 0x163   :  { %v313_v22 = vadd.f32 %v4135_v5, %v312_v13 }
 0x166   :  { %v4436_v14 = vpop.f32.mrb[2].mxu0 }
 0x167   :  { %v292_v15 = vpop.f32.mrb[3].mxu0  ;;  %v298_v17 = vadd.f32 %v4436_v14, %v4135_v5 }
 0x168   :  { %v293_v16 = vadd.f32 %v4135_v5, %v292_v15 }
 0x16a   :  { %4146 = vmatmul.mubr.msk.f32.gmra.mrb[8].mxu1 %vm176_vm1, %v293_v16  ;;  %v537_v24 = vpop.f32.mrb[4].mxu0 }
 0x16b   :  { %438 = vmatprep.mubr.f32.mxu1 %v5338_v21  ;;  %v4453_v25 = vpop.f32.mrb[5].mxu0 }
 0x16e   :  { %4147 = vmatmul.mubr.msk.f32.gmra.mrb[10].mxu1 %vm176_vm1, %v298_v17 }
 0x16f   :  { %444 = vmatprep.mubr.f32.mxu1 %v5338_v21 }
 0x172   :  { %4148 = vmatmul.mubr.msk.f32.gmra.mrb[12].mxu1 %vm176_vm1, %v303_v19 }
 0x173   :  { %450 = vmatprep.mubr.f32.mxu1 %v5338_v21 }
 0x176   :  { %4149 = vmatmul.mubr.msk.f32.gmra.mrb[14].mxu1 %vm176_vm1, %v308_v20 }
 0x177   :  { %456 = vmatprep.mubr.f32.mxu1 %v5338_v21 }
 0x17a   :  { %4150 = vmatmul.mubr.msk.f32.gmra.mrb[16].mxu1 %vm176_vm1, %v313_v22 }
 0x17b   :  { %462 = vmatprep.mubr.f32.mxu1 %v5338_v21 }
 0x17e   :  { %4151 = vmatmul.mubr.msk.f32.gmra.mrb[18].mxu1 %vm176_vm1, %v318_v23 }
 0x17f   :  { %4473 = vmatprep.mubr.msk.f32.mxu1 %vm5339_vm3, %v5338_v21 }
 0x225   :  { %v422_v34 = vpop.f32.mrb[4].mxu1 }
 0x226   :  { %v423_v35 = vadd.f32 %v422_v34, %v325_v32  ;;  %v424_v36 = vpop.f32.mrb[5].mxu1 }
 0x227   :  { %v5612_v37 = vadd.f32 %v424_v36, %v5609_v33 }
 0x228   :  { %v541_v38 = vadd.f32 %v537_v24, %v423_v35 }
 0x229   :  { %v428_v39 = vpop.f32.mrb[6].mxu1 }
 0x22a   :  { %5079 = vtanh.f32 %v541_v38  ;;  %v429_v40 = vadd.f32 %v428_v39, %v325_v32  ;;  %v430_v41 = vpop.f32.mrb[7].mxu1  ;;  %v4152_v3 = vmul.f32 -1.442695, %v541_v38 }
 0x22b   :  { %v5615_v42 = vadd.f32 %v430_v41, %v5609_v33 }
 0x22c   :  { %5081 = vpow2.f32 %v4152_v3 }
 0x234   :  { %v5080_v43 = vpop.eup %5079 }
 0x235   :  { %551 = vrot.lane.b32.xlu0 %v5080_v43, %s5336_s30 }
 0x236   :  { %v5082_v5 = vpop.eup %5081 }
 0x237   :  { %v545_v6 = vadd.f32 1.0, %v5082_v5 }
 0x239   :  { %5083 = vrcp.f32 %v545_v6 }
 0x23d   :  { %v434_v44 = vpop.f32.mrb[8].mxu1 }
 0x23e   :  { %v5618_v45 = vadd.f32 %v434_v44, %v325_v32  ;;  %v436_v46 = vpop.f32.mrb[9].mxu1 }
 0x23f   :  { %v5621_v47 = vadd.f32 %v436_v46, %v5609_v33 }
 0x241   :  { %v440_v48 = vpop.f32.mrb[10].mxu1 }
 0x242   :  { %v5623_v49 = vadd.f32 %v440_v48, %v325_v32  ;;  %v442_v50 = vpop.f32.mrb[11].mxu1 }
 0x243   :  { %v5626_v51 = vadd.f32 %v442_v50, %v5609_v33  ;;  %v5084_v7 = vpop.eup %5083 }
 0x244   :  { %v549_v10 = vmul.f32 0.0, %v5084_v7 }
 0x245   :  { %v446_v52 = vpop.f32.mrb[12].mxu1 }
 0x246   :  { %v5628_v53 = vadd.f32 %v446_v52, %v325_v32  ;;  %v448_v54 = vpop.f32.mrb[13].mxu1 }
 0x247   :  { %v5631_v55 = vadd.f32 %v448_v54, %v5609_v33 }
 0x249   :  { %v452_v56 = vpop.f32.mrb[14].mxu1 }
 0x24a   :  { %v5633_v57 = vadd.f32 %v452_v56, %v325_v32  ;;  %v454_v58 = vpop.f32.mrb[15].mxu1 }
 0x24b   :  { %v5636_v59 = vadd.f32 %v454_v58, %v5609_v33 }
 0x24d   :  { %v458_v60 = vpop.f32.mrb[16].mxu1 }
 0x24e   :  { %v5638_v61 = vadd.f32 %v458_v60, %v325_v32  ;;  %v460_v62 = vpop.f32.mrb[17].mxu1 }
 0x24f   :  { %v5641_v63 = vadd.f32 %v460_v62, %v5609_v33 }
 0x251   :  { %v464_v0 = vpop.f32.mrb[18].mxu1 }
 0x252   :  { %v5643_v1 = vadd.f32 %v464_v0, %v325_v32  ;;  %v5645_v2 = vpop.f32.mrb[19].mxu1 }
 0x2a7   :  { %v552_v8 = vpop.permute.xlu0 %551 }
 0x2a8   :  { %v554_v9 = vmul.f32 %v5084_v7, %v552_v8 }
 0x2aa   :  { %556 = vrot.lane.b32.xlu1 %v554_v9, %s5336_s30 }
 0x31c   :  { %v557_v11 = vpop.permute.xlu1 %556 }
 0x31d   :  { %v559_v12 = vadd.f32 %v557_v11, %v549_v10 }
 0x31f   :  { %5085 = vtanh.f32 %v559_v12 }
 0x329   :  { %v5086_v13 = vpop.eup %5085 }
 0x32a   :  { %562 = vrot.lane.b32.xlu0 %v5086_v13, %s5336_s30 }
 0x39c   :  { %v563_v14 = vpop.permute.xlu0 %562 }
 0x39d   :  { %v565_v15 = vmul.f32 %v5084_v7, %v563_v14 }
 0x39f   :  { %567 = vrot.lane.b32.xlu1 %v565_v15, %s5340_s4 }
 0x411   :  { %v568_v16 = vpop.permute.xlu1 %567 }
 0x412   :  { %570 = vst.msk [vmem:[#allocation2] sm:$0xff] %vm176_vm1, %v568_v16  ;;  %4463 = vmatmul.mubr.msk.f32.vlgmr.msra.gmra.mrb[6].mxu0 %vm176_vm1, %v568_v16 }
 0x413   :  { %4863 = vmatpush3.bf16.msra.mxu0 %v5505_v30  ;;  %4484 = vmatprep.mubr.msk.f32.mxu0 %vm5339_vm3, %v5338_v21 }
 0x414   :  { %4864 = vmatprep.subr.bf16.mxu0 %v5337_v18 }
 0x417   :  { %4866 = vmatpush3.bf16.msra.mxu0 %v5560_v4 }
 0x418   :  { %4873 = vmatprep.subr.bf16.mxu0 %v5337_v18 }
 0x4e5   :  { %v639_v17 = vpop.f32.mrb[6].mxu0 }
 0x4e6   :  { %v643_v19 = vadd.f32 %v639_v17, %v429_v40  ;;  %v4464_v20 = vpop.f32.mrb[7].mxu0 }
 0x4e8   :  { %5087 = vtanh.f32 %v643_v19  ;;  %v4154_v23 = vmul.f32 -1.442695, %v643_v19 }
 0x4ea   :  { %5089 = vpow2.f32 %v4154_v23 }
 0x4f2   :  { %v5088_v22 = vpop.eup %5087 }
 0x4f3   :  { %653 = vrot.lane.b32.xlu0 %v5088_v22, %s5336_s30 }
 0x4f4   :  { %v5090_v24 = vpop.eup %5089 }
 0x4f5   :  { %v647_v25 = vadd.f32 1.0, %v5090_v24 }
 0x4f7   :  { %5091 = vrcp.f32 %v647_v25 }
 0x501   :  { %v5092_v26 = vpop.eup %5091 }
 0x502   :  { %v651_v34 = vmul.f32 %v5092_v26, %v559_v12 }
 0x565   :  { %v654_v29 = vpop.permute.xlu0 %653 }
 0x566   :  { %v656_v32 = vmul.f32 %v5092_v26, %v654_v29 }
 0x568   :  { %658 = vrot.lane.b32.xlu1 %v656_v32, %s5336_s30 }
 0x5da   :  { %v659_v35 = vpop.permute.xlu1 %658 }
 0x5db   :  { %v661_v36 = vadd.f32 %v659_v35, %v651_v34 }
 0x5dd   :  { %5093 = vtanh.f32 %v661_v36 }
 0x5e7   :  { %v5094_v38 = vpop.eup %5093 }
 0x5e8   :  { %664 = vrot.lane.b32.xlu0 %v5094_v38, %s5336_s30 }
 0x65a   :  { %v665_v39 = vpop.permute.xlu0 %664 }
 0x65b   :  { %v667_v40 = vmul.f32 %v5092_v26, %v665_v39 }
 0x65d   :  { %669 = vrot.lane.b32.xlu1 %v667_v40, %s5340_s4 }
 0x6cf   :  { %v670_v41 = vpop.permute.xlu1 %669 }
 0x6d0   :  { %672 = vst.msk [vmem:[#allocation2 + $0x8] sm:$0xff] %vm176_vm1, %v670_v41  ;;  %4474 = vmatmul.mubr.msk.f32.vlgmr.msra.gmra.mrb[20].mxu1 %vm176_vm1, %v670_v41 }
 0x6d1   :  { %4869 = vmatpush3.bf16.msra.mxu1 %v5505_v30  ;;  %4495 = vmatprep.mubr.msk.f32.mxu1 %vm5339_vm3, %v5338_v21 }
 0x6d2   :  { %4870 = vmatprep.subr.bf16.mxu1 %v5337_v18 }
 0x6d5   :  { %4872 = vmatpush3.bf16.msra.mxu1 %v5560_v4 }
 0x6d6   :  { %4879 = vmatprep.subr.bf16.mxu1 %v5337_v18 }
 0x7a3   :  { %v741_v43 = vpop.f32.mrb[20].mxu1 }
 0x7a4   :  { %v745_v44 = vadd.f32 %v741_v43, %v5618_v45  ;;  %v4475_v46 = vpop.f32.mrb[21].mxu1 }
 0x7a6   :  { %5095 = vtanh.f32 %v745_v44  ;;  %v4156_v50 = vmul.f32 -1.442695, %v745_v44 }
 0x7a8   :  { %5097 = vpow2.f32 %v4156_v50 }
 0x7b0   :  { %v5096_v48 = vpop.eup %5095 }
 0x7b1   :  { %755 = vrot.lane.b32.xlu0 %v5096_v48, %s5336_s30 }
 0x7b2   :  { %v5098_v52 = vpop.eup %5097 }
 0x7b3   :  { %v749_v54 = vadd.f32 1.0, %v5098_v52 }
 0x7b5   :  { %5099 = vrcp.f32 %v749_v54 }
 0x7bf   :  { %v5100_v56 = vpop.eup %5099 }
 0x7c0   :  { %v753_v62 = vmul.f32 %v5100_v56, %v661_v36 }
 0x823   :  { %v756_v58 = vpop.permute.xlu0 %755 }
 0x824   :  { %v758_v60 = vmul.f32 %v5100_v56, %v756_v58 }
 0x826   :  { %760 = vrot.lane.b32.xlu1 %v758_v60, %s5336_s30 }
 0x898   :  { %v761_v0 = vpop.permute.xlu1 %760 }
 0x899   :  { %v763_v3 = vadd.f32 %v761_v0, %v753_v62 }
 0x89b   :  { %5101 = vtanh.f32 %v763_v3 }
 0x8a5   :  { %v5102_v45 = vpop.eup %5101 }
 0x8a6   :  { %766 = vrot.lane.b32.xlu0 %v5102_v45, %s5336_s30 }
 0x918   :  { %v767_v5 = vpop.permute.xlu0 %766 }
 0x919   :  { %v769_v6 = vmul.f32 %v5100_v56, %v767_v5 }
 0x91b   :  { %771 = vrot.lane.b32.xlu1 %v769_v6, %s5340_s4 }
 0x98d   :  { %v772_v7 = vpop.permute.xlu1 %771 }
 0x98e   :  { %774 = vst.msk [vmem:[#allocation2 + $0x10] sm:$0xff] %vm176_vm1, %v772_v7  ;;  %4485 = vmatmul.mubr.msk.f32.vlgmr.msra.gmra.mrb[8].mxu0 %vm176_vm1, %v772_v7 }
 0x98f   :  { %4875 = vmatpush3.bf16.msra.mxu0 %v5505_v30  ;;  %4506 = vmatprep.mubr.msk.f32.mxu0 %vm5339_vm3, %v5338_v21 }
 0x990   :  { %4876 = vmatprep.subr.bf16.mxu0 %v5337_v18 }
 0x993   :  { %4878 = vmatpush3.bf16.msra.mxu0 %v5560_v4 }
 0x994   :  { %4885 = vmatprep.subr.bf16.mxu0 %v5337_v18 }
 0xa61   :  { %v843_v8 = vpop.f32.mrb[8].mxu0 }
 0xa62   :  { %v847_v9 = vadd.f32 %v843_v8, %v5623_v49  ;;  %v4486_v10 = vpop.f32.mrb[9].mxu0 }
 0xa63   :  { %v64_v10 = vld [vmem:[%s6304_s6] sm:$0xff] }
 0xa64   :  { %5103 = vtanh.f32 %v847_v9  ;;  %v4158_v12 = vmul.f32 -1.442695, %v847_v9 }
 0xa66   :  { %5105 = vpow2.f32 %v4158_v12 }
 0xa6e   :  { %v5104_v11 = vpop.eup %5103 }
 0xa6f   :  { %857 = vrot.lane.b32.xlu0 %v5104_v11, %s5336_s30  ;;  %v65_v11 = vld [vmem:[%s6304_s6 + $0x8] sm:$0xff] }
 0xa70   :  { %v5106_v13 = vpop.eup %5105  ;;  %v5720_v12 = vpack.c.bf16 %v65_v11, %v64_v10 }
 0xa71   :  { %v851_v14 = vadd.f32 1.0, %v5106_v13  ;;  %v66_v13 = vld [vmem:[%s6304_s6 + $0x10] sm:$0xff] }
 0xa73   :  { %5107 = vrcp.f32 %v851_v14  ;;  %v67_v14 = vld [vmem:[%s6304_s6 + $0x18] sm:$0xff] }
 0xa7d   :  { %v5108_v15 = vpop.eup %5107 }
 0xa7e   :  { %v855_v19 = vmul.f32 %v5108_v15, %v763_v3 }
 0xae1   :  { %v858_v16 = vpop.permute.xlu0 %857 }
 0xae2   :  { %v860_v17 = vmul.f32 %v5108_v15, %v858_v16  ;;  %v5731_v16 = vpack.c.bf16 %v67_v14, %v66_v13 }
 0xae4   :  { %862 = vrot.lane.b32.xlu1 %v860_v17, %s5336_s30 }
 0xb56   :  { %v863_v20 = vpop.permute.xlu1 %862 }
 0xb57   :  { %v865_v22 = vadd.f32 %v863_v20, %v855_v19 }
 0xb59   :  { %5109 = vtanh.f32 %v865_v22 }
 0xb63   :  { %v5110_v49 = vpop.eup %5109 }
 0xb64   :  { %868 = vrot.lane.b32.xlu0 %v5110_v49, %s5336_s30 }
 0xbd6   :  { %v869_v23 = vpop.permute.xlu0 %868 }
 0xbd7   :  { %v871_v24 = vmul.f32 %v5108_v15, %v869_v23 }
 0xbd9   :  { %873 = vrot.lane.b32.xlu1 %v871_v24, %s5340_s4 }
 0xc4b   :  { %v874_v25 = vpop.permute.xlu1 %873 }
 0xc4c   :  { %876 = vst.msk [vmem:[#allocation2 + $0x18] sm:$0xff] %vm176_vm1, %v874_v25  ;;  %4496 = vmatmul.mubr.msk.f32.vlgmr.msra.gmra.mrb[22].mxu1 %vm176_vm1, %v874_v25 }
 0xc4d   :  { %4881 = vmatpush3.bf16.msra.mxu1 %v5505_v30  ;;  %4517 = vmatprep.mubr.msk.f32.mxu1 %vm5339_vm3, %v5338_v21 }
 0xc4e   :  { %4882 = vmatprep.subr.bf16.mxu1 %v5337_v18 }
 0xc51   :  { %4884 = vmatpush3.bf16.msra.mxu1 %v5560_v4 }
 0xc52   :  { %4891 = vmatprep.subr.bf16.mxu1 %v5337_v18 }
 0xd1f   :  { %v945_v26 = vpop.f32.mrb[22].mxu1 }
 0xd20   :  { %v949_v29 = vadd.f32 %v945_v26, %v5628_v53  ;;  %v4497_v32 = vpop.f32.mrb[23].mxu1 }
 0xd22   :  { %5111 = vtanh.f32 %v949_v29  ;;  %v4160_v35 = vmul.f32 -1.442695, %v949_v29 }
 0xd24   :  { %5113 = vpow2.f32 %v4160_v35 }
 0xd2c   :  { %v5112_v34 = vpop.eup %5111 }
 0xd2d   :  { %959 = vrot.lane.b32.xlu0 %v5112_v34, %s5336_s30 }
 0xd2e   :  { %v5114_v36 = vpop.eup %5113 }
 0xd2f   :  { %v953_v38 = vadd.f32 1.0, %v5114_v36 }
 0xd31   :  { %5115 = vrcp.f32 %v953_v38 }
 0xd3b   :  { %v5116_v39 = vpop.eup %5115 }
 0xd3c   :  { %v957_v43 = vmul.f32 %v5116_v39, %v865_v22  ;;  %v467_v22 = vadd.f32 %v5645_v2, %v5609_v33 }
 0xd9f   :  { %v960_v40 = vpop.permute.xlu0 %959 }
 0xda0   :  { %v962_v41 = vmul.f32 %v5116_v39, %v960_v40 }
 0xda2   :  { %964 = vrot.lane.b32.xlu1 %v962_v41, %s5336_s30 }
 0xe14   :  { %v965_v44 = vpop.permute.xlu1 %964 }
 0xe15   :  { %v967_v46 = vadd.f32 %v965_v44, %v957_v43 }
 0xe17   :  { %5117 = vtanh.f32 %v967_v46 }
 0xe21   :  { %v5118_v53 = vpop.eup %5117 }
 0xe22   :  { %970 = vrot.lane.b32.xlu0 %v5118_v53, %s5336_s30 }
 0xe94   :  { %v971_v48 = vpop.permute.xlu0 %970 }
 0xe95   :  { %v973_v50 = vmul.f32 %v5116_v39, %v971_v48 }
 0xe97   :  { %975 = vrot.lane.b32.xlu1 %v973_v50, %s5340_s4 }
 0xf09   :  { %v976_v52 = vpop.permute.xlu1 %975 }
 0xf0a   :  { %978 = vst.msk [vmem:[#allocation2 + $0x20] sm:$0xff] %vm176_vm1, %v976_v52  ;;  %4507 = vmatmul.mubr.msk.f32.vlgmr.msra.gmra.mrb[10].mxu0 %vm176_vm1, %v976_v52 }
 0xf0b   :  { %4887 = vmatpush3.bf16.msra.mxu0 %v5505_v30  ;;  %4528 = vmatprep.mubr.msk.f32.mxu0 %vm5339_vm3, %v5338_v21 }
 0xf0c   :  { %4888 = vmatprep.subr.bf16.mxu0 %v5337_v18 }
 0xf0f   :  { %4890 = vmatpush3.bf16.msra.mxu0 %v5560_v4 }
 0xf10   :  { %4897 = vmatprep.subr.bf16.mxu0 %v5337_v18 }
 0xfdd   :  { %v1047_v54 = vpop.f32.mrb[10].mxu0 }
 0xfde   :  { %v1051_v56 = vadd.f32 %v1047_v54, %v5633_v57  ;;  %v4508_v58 = vpop.f32.mrb[11].mxu0 }
 0xfe0   :  { %5119 = vtanh.f32 %v1051_v56  ;;  %v4162_v62 = vmul.f32 -1.442695, %v1051_v56 }
 0xfe2   :  { %5121 = vpow2.f32 %v4162_v62 }
 0xfea   :  { %v5120_v60 = vpop.eup %5119 }
 0xfeb   :  { %1061 = vrot.lane.b32.xlu0 %v5120_v60, %s5336_s30 }
 0xfec   :  { %v5122_v30 = vpop.eup %5121 }
 0xfed   :  { %v1055_v0 = vadd.f32 1.0, %v5122_v30 }
 0xfef   :  { %5123 = vrcp.f32 %v1055_v0 }
 0xff9   :  { %v5124_v3 = vpop.eup %5123 }
 0xffa   :  { %v1059_v4 = vmul.f32 %v5124_v3, %v967_v46 }
0x105d   :  { %v1062_v45 = vpop.permute.xlu0 %1061 }
0x105e   :  { %v1064_v5 = vmul.f32 %v5124_v3, %v1062_v45 }
0x1060   :  { %1066 = vrot.lane.b32.xlu1 %v1064_v5, %s5336_s30 }
0x10d2   :  { %v1067_v6 = vpop.permute.xlu1 %1066 }
0x10d3   :  { %v1069_v7 = vadd.f32 %v1067_v6, %v1059_v4 }
0x10d5   :  { %5125 = vtanh.f32 %v1069_v7 }
0x10df   :  { %v5126_v57 = vpop.eup %5125 }
0x10e0   :  { %1072 = vrot.lane.b32.xlu0 %v5126_v57, %s5336_s30 }
0x1152   :  { %v1073_v8 = vpop.permute.xlu0 %1072 }
0x1153   :  { %v1075_v9 = vmul.f32 %v5124_v3, %v1073_v8 }
0x1155   :  { %1077 = vrot.lane.b32.xlu1 %v1075_v9, %s5340_s4 }
0x11c7   :  { %v1078_v15 = vpop.permute.xlu1 %1077 }
0x11c8   :  { %1080 = vst.msk [vmem:[#allocation2 + $0x28] sm:$0xff] %vm176_vm1, %v1078_v15  ;;  %4518 = vmatmul.mubr.msk.f32.vlgmr.msra.gmra.mrb[24].mxu1 %vm176_vm1, %v1078_v15 }
0x11c9   :  { %4893 = vmatpush3.bf16.msra.mxu1 %v5720_v12  ;;  %4539 = vmatprep.mubr.msk.f32.mxu1 %vm5339_vm3, %v5338_v21 }
0x11ca   :  { %4894 = vmatprep.subr.bf16.mxu1 %v5337_v18 }
0x11cd   :  { %4896 = vmatpush3.bf16.msra.mxu1 %v5731_v16 }
0x11ce   :  { %4903 = vmatprep.subr.bf16.mxu1 %v5337_v18 }
0x11d0   :  { %4540 = vmatmul.mubr.f32.vlgmr.msra.gmra.mrb[26].mxu1 %v5338_v21 }
0x11d1   :  { %4905 = vmatpush3.bf16.msra.mxu1 %v5720_v12  ;;  %4561 = vmatprep.mubr.msk.f32.mxu1 %vm5339_vm3, %v5338_v21 }
0x11d2   :  { %4906 = vmatprep.subr.bf16.mxu1 %v5337_v18 }
0x11d5   :  { %4908 = vmatpush3.bf16.msra.mxu1 %v5731_v16 }
0x11d6   :  { %4915 = vmatprep.subr.bf16.mxu1 %v5337_v18 }
0x129b   :  { %v1149_v17 = vpop.f32.mrb[24].mxu1 }
0x129c   :  { %v1153_v19 = vadd.f32 %v1149_v17, %v5638_v61  ;;  %v4519_v20 = vpop.f32.mrb[25].mxu1 }
0x129e   :  { %5127 = vtanh.f32 %v1153_v19  ;;  %v4164_v29 = vmul.f32 -1.442695, %v1153_v19 }
0x12a3   :  { %v1351_v49 = vpop.f32.mrb[26].mxu1 }
0x12a4   :  { %v1355_v23 = vadd.f32 %v1351_v49, %v467_v22  ;;  %v4541_v24 = vpop.f32.mrb[27].mxu1 }
0x12a6   :  { %5129 = vtanh.f32 %v1355_v23  ;;  %v4167_v32 = vmul.f32 -1.442695, %v1355_v23 }
0x12a7   :  { %5131 = vpow2.f32 %v4164_v29 }
0x12a8   :  { %v5128_v25 = vpop.eup %5127  ;;  %5133 = vpow2.f32 %v4167_v32 }
0x12a9   :  { %1163 = vrot.lane.b32.xlu0 %v5128_v25, %s5336_s30 }
0x12b0   :  { %v5130_v26 = vpop.eup %5129 }
0x12b1   :  { %1365 = vrot.lane.b32.xlu1 %v5130_v26, %s5336_s30  ;;  %v5132_v61 = vpop.eup %5131 }
0x12b2   :  { %v1157_v34 = vadd.f32 1.0, %v5132_v61  ;;  %v5134_v35 = vpop.eup %5133 }
0x12b3   :  { %v1359_v36 = vadd.f32 1.0, %v5134_v35 }
0x12b4   :  { %5135 = vrcp.f32 %v1157_v34 }
0x12b5   :  { %5137 = vrcp.f32 %v1359_v36 }
0x12be   :  { %v5136_v33 = vpop.eup %5135 }
0x12bf   :  { %v5138_v39 = vpop.eup %5137  ;;  %v1161_v43 = vmul.f32 %v5136_v33, %v1069_v7 }
0x12c0   :  { %v1363_v53 = vmul.f32 0.0, %v5138_v39 }
0x131b   :  { %v1164_v2 = vpop.permute.xlu0 %1163 }
0x131c   :  { %v1166_v38 = vmul.f32 %v5136_v33, %v1164_v2 }
0x131e   :  { %1168 = vrot.lane.b32.xlu0 %v1166_v38, %s5336_s30 }
0x1323   :  { %v1366_v40 = vpop.permute.xlu1 %1365 }
0x1324   :  { %v1368_v41 = vmul.f32 %v5138_v39, %v1366_v40 }
0x1326   :  { %1370 = vrot.lane.b32.xlu1 %v1368_v41, %s5336_s30 }
0x1390   :  { %v1169_v44 = vpop.permute.xlu0 %1168 }
0x1391   :  { %v5752_v46 = vadd.f32 %v1169_v44, %v1161_v43 }
0x1393   :  { %5139 = vtanh.f32 %v5752_v46 }
0x1398   :  { %v1371_v48 = vpop.permute.xlu1 %1370 }
0x1399   :  { %v1373_v50 = vadd.f32 %v1371_v48, %v1363_v53 }
0x139b   :  { %5141 = vtanh.f32 %v1373_v50 }
0x139d   :  { %v5140_v52 = vpop.eup %5139 }
0x139e   :  { %1174 = vrot.lane.b32.xlu0 %v5140_v52, %s5336_s30 }
0x13a5   :  { %v5142_v54 = vpop.eup %5141 }
0x13a6   :  { %1376 = vrot.lane.b32.xlu1 %v5142_v54, %s5336_s30 }
0x1410   :  { %v1175_v56 = vpop.permute.xlu0 %1174 }
0x1411   :  { %v1177_v58 = vmul.f32 %v5136_v33, %v1175_v56 }
0x1413   :  { %1179 = vrot.lane.b32.xlu0 %v1177_v58, %s5340_s4 }
0x1418   :  { %v1377_v60 = vpop.permute.xlu1 %1376 }
0x1419   :  { %v1379_v62 = vmul.f32 %v5138_v39, %v1377_v60 }
0x141b   :  { %1381 = vrot.lane.b32.xlu1 %v1379_v62, %s5340_s4 }
0x1485   :  { %v1180_v30 = vpop.permute.xlu0 %1179 }
0x1486   :  { %1182 = vst.msk [vmem:[#allocation2 + $0x30] sm:$0xff] %vm176_vm1, %v1180_v30  ;;  %4529 = vmatmul.mubr.msk.f32.vlgmr.msra.gmra.mrb[12].mxu0 %vm176_vm1, %v1180_v30 }
0x1487   :  { %4899 = vmatpush3.bf16.msra.mxu0 %v5720_v12  ;;  %4550 = vmatprep.mubr.msk.f32.mxu0 %vm5339_vm3, %v5338_v21 }
0x1488   :  { %4900 = vmatprep.subr.bf16.mxu0 %v5337_v18 }
0x148b   :  { %4902 = vmatpush3.bf16.msra.mxu0 %v5731_v16 }
0x148c   :  { %4909 = vmatprep.subr.bf16.mxu0 %v5337_v18 }
0x148d   :  { %v1382_v0 = vpop.permute.xlu1 %1381 }
0x148e   :  { %1384 = vst.msk [vmem:[#allocation3 + $0x38] sm:$0xff] %vm176_vm1, %v1382_v0  ;;  %4551 = vmatmul.mubr.msk.f32.vlgmr.msra.gmra.mrb[14].mxu0 %vm176_vm1, %v1382_v0 }
0x148f   :  { %4911 = vmatpush3.bf16.msra.mxu0 %v5720_v12  ;;  %4572 = vmatprep.mubr.msk.f32.mxu0 %vm5339_vm3, %v5338_v21 }
0x1490   :  { %4912 = vmatprep.subr.bf16.mxu0 %v5337_v18 }
0x1493   :  { %4914 = vmatpush3.bf16.msra.mxu0 %v5731_v16 }
0x1494   :  { %4921 = vmatprep.subr.bf16.mxu0 %v5337_v18 }
0x1559   :  { %v1251_v3 = vpop.f32.mrb[12].mxu0 }
0x155a   :  { %v5776_v45 = vadd.f32 %v1251_v3, %v5643_v1  ;;  %v4530_v5 = vpop.f32.mrb[13].mxu0 }
0x1561   :  { %v1453_v4 = vpop.f32.mrb[14].mxu0 }
0x1562   :  { %v1457_v6 = vadd.f32 %v1453_v4, %v5641_v63  ;;  %v4552_v7 = vpop.f32.mrb[15].mxu0 }
0x1564   :  { %5143 = vtanh.f32 %v1457_v6  ;;  %v4169_v8 = vmul.f32 -1.442695, %v1457_v6 }
0x1566   :  { %5145 = vpow2.f32 %v4169_v8 }
0x156e   :  { %v5144_v57 = vpop.eup %5143 }
0x156f   :  { %1467 = vrot.lane.b32.xlu0 %v5144_v57, %s5336_s30 }
0x1570   :  { %v5146_v9 = vpop.eup %5145 }
0x1571   :  { %v1461_v10 = vadd.f32 1.0, %v5146_v9 }
0x1573   :  { %5147 = vrcp.f32 %v1461_v10 }
0x157d   :  { %v5148_v11 = vpop.eup %5147 }
0x157e   :  { %v1465_v1 = vmul.f32 %v5148_v11, %v1373_v50 }
0x15e1   :  { %v1468_v13 = vpop.permute.xlu0 %1467 }
0x15e2   :  { %v1470_v14 = vmul.f32 %v5148_v11, %v1468_v13 }
0x15e4   :  { %1472 = vrot.lane.b32.xlu1 %v1470_v14, %s5336_s30 }
0x1656   :  { %v1473_v15 = vpop.permute.xlu1 %1472 }
0x1657   :  { %v1475_v17 = vadd.f32 %v1473_v15, %v1465_v1 }
0x1659   :  { %5149 = vtanh.f32 %v1475_v17 }
0x1663   :  { %v5150_v63 = vpop.eup %5149 }
0x1664   :  { %1478 = vrot.lane.b32.xlu0 %v5150_v63, %s5336_s30 }
0x16d6   :  { %v1479_v19 = vpop.permute.xlu0 %1478 }
0x16d7   :  { %v1481_v20 = vmul.f32 %v5148_v11, %v1479_v19 }
0x16d9   :  { %1483 = vrot.lane.b32.xlu1 %v1481_v20, %s5340_s4 }
0x174b   :  { %v1484_v22 = vpop.permute.xlu1 %1483 }
0x174c   :  { %1486 = vst.msk [vmem:[#allocation3 + $0x30] sm:$0xff] %vm176_vm1, %v1484_v22  ;;  %4562 = vmatmul.mubr.msk.f32.vlgmr.msra.gmra.mrb[28].mxu1 %vm176_vm1, %v1484_v22 }
0x174d   :  { %4917 = vmatpush3.bf16.msra.mxu1 %v5720_v12  ;;  %4583 = vmatprep.mubr.msk.f32.mxu1 %vm5339_vm3, %v5338_v21 }
0x174e   :  { %4918 = vmatprep.subr.bf16.mxu1 %v5337_v18 }
0x1751   :  { %4920 = vmatpush3.bf16.msra.mxu1 %v5731_v16 }
0x1752   :  { %4927 = vmatprep.subr.bf16.mxu1 %v5337_v18 }
0x181f   :  { %v1555_v49 = vpop.f32.mrb[28].mxu1 }
0x1820   :  { %v1559_v23 = vadd.f32 %v1555_v49, %v5636_v59  ;;  %v4563_v24 = vpop.f32.mrb[29].mxu1 }
0x1822   :  { %5151 = vtanh.f32 %v1559_v23  ;;  %v4171_v26 = vmul.f32 -1.442695, %v1559_v23 }
0x1824   :  { %5153 = vpow2.f32 %v4171_v26 }
0x182c   :  { %v5152_v25 = vpop.eup %5151 }
0x182d   :  { %1569 = vrot.lane.b32.xlu0 %v5152_v25, %s5336_s30 }
0x182e   :  { %v5154_v29 = vpop.eup %5153 }
0x182f   :  { %v1563_v32 = vadd.f32 1.0, %v5154_v29 }
0x1831   :  { %5155 = vrcp.f32 %v1563_v32 }
0x183b   :  { %v5156_v61 = vpop.eup %5155 }
0x183c   :  { %v1567_v36 = vmul.f32 %v5156_v61, %v1475_v17 }
0x189f   :  { %v1570_v34 = vpop.permute.xlu0 %1569 }
0x18a0   :  { %v1572_v35 = vmul.f32 %v5156_v61, %v1570_v34 }
0x18a2   :  { %1574 = vrot.lane.b32.xlu1 %v1572_v35, %s5336_s30 }
0x1914   :  { %v1575_v33 = vpop.permute.xlu1 %1574 }
0x1915   :  { %v1577_v2 = vadd.f32 %v1575_v33, %v1567_v36 }
0x1917   :  { %5157 = vtanh.f32 %v1577_v2 }
0x1921   :  { %v5158_v59 = vpop.eup %5157 }
0x1922   :  { %1580 = vrot.lane.b32.xlu0 %v5158_v59, %s5336_s30 }
0x1994   :  { %v1581_v38 = vpop.permute.xlu0 %1580 }
0x1995   :  { %v1583_v39 = vmul.f32 %v5156_v61, %v1581_v38 }
0x1997   :  { %1585 = vrot.lane.b32.xlu1 %v1583_v39, %s5340_s4 }
0x1a09   :  { %v1586_v40 = vpop.permute.xlu1 %1585 }
0x1a0a   :  { %1588 = vst.msk [vmem:[#allocation3 + $0x28] sm:$0xff] %vm176_vm1, %v1586_v40  ;;  %4573 = vmatmul.mubr.msk.f32.vlgmr.msra.gmra.mrb[16].mxu0 %vm176_vm1, %v1586_v40 }
0x1a0b   :  { %4923 = vmatpush3.bf16.msra.mxu0 %v5720_v12  ;;  %4594 = vmatprep.mubr.msk.f32.mxu0 %vm5339_vm3, %v5338_v21 }
0x1a0c   :  { %4924 = vmatprep.subr.bf16.mxu0 %v5337_v18 }
0x1a0f   :  { %4926 = vmatpush3.bf16.msra.mxu0 %v5731_v16 }
0x1a10   :  { %4933 = vmatprep.subr.bf16.mxu0 %v5337_v18 }
0x1add   :  { %v1657_v41 = vpop.f32.mrb[16].mxu0 }
0x1ade   :  { %v1661_v43 = vadd.f32 %v1657_v41, %v5631_v55  ;;  %v4574_v44 = vpop.f32.mrb[17].mxu0 }
0x1ae0   :  { %5159 = vtanh.f32 %v1661_v43  ;;  %v4173_v48 = vmul.f32 -1.442695, %v1661_v43 }
0x1ae2   :  { %5161 = vpow2.f32 %v4173_v48 }
0x1aea   :  { %v5160_v53 = vpop.eup %5159 }
0x1aeb   :  { %1671 = vrot.lane.b32.xlu0 %v5160_v53, %s5336_s30 }
0x1aec   :  { %v5162_v50 = vpop.eup %5161 }
0x1aed   :  { %v1665_v52 = vadd.f32 1.0, %v5162_v50 }
0x1aef   :  { %5163 = vrcp.f32 %v1665_v52 }
0x1af9   :  { %v5164_v54 = vpop.eup %5163 }
0x1afa   :  { %v1669_v60 = vmul.f32 %v5164_v54, %v1577_v2 }
0x1b5d   :  { %v1672_v56 = vpop.permute.xlu0 %1671 }
0x1b5e   :  { %v1674_v58 = vmul.f32 %v5164_v54, %v1672_v56 }
0x1b60   :  { %1676 = vrot.lane.b32.xlu1 %v1674_v58, %s5336_s30 }
0x1bd2   :  { %v1677_v62 = vpop.permute.xlu1 %1676 }
0x1bd3   :  { %v1679_v30 = vadd.f32 %v1677_v62, %v1669_v60 }
0x1bd5   :  { %5165 = vtanh.f32 %v1679_v30 }
0x1bdf   :  { %v5166_v55 = vpop.eup %5165 }
0x1be0   :  { %1682 = vrot.lane.b32.xlu0 %v5166_v55, %s5336_s30 }
0x1c52   :  { %v1683_v0 = vpop.permute.xlu0 %1682 }
0x1c53   :  { %v1685_v3 = vmul.f32 %v5164_v54, %v1683_v0 }
0x1c55   :  { %1687 = vrot.lane.b32.xlu1 %v1685_v3, %s5340_s4 }
0x1cc7   :  { %v1688_v5 = vpop.permute.xlu1 %1687 }
0x1cc8   :  { %1690 = vst.msk [vmem:[#allocation3 + $0x20] sm:$0xff] %vm176_vm1, %v1688_v5  ;;  %4584 = vmatmul.mubr.msk.f32.vlgmr.msra.gmra.mrb[30].mxu1 %vm176_vm1, %v1688_v5 }
0x1cc9   :  { %4929 = vmatpush3.bf16.msra.mxu1 %v5720_v12  ;;  %4605 = vmatprep.mubr.msk.f32.mxu1 %vm5339_vm3, %v5338_v21 }
0x1cca   :  { %4930 = vmatprep.subr.bf16.mxu1 %v5337_v18 }
0x1ccd   :  { %4932 = vmatpush3.bf16.msra.mxu1 %v5731_v16 }
0x1d9b   :  { %v1759_v4 = vpop.f32.mrb[30].mxu1 }
0x1d9c   :  { %v1763_v6 = vadd.f32 %v1759_v4, %v5626_v51  ;;  %v4585_v7 = vpop.f32.mrb[31].mxu1 }
0x1d9e   :  { %5167 = vtanh.f32 %v1763_v6  ;;  %v4175_v8 = vmul.f32 -1.442695, %v1763_v6 }
0x1da0   :  { %5169 = vpow2.f32 %v4175_v8 }
0x1da8   :  { %v5168_v57 = vpop.eup %5167 }
0x1da9   :  { %1773 = vrot.lane.b32.xlu0 %v5168_v57, %s5336_s30 }
0x1daa   :  { %v5170_v9 = vpop.eup %5169 }
0x1dab   :  { %v1767_v10 = vadd.f32 1.0, %v5170_v9 }
0x1dad   :  { %5171 = vrcp.f32 %v1767_v10 }
0x1db7   :  { %v5172_v11 = vpop.eup %5171 }
0x1db8   :  { %v1771_v1 = vmul.f32 %v5172_v11, %v1679_v30 }
0x1e1b   :  { %v1774_v13 = vpop.permute.xlu0 %1773 }
0x1e1c   :  { %v1776_v14 = vmul.f32 %v5172_v11, %v1774_v13  ;;  %v69_v13 = vld [vmem:[%s6305_s7 + $0x8] sm:$0xff] }
0x1e1e   :  { %1778 = vrot.lane.b32.xlu1 %v1776_v14, %s5336_s30  ;;  %v71_v14 = vld [vmem:[%s6305_s7 + $0x18] sm:$0xff] }
0x1e90   :  { %v1779_v15 = vpop.permute.xlu1 %1778 }
0x1e91   :  { %v1781_v17 = vadd.f32 %v1779_v15, %v1771_v1  ;;  %v68_v1 = vld [vmem:[%s6305_s7] sm:$0xff] }
0x1e93   :  { %5173 = vtanh.f32 %v1781_v17 }
0x1e9d   :  { %v5174_v51 = vpop.eup %5173 }
0x1e9e   :  { %1784 = vrot.lane.b32.xlu0 %v5174_v51, %s5336_s30  ;;  %v70_v51 = vld [vmem:[%s6305_s7 + $0x10] sm:$0xff] }
0x1f10   :  { %v1785_v63 = vpop.permute.xlu0 %1784 }
0x1f11   :  { %v1787_v19 = vmul.f32 %v5172_v11, %v1785_v63  ;;  %v73_v63 = vld [vmem:[%s6305_s7 + $0x28] sm:$0xff] }
0x1f13   :  { %1789 = vrot.lane.b32.xlu1 %v1787_v19, %s5340_s4  ;;  %v75_v19 = vld [vmem:[%s6305_s7 + $0x38] sm:$0xff] }
0x1f85   :  { %v1790_v20 = vpop.permute.xlu1 %1789 }
0x1f86   :  { %1792 = vst.msk [vmem:[#allocation3 + $0x18] sm:$0xff] %vm176_vm1, %v1790_v20  ;;  %4595 = vmatmul.mubr.msk.f32.vlgmr.msra.gmra.mrb[18].mxu0 %vm176_vm1, %v1790_v20 }
0x1f87   :  { %4935 = vmatpush3.bf16.msra.mxu0 %v5720_v12  ;;  %4616 = vmatprep.mubr.msk.f32.mxu0 %vm5339_vm3, %v5338_v21 }
0x1f88   :  { %4936 = vmatprep.subr.bf16.mxu0 %v5337_v18 }
0x1f8b   :  { %4938 = vmatpush3.bf16.msra.mxu0 %v5731_v16 }
0x1f8c   :  { %4955 = vmatprep.subr.bf16.mxu0 %v5337_v18 }
0x2059   :  { %v1861_v22 = vpop.f32.mrb[18].mxu0 }
0x205a   :  { %v1865_v49 = vadd.f32 %v1861_v22, %v5621_v47  ;;  %v4596_v23 = vpop.f32.mrb[19].mxu0  ;;  %v4941_v22 = vpack.c.bf16 %v70_v51, %v68_v1 }
0x205b   :  { %v72_v23 = vld [vmem:[%s6305_s7 + $0x20] sm:$0xff] }
0x205c   :  { %5175 = vtanh.f32 %v1865_v49  ;;  %v4177_v25 = vmul.f32 -1.442695, %v1865_v49  ;;  %v4943_v49 = vpack.c.bf16 %v75_v19, %v73_v63 }
0x205e   :  { %5177 = vpow2.f32 %v4177_v25  ;;  %v77_v25 = vld [vmem:[%s6305_s7 + $0x48] sm:$0xff] }
0x2066   :  { %v5176_v24 = vpop.eup %5175 }
0x2067   :  { %1875 = vrot.lane.b32.xlu0 %v5176_v24, %s5336_s30  ;;  %v74_v24 = vld [vmem:[%s6305_s7 + $0x30] sm:$0xff] }
0x2068   :  { %v5178_v12 = vpop.eup %5177 }
0x2069   :  { %v1869_v26 = vadd.f32 1.0, %v5178_v12  ;;  %v79_v12 = vld [vmem:[%s6305_s7 + $0x58] sm:$0xff] }
0x206b   :  { %5179 = vrcp.f32 %v1869_v26  ;;  %v4945_v26 = vpack.c.bf16 %v74_v24, %v72_v23 }
0x2075   :  { %v5180_v29 = vpop.eup %5179 }
0x2076   :  { %v1873_v16 = vmul.f32 %v5180_v29, %v1781_v17  ;;  %v4939_v17 = vpack.c.bf16 %v71_v14, %v69_v13 }
0x2078   :  { %4940 = vmatprep.subr.bf16.mxu1 %v4939_v17 }
0x20d9   :  { %v1876_v32 = vpop.permute.xlu0 %1875 }
0x20da   :  { %v1878_v61 = vmul.f32 %v5180_v29, %v1876_v32  ;;  %v86_v32 = vld [vmem:[%s6306_s9 + $0x8] sm:$0xff] }
0x20dc   :  { %1880 = vrot.lane.b32.xlu1 %v1878_v61, %s5336_s30  ;;  %v4947_v61 = vpack.c.bf16 %v79_v12, %v77_v25 }
0x214e   :  { %v1881_v34 = vpop.permute.xlu1 %1880 }
0x214f   :  { %v1883_v35 = vadd.f32 %v1881_v34, %v1873_v16  ;;  %v76_v16 = vld [vmem:[%s6305_s7 + $0x40] sm:$0xff]  ;;  %v78_v34 = vld [vmem:[%s6305_s7 + $0x50] sm:$0xff] }
0x2151   :  { %5181 = vtanh.f32 %v1883_v35 }
0x215b   :  { %v5182_v47 = vpop.eup %5181 }
0x215c   :  { %1886 = vrot.lane.b32.xlu0 %v5182_v47, %s5336_s30  ;;  %v81_v47 = vld [vmem:[%s6305_s7 + $0x68] sm:$0xff] }
0x21ce   :  { %v1887_v36 = vpop.permute.xlu0 %1886 }
0x21cf   :  { %v1889_v33 = vmul.f32 %v5180_v29, %v1887_v36  ;;  %v85_v29 = vld [vmem:[%s6306_s9] sm:$0xff]  ;;  %v83_v36 = vld [vmem:[%s6305_s7 + $0x78] sm:$0xff] }
0x21d1   :  { %1891 = vrot.lane.b32.xlu1 %v1889_v33, %s5340_s4  ;;  %v87_v33 = vld [vmem:[%s6306_s9 + $0x10] sm:$0xff] }
0x2243   :  { %v1892_v2 = vpop.permute.xlu1 %1891 }
0x2244   :  { %1894 = vst.msk [vmem:[#allocation3 + $0x10] sm:$0xff] %vm176_vm1, %v1892_v2  ;;  %4606 = vmatmul.mubr.msk.f32.vlgmr.msra.gmra.mrb[32].mxu1 %vm176_vm1, %v1892_v2  ;;  %v88_v2 = vld [vmem:[%s6306_s9 + $0x18] sm:$0xff] }
0x2245   :  { %2255 = vmatprep.mubr.f32.mxu1 %v5338_v21  ;;  %4942 = vmatpush1.bf16.msra.mxu1 %v4941_v22 }
0x2246   :  { %4944 = vmatprep.subr.bf16.mxu1 %v4943_v49 }
0x2249   :  { %4946 = vmatpush1.bf16.msra.mxu1 %v4945_v26 }
0x224a   :  { %4948 = vmatprep.subr.bf16.mxu1 %v4947_v61 }
0x224b   :  { %v2109_v61 = vld [vmem:[#allocation3 + $0x10] sm:$0xff] }
0x2317   :  { %v1963_v59 = vpop.f32.mrb[32].mxu1 }
0x2318   :  { %v1967_v38 = vadd.f32 %v1963_v59, %v5615_v42  ;;  %v4607_v39 = vpop.f32.mrb[33].mxu1  ;;  %v5908_v59 = vpack.c.bf16 %v88_v2, %v87_v33  ;;  %v2101_v33 = vld [vmem:[#allocation2 + $0x10] sm:$0xff] }
0x2319   :  { %v4951_v39 = vpack.c.bf16 %v83_v36, %v81_v47 }
0x231a   :  { %5183 = vtanh.f32 %v1967_v38  ;;  %v4179_v41 = vmul.f32 -1.442695, %v1967_v38  ;;  %v4949_v38 = vpack.c.bf16 %v78_v34, %v76_v16 }
0x231c   :  { %5185 = vpow2.f32 %v4179_v41  ;;  %v82_v41 = vld [vmem:[%s6305_s7 + $0x70] sm:$0xff]  ;;  %4950 = vmatpush1.bf16.msra.mxu1 %v4949_v38 }
0x231d   :  { %4952 = vmatprep.subr.bf16.mxu1 %v4951_v39 }
0x2324   :  { %v5184_v40 = vpop.eup %5183 }
0x2325   :  { %1977 = vrot.lane.b32.xlu0 %v5184_v40, %s5336_s30  ;;  %v80_v40 = vld [vmem:[%s6305_s7 + $0x60] sm:$0xff] }
0x2326   :  { %v5186_v43 = vpop.eup %5185 }
0x2327   :  { %v1971_v44 = vadd.f32 1.0, %v5186_v43  ;;  %v4953_v43 = vpack.c.bf16 %v82_v41, %v80_v40 }
0x2329   :  { %5187 = vrcp.f32 %v1971_v44  ;;  %4954 = vmatpush1.bf16.msra.mxu1 %v4953_v43 }
0x232a   :  { %4985 = vmatprep.subr.bf16.mxu1 %v5337_v18 }
0x2333   :  { %v5188_v53 = vpop.eup %5187 }
0x2334   :  { %v1975_v52 = vmul.f32 %v5188_v53, %v1883_v35  ;;  %v5893_v35 = vpack.c.bf16 %v86_v32, %v85_v29 }
0x2397   :  { %v1978_v48 = vpop.permute.xlu0 %1977 }
0x2398   :  { %v1980_v50 = vmul.f32 %v5188_v53, %v1978_v48  ;;  %v2099_v48 = vld [vmem:[#allocation2] sm:$0xff] }
0x239a   :  { %1982 = vrot.lane.b32.xlu1 %v1980_v50, %s5336_s30 }
0x240c   :  { %v1983_v54 = vpop.permute.xlu1 %1982 }
0x240d   :  { %v1985_v56 = vadd.f32 %v1983_v54, %v1975_v52 }
0x240f   :  { %5189 = vtanh.f32 %v1985_v56 }
0x2419   :  { %v5190_v42 = vpop.eup %5189 }
0x241a   :  { %1988 = vrot.lane.b32.xlu0 %v5190_v42, %s5336_s30  ;;  %v5939_v42 = vld [vmem:[%s6307_s8] sm:$0x3] }
0x248c   :  { %v1989_v58 = vpop.permute.xlu0 %1988 }
0x248d   :  { %v1991_v60 = vmul.f32 %v5188_v53, %v1989_v58  ;;  %v5944_v58 = vrot.slane %v5939_v42, %v324_v28 }
0x248f   :  { %1993 = vrot.lane.b32.xlu1 %v1991_v60, %s5340_s4 }
0x2501   :  { %v1994_v62 = vpop.permute.xlu1 %1993 }
0x2502   :  { %1996 = vst.msk [vmem:[#allocation3 + $0x8] sm:$0xff] %vm176_vm1, %v1994_v62  ;;  %4617 = vmatmul.mubr.msk.f32.vlgmr.msra.gmra.mrb[20].mxu0 %vm176_vm1, %v1994_v62 }
0x2503   :  { %4627 = vmatprep.mubr.msk.f32.mxu0 %vm5339_vm3, %v5338_v21  ;;  %4957 = vmatpush3.bf16.msra.mxu0 %v5893_v35 }
0x2504   :  { %4958 = vmatprep.subr.bf16.mxu0 %v5337_v18 }
0x2507   :  { %4960 = vmatpush3.bf16.msra.mxu0 %v5908_v59 }
0x2508   :  { %4961 = vmatprep.subr.bf16.mxu0 %v5337_v18 }
0x2509   :  { %v2108_v28 = vld [vmem:[#allocation3 + $0x8] sm:$0xff] }
0x250a   :  { %4628 = vmatmul.mubr.f32.vlgmr.msra.gmra.mrb[22].mxu0 %v5338_v21 }
0x250b   :  { %4963 = vmatpush3.bf16.msra.mxu0 %v5893_v35  ;;  %4638 = vmatprep.mubr.msk.f32.mxu0 %vm5339_vm3, %v5338_v21 }
0x250c   :  { %4964 = vmatprep.subr.bf16.mxu0 %v5337_v18 }
0x250f   :  { %4966 = vmatpush3.bf16.msra.mxu0 %v5908_v59 }
0x2510   :  { %4967 = vmatprep.subr.bf16.mxu0 %v5337_v18 }
0x25d5   :  { %v2065_v30 = vpop.f32.mrb[20].mxu0 }
0x25d6   :  { %v2069_v55 = vadd.f32 %v2065_v30, %v5612_v37  ;;  %v4618_v0 = vpop.f32.mrb[21].mxu0 }
0x25d8   :  { %5191 = vtanh.f32 %v2069_v55  ;;  %v4181_v5 = vmul.f32 -1.442695, %v2069_v55 }
0x25da   :  { %5193 = vpow2.f32 %v4181_v5 }
0x25dd   :  { %v2370_v54 = vpop.f32.mrb[22].mxu0 }
0x25e2   :  { %v5192_v3 = vpop.eup %5191 }
0x25e3   :  { %2079 = vrot.lane.b32.xlu0 %v5192_v3, %s5336_s30 }
0x25e4   :  { %v5194_v4 = vpop.eup %5193 }
0x25e5   :  { %v2073_v6 = vadd.f32 1.0, %v5194_v4 }
0x25e7   :  { %5195 = vrcp.f32 %v2073_v6 }
0x25f1   :  { %v5196_v7 = vpop.eup %5195 }
0x25f2   :  { %v2077_v9 = vmul.f32 %v5196_v7, %v1985_v56  ;;  %v4629_v56 = vpop.f32.mrb[23].mxu0 }
0x2655   :  { %v2080_v57 = vpop.permute.xlu0 %2079 }
0x2656   :  { %v2082_v8 = vmul.f32 %v5196_v7, %v2080_v57 }
0x2658   :  { %2084 = vrot.lane.b32.xlu1 %v2082_v8, %s5336_s30 }
0x26ca   :  { %v2085_v10 = vpop.permute.xlu1 %2084 }
0x26cb   :  { %v2087_v11 = vadd.f32 %v2085_v10, %v2077_v9 }
0x26cd   :  { %5197 = vtanh.f32 %v2087_v11  ;;  %v2100_v11 = vld [vmem:[#allocation2 + $0x8] sm:$0xff] }
0x26d7   :  { %v5198_v37 = vpop.eup %5197 }
0x26d8   :  { %2090 = vrot.lane.b32.xlu0 %v5198_v37, %s5336_s30 }
0x274a   :  { %v2091_v15 = vpop.permute.xlu0 %2090 }
0x274b   :  { %v2093_v20 = vmul.f32 %v5196_v7, %v2091_v15 }
0x274d   :  { %2095 = vrot.lane.b32.xlu1 %v2093_v20, %s5340_s4 }
0x27bf   :  { %v2096_v44 = vpop.permute.xlu1 %2095 }
0x27c0   :  { %2098 = vst.msk [vmem:[#allocation3] sm:$0xff] %vm176_vm1, %v2096_v44 }
0x27c7   :  { %v2107_v53 = vld [vmem:[#allocation3] sm:$0xff] }
0x27c8   :  { %2123 = vrot.lane.b32.xlu0 %v2107_v53, %s5336_s30 }
0x283a   :  { %v2124_v50 = vpop.permute.xlu0 %2123 }
0x283b   :  { %v2147_v52 = vsel %vm176_vm1, %v2099_v48, %v2124_v50 }
0x283c   :  { %4182 = vmatmul.mubr.msk.f32.vlgmr.msra.gmra.mrb[34].mxu1 %vm2166_vm4, %v2147_v52 }
0x283d   :  { %2261 = vmatprep.mubr.f32.mxu1 %v5338_v21  ;;  %4987 = vmatpush3.bf16.msra.mxu1 %v5893_v35 }
0x283e   :  { %4988 = vmatprep.subr.bf16.mxu1 %v5337_v18 }
0x2841   :  { %4990 = vmatpush3.bf16.msra.mxu1 %v5908_v59 }
0x2842   :  { %4997 = vmatprep.subr.bf16.mxu1 %v5337_v18 }
0x290f   :  { %v2257_v60 = vpop.f32.mrb[34].mxu1 }
0x2910   :  { %v2258_v62 = vadd.f32 %v2257_v60, %v5944_v58  ;;  %v5947_v30 = vpop.f32.mrb[35].mxu1 }
0x2912   :  { %v2374_v55 = vadd.f32 %v2370_v54, %v2258_v62 }
0x2914   :  { %5199 = vtanh.f32 %v2374_v55  ;;  %v4190_v3 = vmul.f32 -1.442695, %v2374_v55 }
0x2916   :  { %5201 = vpow2.f32 %v4190_v3 }
0x291e   :  { %v5200_v0 = vpop.eup %5199 }
0x291f   :  { %2384 = vrot.lane.b32.xlu1 %v5200_v0, %s5336_s30 }
0x2920   :  { %v5202_v5 = vpop.eup %5201 }
0x2921   :  { %v2378_v4 = vadd.f32 1.0, %v5202_v5  ;;  %v2110_v5 = vld [vmem:[#allocation3 + $0x18] sm:$0xff] }
0x2923   :  { %5203 = vrcp.f32 %v2378_v4 }
0x292d   :  { %v5204_v6 = vpop.eup %5203 }
0x292e   :  { %v2382_v8 = vmul.f32 0.0, %v5204_v6 }
0x2991   :  { %v2385_v7 = vpop.permute.xlu1 %2384 }
0x2992   :  { %v2387_v57 = vmul.f32 %v5204_v6, %v2385_v7 }
0x2994   :  { %2389 = vrot.lane.b32.xlu0 %v2387_v57, %s5336_s30  ;;  %v2102_v57 = vld [vmem:[#allocation2 + $0x18] sm:$0xff] }
0x2998   :  { %2125 = vrot.lane.b32.xlu0 %v2108_v28, %s5336_s30 }
0x2a06   :  { %v2390_v9 = vpop.permute.xlu0 %2389 }
0x2a07   :  { %v2392_v10 = vadd.f32 %v2390_v9, %v2382_v8 }
0x2a09   :  { %5205 = vtanh.f32 %v2392_v10 }
0x2a0a   :  { %v2126_v37 = vpop.permute.xlu0 %2125 }
0x2a0b   :  { %v2148_v13 = vsel %vm176_vm1, %v2100_v11, %v2126_v37 }
0x2a0c   :  { %4183 = vmatmul.mubr.msk.f32.gmra.mrb[36].mxu1 %vm2166_vm4, %v2148_v13 }
0x2a0d   :  { %2267 = vmatprep.mubr.f32.mxu1 %v5338_v21 }
0x2a13   :  { %v5206_v14 = vpop.eup %5205 }
0x2a14   :  { %2395 = vrot.lane.b32.xlu1 %v5206_v14, %s5336_s30 }
0x2a86   :  { %v2396_v1 = vpop.permute.xlu1 %2395 }
0x2a87   :  { %v2398_v15 = vmul.f32 %v5204_v6, %v2396_v1 }
0x2a89   :  { %2400 = vrot.lane.b32.xlu1 %v2398_v15, %s5340_s4 }
0x2adf   :  { %v2263_v17 = vpop.f32.mrb[36].mxu1 }
0x2ae0   :  { %v5957_v51 = vpop.f32.mrb[37].mxu1  ;;  %v2264_v19 = vadd.f32 %v2263_v17, %v5944_v58 }
0x2afb   :  { %v2401_v63 = vpop.permute.xlu1 %2400 }
0x2afc   :  { %2403 = vst.msk [vmem:[#allocation2] sm:$0xff] %vm176_vm1, %v2401_v63  ;;  %4639 = vmatmul.mubr.msk.f32.vlgmr.msra.gmra.mrb[24].mxu0 %vm176_vm1, %v2401_v63 }
0x2afd   :  { %4969 = vmatpush3.bf16.msra.mxu0 %v5893_v35  ;;  %4649 = vmatprep.mubr.msk.f32.mxu0 %vm5339_vm3, %v5338_v21 }
0x2afe   :  { %4970 = vmatprep.subr.bf16.mxu0 %v5337_v18 }
0x2b01   :  { %4972 = vmatpush3.bf16.msra.mxu0 %v5908_v59 }
0x2b02   :  { %4973 = vmatprep.subr.bf16.mxu0 %v5337_v18 }
0x2bcf   :  { %v2472_v20 = vpop.f32.mrb[24].mxu0 }
0x2bd0   :  { %v2476_v22 = vadd.f32 %v2472_v20, %v2264_v19  ;;  %v4640_v49 = vpop.f32.mrb[25].mxu0 }
0x2bd2   :  { %5207 = vtanh.f32 %v2476_v22  ;;  %v4192_v24 = vmul.f32 -1.442695, %v2476_v22 }
0x2bd4   :  { %5209 = vpow2.f32 %v4192_v24 }
0x2bdc   :  { %v5208_v23 = vpop.eup %5207 }
0x2bdd   :  { %2486 = vrot.lane.b32.xlu0 %v5208_v23, %s5336_s30 }
0x2bde   :  { %v5210_v25 = vpop.eup %5209 }
0x2bdf   :  { %v2480_v12 = vadd.f32 1.0, %v5210_v25 }
0x2be1   :  { %5211 = vrcp.f32 %v2480_v12  ;;  %v2111_v12 = vld [vmem:[#allocation3 + $0x20] sm:$0xff] }
0x2beb   :  { %v5212_v26 = vpop.eup %5211 }
0x2bec   :  { %v2484_v16 = vmul.f32 %v5212_v26, %v2392_v10 }
0x2c4f   :  { %v2487_v29 = vpop.permute.xlu0 %2486 }
0x2c50   :  { %v2489_v32 = vmul.f32 %v5212_v26, %v2487_v29  ;;  %v4166_v29 = vmul.f32 -1.442695, %v5776_v45 }
0x2c52   :  { %2491 = vrot.lane.b32.xlu1 %v2489_v32, %s5336_s30 }
0x2c56   :  { %2127 = vrot.lane.b32.xlu1 %v2109_v61, %s5336_s30 }
0x2cc4   :  { %v2492_v34 = vpop.permute.xlu1 %2491 }
0x2cc5   :  { %v2494_v47 = vadd.f32 %v2492_v34, %v2484_v16 }
0x2cc7   :  { %5213 = vtanh.f32 %v2494_v47 }
0x2cc8   :  { %v2128_v36 = vpop.permute.xlu1 %2127 }
0x2cc9   :  { %v2149_v2 = vsel %vm176_vm1, %v2101_v33, %v2128_v36  ;;  %v2103_v36 = vld [vmem:[#allocation2 + $0x20] sm:$0xff] }
0x2cca   :  { %4184 = vmatmul.mubr.msk.f32.gmra.mrb[38].mxu1 %vm2166_vm4, %v2149_v2 }
0x2ccb   :  { %2273 = vmatprep.mubr.f32.mxu1 %v5338_v21 }
0x2cd1   :  { %v5214_v38 = vpop.eup %5213 }
0x2cd2   :  { %2497 = vrot.lane.b32.xlu0 %v5214_v38, %s5336_s30 }
0x2d44   :  { %v2498_v39 = vpop.permute.xlu0 %2497 }
0x2d45   :  { %v2500_v40 = vmul.f32 %v5212_v26, %v2498_v39 }
0x2d47   :  { %2502 = vrot.lane.b32.xlu0 %v2500_v40, %s5340_s4 }
0x2d9d   :  { %v2269_v41 = vpop.f32.mrb[38].mxu1 }
0x2d9e   :  { %v5976_v43 = vpop.f32.mrb[39].mxu1  ;;  %v2270_v53 = vadd.f32 %v2269_v41, %v5944_v58 }
0x2db9   :  { %v2503_v44 = vpop.permute.xlu0 %2502 }
0x2dba   :  { %2505 = vst.msk [vmem:[#allocation2 + $0x8] sm:$0xff] %vm176_vm1, %v2503_v44  ;;  %4650 = vmatmul.mubr.msk.f32.vlgmr.msra.gmra.mrb[26].mxu0 %vm176_vm1, %v2503_v44 }
0x2dbb   :  { %4975 = vmatpush3.bf16.msra.mxu0 %v5893_v35  ;;  %4660 = vmatprep.mubr.msk.f32.mxu0 %vm5339_vm3, %v5338_v21 }
0x2dbc   :  { %4976 = vmatprep.subr.bf16.mxu0 %v5337_v18 }
0x2dbf   :  { %4978 = vmatpush3.bf16.msra.mxu0 %v5908_v59 }
0x2dc0   :  { %4979 = vmatprep.subr.bf16.mxu0 %v5337_v18 }
0x2e8d   :  { %v2574_v48 = vpop.f32.mrb[26].mxu0 }
0x2e8e   :  { %v2578_v50 = vadd.f32 %v2574_v48, %v2270_v53  ;;  %v4651_v52 = vpop.f32.mrb[27].mxu0 }
0x2e90   :  { %5215 = vtanh.f32 %v2578_v50  ;;  %v4194_v56 = vmul.f32 -1.442695, %v2578_v50 }
0x2e92   :  { %5217 = vpow2.f32 %v4194_v56 }
0x2e9a   :  { %v5216_v54 = vpop.eup %5215 }
0x2e9b   :  { %2588 = vrot.lane.b32.xlu1 %v5216_v54, %s5336_s30 }
0x2e9c   :  { %v5218_v60 = vpop.eup %5217 }
0x2e9d   :  { %v2582_v62 = vadd.f32 1.0, %v5218_v60 }
0x2e9f   :  { %5219 = vrcp.f32 %v2582_v62 }
0x2ea9   :  { %v5220_v55 = vpop.eup %5219 }
0x2eaa   :  { %v2586_v4 = vmul.f32 %v5220_v55, %v2494_v47 }
0x2f0d   :  { %v2589_v0 = vpop.permute.xlu1 %2588 }
0x2f0e   :  { %v2591_v3 = vmul.f32 %v5220_v55, %v2589_v0 }
0x2f10   :  { %2593 = vrot.lane.b32.xlu0 %v2591_v3, %s5336_s30 }
0x2f14   :  { %2129 = vrot.lane.b32.xlu0 %v2110_v5, %s5336_s30 }
0x2f82   :  { %v2594_v6 = vpop.permute.xlu0 %2593 }
0x2f83   :  { %v2596_v7 = vadd.f32 %v2594_v6, %v2586_v4 }
0x2f85   :  { %5221 = vtanh.f32 %v2596_v7 }
0x2f86   :  { %v2130_v28 = vpop.permute.xlu0 %2129 }
0x2f87   :  { %v2150_v8 = vsel %vm176_vm1, %v2102_v57, %v2130_v28 }
0x2f88   :  { %4185 = vmatmul.mubr.msk.f32.gmra.mrb[40].mxu1 %vm2166_vm4, %v2150_v8 }
0x2f89   :  { %2279 = vmatprep.mubr.f32.mxu1 %v5338_v21 }
0x2f8f   :  { %v5222_v9 = vpop.eup %5221 }
0x2f90   :  { %2599 = vrot.lane.b32.xlu1 %v5222_v9, %s5336_s30 }
0x3002   :  { %v2600_v10 = vpop.permute.xlu1 %2599 }
0x3003   :  { %v2602_v11 = vmul.f32 %v5220_v55, %v2600_v10  ;;  %v2113_v55 = vld [vmem:[#allocation3 + $0x30] sm:$0xff] }
0x3005   :  { %2604 = vrot.lane.b32.xlu1 %v2602_v11, %s5340_s4 }
0x305b   :  { %v2275_v37 = vpop.f32.mrb[40].mxu1 }
0x305c   :  { %v5995_v13 = vpop.f32.mrb[41].mxu1  ;;  %v2276_v1 = vadd.f32 %v2275_v37, %v5944_v58 }
0x3077   :  { %v2605_v14 = vpop.permute.xlu1 %2604 }
0x3078   :  { %2607 = vst.msk [vmem:[#allocation2 + $0x10] sm:$0xff] %vm176_vm1, %v2605_v14  ;;  %4661 = vmatmul.mubr.msk.f32.vlgmr.msra.gmra.mrb[28].mxu0 %vm176_vm1, %v2605_v14 }
0x3079   :  { %4981 = vmatpush3.bf16.msra.mxu0 %v5893_v35  ;;  %4671 = vmatprep.mubr.msk.f32.mxu0 %vm5339_vm3, %v5338_v21 }
0x307a   :  { %4982 = vmatprep.subr.bf16.mxu0 %v5337_v18 }
0x307d   :  { %4984 = vmatpush3.bf16.msra.mxu0 %v5908_v59 }
0x307e   :  { %4991 = vmatprep.subr.bf16.mxu0 %v5337_v18 }
0x314b   :  { %v2676_v15 = vpop.f32.mrb[28].mxu0 }
0x314c   :  { %v2680_v17 = vadd.f32 %v2676_v15, %v2276_v1  ;;  %v4662_v63 = vpop.f32.mrb[29].mxu0 }
0x314d   :  { %v2114_v63 = vld [vmem:[#allocation3 + $0x38] sm:$0xff] }
0x314e   :  { %5223 = vtanh.f32 %v2680_v17  ;;  %v4196_v20 = vmul.f32 -1.442695, %v2680_v17  ;;  %v2112_v17 = vld [vmem:[#allocation3 + $0x28] sm:$0xff] }
0x3150   :  { %5225 = vpow2.f32 %v4196_v20 }
0x3158   :  { %v5224_v19 = vpop.eup %5223 }
0x3159   :  { %2690 = vrot.lane.b32.xlu0 %v5224_v19, %s5336_s30 }
0x315a   :  { %v5226_v22 = vpop.eup %5225 }
0x315b   :  { %v2684_v49 = vadd.f32 1.0, %v5226_v22  ;;  %v2104_v22 = vld [vmem:[#allocation2 + $0x28] sm:$0xff] }
0x315d   :  { %5227 = vrcp.f32 %v2684_v49 }
0x315e   :  { %5229 = vtanh.f32 %v5776_v45 }
0x315f   :  { %5231 = vpow2.f32 %v4166_v29 }
0x3167   :  { %v5228_v23 = vpop.eup %5227 }
0x3168   :  { %v5230_v26 = vpop.eup %5229  ;;  %v2688_v16 = vmul.f32 %v5228_v23, %v2596_v7 }
0x3169   :  { %v5232_v32 = vpop.eup %5231 }
0x316a   :  { %v1259_v61 = vadd.f32 1.0, %v5232_v32 }
0x316c   :  { %5233 = vrcp.f32 %v1259_v61 }
0x3176   :  { %v5234_v38 = vpop.eup %5233 }
0x3177   :  { %v1263_v41 = vmul.f32 %v5234_v38, %v5752_v46 }
0x31cb   :  { %v2691_v24 = vpop.permute.xlu0 %2690 }
0x31cc   :  { %v2693_v25 = vmul.f32 %v5228_v23, %v2691_v24 }
0x31ce   :  { %2695 = vrot.lane.b32.xlu1 %v2693_v25, %s5336_s30  ;;  %v2105_v25 = vld [vmem:[#allocation2 + $0x30] sm:$0xff] }
0x31d2   :  { %2131 = vrot.lane.b32.xlu1 %v2111_v12, %s5336_s30 }
0x31d6   :  { %1265 = vrot.lane.b32.xlu1 %v5230_v26, %s5336_s30 }
0x3240   :  { %v2696_v34 = vpop.permute.xlu1 %2695 }
0x3241   :  { %v2698_v47 = vadd.f32 %v2696_v34, %v2688_v16 }
0x3243   :  { %5235 = vtanh.f32 %v2698_v47 }
0x3244   :  { %v2132_v33 = vpop.permute.xlu1 %2131 }
0x3245   :  { %v2151_v2 = vsel %vm176_vm1, %v2103_v36, %v2132_v33 }
0x3246   :  { %4186 = vmatmul.mubr.msk.f32.gmra.mrb[42].mxu1 %vm2166_vm4, %v2151_v2 }
0x3247   :  { %2285 = vmatprep.mubr.f32.mxu1 %v5338_v21 }
0x3248   :  { %v1266_v39 = vpop.permute.xlu1 %1265 }
0x3249   :  { %v1268_v40 = vmul.f32 %v5234_v38, %v1266_v39 }
0x324b   :  { %1270 = vrot.lane.b32.xlu1 %v1268_v40, %s5336_s30 }
0x324d   :  { %v5236_v45 = vpop.eup %5235 }
0x324e   :  { %2701 = vrot.lane.b32.xlu0 %v5236_v45, %s5336_s30 }
0x32bd   :  { %v1271_v44 = vpop.permute.xlu1 %1270 }
0x32be   :  { %v1273_v53 = vadd.f32 %v1271_v44, %v1263_v41 }
0x32c0   :  { %5237 = vtanh.f32 %v1273_v53  ;;  %v2702_v48 = vpop.permute.xlu0 %2701 }
0x32c1   :  { %v2704_v50 = vmul.f32 %v5228_v23, %v2702_v48 }
0x32c3   :  { %2706 = vrot.lane.b32.xlu0 %v2704_v50, %s5340_s4 }
0x32ca   :  { %v5238_v52 = vpop.eup %5237 }
0x32cb   :  { %1276 = vrot.lane.b32.xlu1 %v5238_v52, %s5336_s30 }
0x3319   :  { %v2281_v54 = vpop.f32.mrb[42].mxu1 }
0x331a   :  { %v6020_v56 = vpop.f32.mrb[43].mxu1  ;;  %v2282_v3 = vadd.f32 %v2281_v54, %v5944_v58 }
0x3335   :  { %v2707_v60 = vpop.permute.xlu0 %2706 }
0x3336   :  { %2709 = vst.msk [vmem:[#allocation2 + $0x18] sm:$0xff] %vm176_vm1, %v2707_v60  ;;  %4672 = vmatmul.mubr.msk.f32.vlgmr.msra.gmra.mrb[30].mxu0 %vm176_vm1, %v2707_v60 }
0x3337   :  { %4993 = vmatpush3.bf16.msra.mxu0 %v5893_v35  ;;  %4693 = vmatprep.mubr.msk.f32.mxu0 %vm5339_vm3, %v5338_v21 }
0x3338   :  { %4994 = vmatprep.subr.bf16.mxu0 %v5337_v18 }
0x333b   :  { %4996 = vmatpush3.bf16.msra.mxu0 %v5908_v59 }
0x333c   :  { %5003 = vmatprep.subr.bf16.mxu0 %v5337_v18 }
0x333d   :  { %v1277_v46 = vpop.permute.xlu1 %1276 }
0x333e   :  { %v1279_v62 = vmul.f32 %v5234_v38, %v1277_v46 }
0x3340   :  { %1281 = vrot.lane.b32.xlu1 %v1279_v62, %s5340_s4 }
0x3344   :  { %2135 = vrot.lane.b32.xlu1 %v2113_v55, %s5336_s30 }
0x33b2   :  { %v1282_v0 = vpop.permute.xlu1 %1281 }
0x33b3   :  { %1284 = vst.msk [vmem:[#allocation2 + $0x38] sm:$0xff] %vm176_vm1, %v1282_v0  ;;  %v89_v0 = vld [vmem:[%s6308_s10] sm:$0xff] }
0x33b6   :  { %v2136_v24 = vpop.permute.xlu1 %2135 }
0x33b7   :  { %v2153_v12 = vsel %vm176_vm1, %v2105_v25, %v2136_v24 }
0x33ba   :  { %v2106_v29 = vld [vmem:[#allocation2 + $0x38] sm:$0xff] }
0x3409   :  { %v2778_v5 = vpop.f32.mrb[30].mxu0 }
0x340a   :  { %v2782_v4 = vadd.f32 %v2778_v5, %v2282_v3  ;;  %v4673_v6 = vpop.f32.mrb[31].mxu0  ;;  %v90_v3 = vld [vmem:[%s6308_s10 + $0x8] sm:$0xff] }
0x340b   :  { %v6075_v5 = vpack.c.bf16 %v90_v3, %v89_v0  ;;  %v92_v6 = vld [vmem:[%s6308_s10 + $0x18] sm:$0xff] }
0x340c   :  { %5239 = vtanh.f32 %v2782_v4  ;;  %v4198_v57 = vmul.f32 -1.442695, %v2782_v4  ;;  %v91_v4 = vld [vmem:[%s6308_s10 + $0x10] sm:$0xff] }
0x340e   :  { %5241 = vpow2.f32 %v4198_v57  ;;  %v6086_v57 = vpack.c.bf16 %v92_v6, %v91_v4 }
0x3416   :  { %v5240_v7 = vpop.eup %5239 }
0x3417   :  { %2792 = vrot.lane.b32.xlu0 %v5240_v7, %s5336_s30 }
0x3418   :  { %v5242_v28 = vpop.eup %5241 }
0x3419   :  { %v2786_v8 = vadd.f32 1.0, %v5242_v28 }
0x341b   :  { %5243 = vrcp.f32 %v2786_v8 }
0x3425   :  { %v5244_v9 = vpop.eup %5243 }
0x3426   :  { %v2790_v37 = vmul.f32 %v5244_v9, %v2698_v47 }
0x3489   :  { %v2793_v10 = vpop.permute.xlu0 %2792 }
0x348a   :  { %v2795_v11 = vmul.f32 %v5244_v9, %v2793_v10 }
0x348c   :  { %2797 = vrot.lane.b32.xlu0 %v2795_v11, %s5336_s30  ;;  %v6104_v11 = vrot.slane %v5939_v42, %v328_v31 }
0x34fe   :  { %v2798_v14 = vpop.permute.xlu0 %2797 }
0x34ff   :  { %v2800_v1 = vadd.f32 %v2798_v14, %v2790_v37 }
0x3501   :  { %5245 = vtanh.f32 %v2800_v1 }
0x350b   :  { %v5246_v15 = vpop.eup %5245 }
0x350c   :  { %2803 = vrot.lane.b32.xlu0 %v5246_v15, %s5336_s30 }
0x3510   :  { %2133 = vrot.lane.b32.xlu0 %v2112_v17, %s5336_s30 }
0x3514   :  { %2137 = vrot.lane.b32.xlu0 %v2114_v63, %s5336_s30 }
0x357e   :  { %v2804_v19 = vpop.permute.xlu0 %2803 }
0x357f   :  { %v2806_v20 = vmul.f32 %v5244_v9, %v2804_v19 }
0x3581   :  { %2808 = vrot.lane.b32.xlu1 %v2806_v20, %s5340_s4 }
0x3582   :  { %v2134_v49 = vpop.permute.xlu0 %2133 }
0x3583   :  { %v2152_v23 = vsel %vm176_vm1, %v2104_v22, %v2134_v49 }
0x3584   :  { %4187 = vmatmul.mubr.msk.f32.gmra.mrb[44].mxu1 %vm2166_vm4, %v2152_v23 }
0x3585   :  { %2291 = vmatprep.mubr.f32.mxu1 %v5338_v21 }
0x3586   :  { %v2138_v26 = vpop.permute.xlu0 %2137 }
0x3587   :  { %v2154_v32 = vsel %vm176_vm1, %v2106_v29, %v2138_v26 }
0x3588   :  { %4188 = vmatmul.mubr.msk.f32.gmra.mrb[46].mxu1 %vm2166_vm4, %v2153_v12 }
0x3589   :  { %2297 = vmatprep.mubr.f32.mxu1 %v5338_v21 }
0x358c   :  { %4189 = vmatmul.mubr.msk.f32.gmra.mrb[48].mxu1 %vm2166_vm4, %v2154_v32 }
0x358d   :  { %4682 = vmatprep.mubr.msk.f32.mxu1 %vm5339_vm3, %v5338_v21 }
0x35f3   :  { %v2809_v61 = vpop.permute.xlu1 %2808 }
0x35f4   :  { %2811 = vst.msk [vmem:[#allocation2 + $0x20] sm:$0xff] %vm176_vm1, %v2809_v61  ;;  %4683 = vmatmul.mubr.msk.f32.vlgmr.msra.gmra.mrb[50].mxu1 %vm176_vm1, %v2809_v61 }
0x35f5   :  { %4999 = vmatpush3.bf16.msra.mxu1 %v5893_v35  ;;  %4704 = vmatprep.mubr.msk.f32.mxu1 %vm5339_vm3, %v5338_v21 }
0x35f6   :  { %5000 = vmatprep.subr.bf16.mxu1 %v5337_v18 }
0x35f9   :  { %5002 = vmatpush3.bf16.msra.mxu1 %v5908_v59 }
0x35fa   :  { %5009 = vmatprep.subr.bf16.mxu1 %v5337_v18 }
0x3657   :  { %v2287_v16 = vpop.f32.mrb[44].mxu1 }
0x3658   :  { %v6058_v34 = vpop.f32.mrb[45].mxu1  ;;  %v2288_v35 = vadd.f32 %v2287_v16, %v5944_v58 }
0x365b   :  { %v2293_v47 = vpop.f32.mrb[46].mxu1 }
0x365c   :  { %v6060_v36 = vpop.f32.mrb[47].mxu1  ;;  %v2294_v28 = vadd.f32 %v2293_v47, %v5944_v58 }
0x365f   :  { %v6062_v33 = vpop.f32.mrb[48].mxu1 }
0x3660   :  { %v2301_v2 = vpop.f32.mrb[49].mxu1 }
0x3661   :  { %v2302_v37 = vadd.f32 %v2301_v2, %v6104_v11 }
0x36c7   :  { %v2880_v38 = vpop.f32.mrb[50].mxu1 }
0x36c8   :  { %v2884_v39 = vadd.f32 %v2880_v38, %v2288_v35  ;;  %v4684_v40 = vpop.f32.mrb[51].mxu1 }
0x36ca   :  { %5247 = vtanh.f32 %v2884_v39  ;;  %v4200_v59 = vmul.f32 -1.442695, %v2884_v39 }
0x36cc   :  { %5249 = vpow2.f32 %v4200_v59 }
0x36d4   :  { %v5248_v45 = vpop.eup %5247 }
0x36d5   :  { %2894 = vrot.lane.b32.xlu0 %v5248_v45, %s5336_s30 }
0x36d6   :  { %v5250_v41 = vpop.eup %5249 }
0x36d7   :  { %v2888_v44 = vadd.f32 1.0, %v5250_v41 }
0x36d9   :  { %5251 = vrcp.f32 %v2888_v44 }
0x36e3   :  { %v5252_v53 = vpop.eup %5251 }
0x36e4   :  { %v2892_v52 = vmul.f32 %v5252_v53, %v2800_v1 }
0x3747   :  { %v2895_v48 = vpop.permute.xlu0 %2894 }
0x3748   :  { %v2897_v50 = vmul.f32 %v5252_v53, %v2895_v48 }
0x374a   :  { %2899 = vrot.lane.b32.xlu1 %v2897_v50, %s5336_s30 }
0x37bc   :  { %v2900_v54 = vpop.permute.xlu1 %2899 }
0x37bd   :  { %v2902_v60 = vadd.f32 %v2900_v54, %v2892_v52  ;;  %v2296_v54 = vadd.f32 %v6060_v36, %v6104_v11 }
0x37bf   :  { %5253 = vtanh.f32 %v2902_v60 }
0x37c9   :  { %v5254_v46 = vpop.eup %5253 }
0x37ca   :  { %2905 = vrot.lane.b32.xlu0 %v5254_v46, %s5336_s30 }
0x383c   :  { %v2906_v62 = vpop.permute.xlu0 %2905 }
0x383d   :  { %v2908_v55 = vmul.f32 %v5252_v53, %v2906_v62  ;;  %v2300_v53 = vadd.f32 %v6062_v33, %v5944_v58 }
0x383f   :  { %2910 = vrot.lane.b32.xlu1 %v2908_v55, %s5340_s4 }
0x38b1   :  { %v2911_v7 = vpop.permute.xlu1 %2910 }
0x38b2   :  { %2913 = vst.msk [vmem:[#allocation2 + $0x28] sm:$0xff] %vm176_vm1, %v2911_v7  ;;  %4694 = vmatmul.mubr.msk.f32.vlgmr.msra.gmra.mrb[32].mxu0 %vm176_vm1, %v2911_v7 }
0x38b3   :  { %5005 = vmatpush3.bf16.msra.mxu0 %v6075_v5  ;;  %4715 = vmatprep.mubr.msk.f32.mxu0 %vm5339_vm3, %v5338_v21 }
0x38b4   :  { %5006 = vmatprep.subr.bf16.mxu0 %v5337_v18 }
0x38b7   :  { %5008 = vmatpush3.bf16.msra.mxu0 %v6086_v57 }
0x38b8   :  { %5015 = vmatprep.subr.bf16.mxu0 %v5337_v18 }
0x38ba   :  { %4716 = vmatmul.mubr.f32.vlgmr.msra.gmra.mrb[34].mxu0 %v5338_v21 }
0x38bb   :  { %5017 = vmatpush3.bf16.msra.mxu0 %v6075_v5  ;;  %4737 = vmatprep.mubr.msk.f32.mxu0 %vm5339_vm3, %v5338_v21 }
0x38bc   :  { %5018 = vmatprep.subr.bf16.mxu0 %v5337_v18 }
0x38bf   :  { %5020 = vmatpush3.bf16.msra.mxu0 %v6086_v57 }
0x38c0   :  { %5027 = vmatprep.subr.bf16.mxu0 %v5337_v18 }
0x3985   :  { %v2982_v8 = vpop.f32.mrb[32].mxu0 }
0x3986   :  { %v2986_v9 = vadd.f32 %v2982_v8, %v2294_v28  ;;  %v4695_v10 = vpop.f32.mrb[33].mxu0 }
0x3988   :  { %5255 = vtanh.f32 %v2986_v9  ;;  %v4202_v19 = vmul.f32 -1.442695, %v2986_v9 }
0x398d   :  { %v3184_v14 = vpop.f32.mrb[34].mxu0 }
0x398e   :  { %v3188_v1 = vadd.f32 %v3184_v14, %v2302_v37  ;;  %v4717_v15 = vpop.f32.mrb[35].mxu0  ;;  %v2290_v14 = vadd.f32 %v6058_v34, %v6104_v11 }
0x3990   :  { %5257 = vtanh.f32 %v3188_v1  ;;  %v4205_v20 = vmul.f32 -1.442695, %v3188_v1 }
0x3991   :  { %5259 = vpow2.f32 %v4202_v19 }
0x3992   :  { %v5256_v17 = vpop.eup %5255  ;;  %5261 = vpow2.f32 %v4205_v20 }
0x3993   :  { %2996 = vrot.lane.b32.xlu0 %v5256_v17, %s5336_s30 }
0x399a   :  { %v5258_v63 = vpop.eup %5257 }
0x399b   :  { %3198 = vrot.lane.b32.xlu1 %v5258_v63, %s5336_s30  ;;  %v5260_v27 = vpop.eup %5259 }
0x399c   :  { %v2990_v22 = vadd.f32 1.0, %v5260_v27  ;;  %v5262_v31 = vpop.eup %5261 }
0x399d   :  { %v3192_v42 = vadd.f32 1.0, %v5262_v31 }
0x399e   :  { %5263 = vrcp.f32 %v2990_v22 }
0x399f   :  { %5265 = vrcp.f32 %v3192_v42 }
0x39a8   :  { %v5264_v49 = vpop.eup %5263 }
0x39a9   :  { %v5266_v25 = vpop.eup %5265  ;;  %v2994_v29 = vmul.f32 %v5264_v49, %v2902_v60 }
0x39aa   :  { %v3196_v16 = vmul.f32 0.0, %v5266_v25 }
0x3a05   :  { %v2997_v23 = vpop.permute.xlu0 %2996 }
0x3a06   :  { %v2999_v24 = vmul.f32 %v5264_v49, %v2997_v23 }
0x3a08   :  { %3001 = vrot.lane.b32.xlu0 %v2999_v24, %s5336_s30 }
0x3a0d   :  { %v3199_v12 = vpop.permute.xlu1 %3198 }
0x3a0e   :  { %v3201_v26 = vmul.f32 %v5266_v25, %v3199_v12 }
0x3a10   :  { %3203 = vrot.lane.b32.xlu1 %v3201_v26, %s5336_s30 }
0x3a7a   :  { %v3002_v32 = vpop.permute.xlu0 %3001 }
0x3a7b   :  { %v6111_v61 = vadd.f32 %v3002_v32, %v2994_v29  ;;  %v2284_v29 = vadd.f32 %v6020_v56, %v6104_v11 }
0x3a7d   :  { %5267 = vtanh.f32 %v6111_v61 }
0x3a82   :  { %v3204_v47 = vpop.permute.xlu1 %3203 }
0x3a83   :  { %v3206_v2 = vadd.f32 %v3204_v47, %v3196_v16 }
0x3a85   :  { %5269 = vtanh.f32 %v3206_v2 }
0x3a87   :  { %v5268_v35 = vpop.eup %5267 }
0x3a88   :  { %3007 = vrot.lane.b32.xlu0 %v5268_v35, %s5336_s30 }
0x3a8f   :  { %v5270_v38 = vpop.eup %5269 }
0x3a90   :  { %3209 = vrot.lane.b32.xlu1 %v5270_v38, %s5336_s30 }
0x3afa   :  { %v3008_v39 = vpop.permute.xlu0 %3007 }
0x3afb   :  { %v3010_v40 = vmul.f32 %v5264_v49, %v3008_v39 }
0x3afd   :  { %3012 = vrot.lane.b32.xlu0 %v3010_v40, %s5340_s4 }
0x3b02   :  { %v3210_v45 = vpop.permute.xlu1 %3209 }
0x3b03   :  { %v3212_v59 = vmul.f32 %v5266_v25, %v3210_v45 }
0x3b05   :  { %3214 = vrot.lane.b32.xlu1 %v3212_v59, %s5340_s4 }
0x3b6f   :  { %v3013_v41 = vpop.permute.xlu0 %3012 }
0x3b70   :  { %3015 = vst.msk [vmem:[#allocation2 + $0x30] sm:$0xff] %vm176_vm1, %v3013_v41  ;;  %4705 = vmatmul.mubr.msk.f32.vlgmr.msra.gmra.mrb[52].mxu1 %vm176_vm1, %v3013_v41 }
0x3b71   :  { %5011 = vmatpush3.bf16.msra.mxu1 %v6075_v5  ;;  %4726 = vmatprep.mubr.msk.f32.mxu1 %vm5339_vm3, %v5338_v21 }
0x3b72   :  { %5012 = vmatprep.subr.bf16.mxu1 %v5337_v18 }
0x3b75   :  { %5014 = vmatpush3.bf16.msra.mxu1 %v6086_v57 }
0x3b76   :  { %5021 = vmatprep.subr.bf16.mxu1 %v5337_v18 }
0x3b77   :  { %v3215_v44 = vpop.permute.xlu1 %3214 }
0x3b78   :  { %3217 = vst.msk [vmem:[#allocation3 + $0x38] sm:$0xff] %vm176_vm1, %v3215_v44  ;;  %4727 = vmatmul.mubr.msk.f32.vlgmr.msra.gmra.mrb[54].mxu1 %vm176_vm1, %v3215_v44 }
0x3b79   :  { %5023 = vmatpush3.bf16.msra.mxu1 %v6075_v5  ;;  %4748 = vmatprep.mubr.msk.f32.mxu1 %vm5339_vm3, %v5338_v21 }
0x3b7a   :  { %5024 = vmatprep.subr.bf16.mxu1 %v5337_v18 }
0x3b7d   :  { %5026 = vmatpush3.bf16.msra.mxu1 %v6086_v57 }
0x3b7e   :  { %5033 = vmatprep.subr.bf16.mxu1 %v5337_v18 }
0x3c43   :  { %v3084_v48 = vpop.f32.mrb[52].mxu1 }
0x3c44   :  { %v6136_v50 = vadd.f32 %v3084_v48, %v2300_v53  ;;  %v4706_v52 = vpop.f32.mrb[53].mxu1 }
0x3c4b   :  { %v3286_v60 = vpop.f32.mrb[54].mxu1 }
0x3c4c   :  { %v3290_v46 = vadd.f32 %v3286_v60, %v2296_v54  ;;  %v4728_v62 = vpop.f32.mrb[55].mxu1  ;;  %v2278_v60 = vadd.f32 %v5995_v13, %v6104_v11 }
0x3c4e   :  { %5271 = vtanh.f32 %v3290_v46  ;;  %v4207_v0 = vmul.f32 -1.442695, %v3290_v46 }
0x3c50   :  { %5273 = vpow2.f32 %v4207_v0 }
0x3c58   :  { %v5272_v55 = vpop.eup %5271 }
0x3c59   :  { %3300 = vrot.lane.b32.xlu0 %v5272_v55, %s5336_s30 }
0x3c5a   :  { %v5274_v3 = vpop.eup %5273 }
0x3c5b   :  { %v3294_v4 = vadd.f32 1.0, %v5274_v3 }
0x3c5d   :  { %5275 = vrcp.f32 %v3294_v4 }
0x3c67   :  { %v5276_v58 = vpop.eup %5275 }
0x3c68   :  { %v3298_v7 = vmul.f32 %v5276_v58, %v3206_v2 }
0x3ccb   :  { %v3301_v33 = vpop.permute.xlu0 %3300 }
0x3ccc   :  { %v3303_v6 = vmul.f32 %v5276_v58, %v3301_v33 }
0x3cce   :  { %3305 = vrot.lane.b32.xlu1 %v3303_v6, %s5336_s30 }
0x3d40   :  { %v3306_v28 = vpop.permute.xlu1 %3305 }
0x3d41   :  { %v3308_v36 = vadd.f32 %v3306_v28, %v3298_v7 }
0x3d43   :  { %5277 = vtanh.f32 %v3308_v36 }
0x3d4d   :  { %v5278_v8 = vpop.eup %5277 }
0x3d4e   :  { %3311 = vrot.lane.b32.xlu0 %v5278_v8, %s5336_s30 }
0x3dc0   :  { %v3312_v9 = vpop.permute.xlu0 %3311 }
0x3dc1   :  { %v3314_v10 = vmul.f32 %v5276_v58, %v3312_v9 }
0x3dc3   :  { %3316 = vrot.lane.b32.xlu1 %v3314_v10, %s5340_s4 }
0x3e35   :  { %v3317_v37 = vpop.permute.xlu1 %3316 }
0x3e36   :  { %3319 = vst.msk [vmem:[#allocation3 + $0x30] sm:$0xff] %vm176_vm1, %v3317_v37  ;;  %4738 = vmatmul.mubr.msk.f32.vlgmr.msra.gmra.mrb[36].mxu0 %vm176_vm1, %v3317_v37 }
0x3e37   :  { %5029 = vmatpush3.bf16.msra.mxu0 %v6075_v5  ;;  %4759 = vmatprep.mubr.msk.f32.mxu0 %vm5339_vm3, %v5338_v21 }
0x3e38   :  { %5030 = vmatprep.subr.bf16.mxu0 %v5337_v18 }
0x3e3b   :  { %5032 = vmatpush3.bf16.msra.mxu0 %v6086_v57 }
0x3e3c   :  { %5039 = vmatprep.subr.bf16.mxu0 %v5337_v18 }
0x3f09   :  { %v3388_v1 = vpop.f32.mrb[36].mxu0 }
0x3f0a   :  { %v3392_v15 = vadd.f32 %v3388_v1, %v2290_v14  ;;  %v4739_v17 = vpop.f32.mrb[37].mxu0  ;;  %v2272_v14 = vadd.f32 %v5976_v43, %v6104_v11 }
0x3f0c   :  { %5279 = vtanh.f32 %v3392_v15  ;;  %v4209_v19 = vmul.f32 -1.442695, %v3392_v15 }
0x3f0e   :  { %5281 = vpow2.f32 %v4209_v19 }
0x3f16   :  { %v5280_v63 = vpop.eup %5279 }
0x3f17   :  { %3402 = vrot.lane.b32.xlu0 %v5280_v63, %s5336_s30 }
0x3f18   :  { %v5282_v20 = vpop.eup %5281 }
0x3f19   :  { %v3396_v27 = vadd.f32 1.0, %v5282_v20 }
0x3f1b   :  { %5283 = vrcp.f32 %v3396_v27 }
0x3f25   :  { %v5284_v22 = vpop.eup %5283 }
0x3f26   :  { %v3400_v49 = vmul.f32 %v5284_v22, %v3308_v36 }
0x3f89   :  { %v3403_v31 = vpop.permute.xlu0 %3402 }
0x3f8a   :  { %v3405_v42 = vmul.f32 %v5284_v22, %v3403_v31 }
0x3f8c   :  { %3407 = vrot.lane.b32.xlu1 %v3405_v42, %s5336_s30 }
0x3ffe   :  { %v3408_v23 = vpop.permute.xlu1 %3407 }
0x3fff   :  { %v3410_v34 = vadd.f32 %v3408_v23, %v3400_v49 }
0x4001   :  { %5285 = vtanh.f32 %v3410_v34 }
0x400b   :  { %v5286_v24 = vpop.eup %5285 }
0x400c   :  { %3413 = vrot.lane.b32.xlu0 %v5286_v24, %s5336_s30 }
0x407e   :  { %v3414_v25 = vpop.permute.xlu0 %3413 }
0x407f   :  { %v3416_v12 = vmul.f32 %v5284_v22, %v3414_v25 }
0x4081   :  { %3418 = vrot.lane.b32.xlu1 %v3416_v12, %s5340_s4 }
0x40f3   :  { %v3419_v26 = vpop.permute.xlu1 %3418 }
0x40f4   :  { %3421 = vst.msk [vmem:[#allocation3 + $0x28] sm:$0xff] %vm176_vm1, %v3419_v26  ;;  %4749 = vmatmul.mubr.msk.f32.vlgmr.msra.gmra.mrb[56].mxu1 %vm176_vm1, %v3419_v26 }
0x40f5   :  { %5035 = vmatpush3.bf16.msra.mxu1 %v6075_v5  ;;  %4770 = vmatprep.mubr.msk.f32.mxu1 %vm5339_vm3, %v5338_v21 }
0x40f6   :  { %5036 = vmatprep.subr.bf16.mxu1 %v5337_v18 }
0x40f9   :  { %5038 = vmatpush3.bf16.msra.mxu1 %v6086_v57 }
0x40fa   :  { %5045 = vmatprep.subr.bf16.mxu1 %v5337_v18 }
0x41c7   :  { %v3490_v32 = vpop.f32.mrb[56].mxu1 }
0x41c8   :  { %v3494_v16 = vadd.f32 %v3490_v32, %v2284_v29  ;;  %v4750_v47 = vpop.f32.mrb[57].mxu1 }
0x41ca   :  { %5287 = vtanh.f32 %v3494_v16  ;;  %v4211_v35 = vmul.f32 -1.442695, %v3494_v16 }
0x41cc   :  { %5289 = vpow2.f32 %v4211_v35 }
0x41d4   :  { %v5288_v2 = vpop.eup %5287 }
0x41d5   :  { %3504 = vrot.lane.b32.xlu0 %v5288_v2, %s5336_s30 }
0x41d6   :  { %v5290_v38 = vpop.eup %5289 }
0x41d7   :  { %v3498_v39 = vadd.f32 1.0, %v5290_v38 }
0x41d9   :  { %5291 = vrcp.f32 %v3498_v39 }
0x41e3   :  { %v5292_v40 = vpop.eup %5291 }
0x41e4   :  { %v3502_v41 = vmul.f32 %v5292_v40, %v3410_v34  ;;  %v2266_v34 = vadd.f32 %v5957_v51, %v6104_v11 }
0x4247   :  { %v3505_v45 = vpop.permute.xlu0 %3504 }
0x4248   :  { %v3507_v59 = vmul.f32 %v5292_v40, %v3505_v45 }
0x424a   :  { %3509 = vrot.lane.b32.xlu1 %v3507_v59, %s5336_s30 }
0x42bc   :  { %v3510_v44 = vpop.permute.xlu1 %3509 }
0x42bd   :  { %v3512_v56 = vadd.f32 %v3510_v44, %v3502_v41  ;;  %v2260_v44 = vadd.f32 %v5947_v30, %v6104_v11 }
0x42bf   :  { %5293 = vtanh.f32 %v3512_v56 }
0x42c9   :  { %v5294_v53 = vpop.eup %5293 }
0x42ca   :  { %3515 = vrot.lane.b32.xlu0 %v5294_v53, %s5336_s30 }
0x433c   :  { %v3516_v48 = vpop.permute.xlu0 %3515 }
0x433d   :  { %v3518_v52 = vmul.f32 %v5292_v40, %v3516_v48 }
0x433f   :  { %3520 = vrot.lane.b32.xlu1 %v3518_v52, %s5340_s4 }
0x43b1   :  { %v3521_v54 = vpop.permute.xlu1 %3520 }
0x43b2   :  { %3523 = vst.msk [vmem:[#allocation3 + $0x20] sm:$0xff] %vm176_vm1, %v3521_v54  ;;  %4760 = vmatmul.mubr.msk.f32.vlgmr.msra.gmra.mrb[38].mxu0 %vm176_vm1, %v3521_v54 }
0x43b3   :  { %5041 = vmatpush3.bf16.msra.mxu0 %v6075_v5  ;;  %4781 = vmatprep.mubr.msk.f32.mxu0 %vm5339_vm3, %v5338_v21 }
0x43b4   :  { %5042 = vmatprep.subr.bf16.mxu0 %v5337_v18 }
0x43b7   :  { %5044 = vmatpush3.bf16.msra.mxu0 %v6086_v57 }
0x4485   :  { %v3592_v46 = vpop.f32.mrb[38].mxu0 }
0x4486   :  { %v3596_v62 = vadd.f32 %v3592_v46, %v2278_v60  ;;  %v4761_v55 = vpop.f32.mrb[39].mxu0  ;;  %v4204_v46 = vmul.f32 -1.442695, %v6136_v50 }
0x4488   :  { %5295 = vtanh.f32 %v3596_v62  ;;  %v4213_v3 = vmul.f32 -1.442695, %v3596_v62 }
0x448a   :  { %5297 = vpow2.f32 %v4213_v3 }
0x4492   :  { %v5296_v0 = vpop.eup %5295 }
0x4493   :  { %3606 = vrot.lane.b32.xlu0 %v5296_v0, %s5336_s30 }
0x4494   :  { %v5298_v4 = vpop.eup %5297 }
0x4495   :  { %v3600_v58 = vadd.f32 1.0, %v5298_v4 }
0x4497   :  { %5299 = vrcp.f32 %v3600_v58 }
0x44a1   :  { %v5300_v33 = vpop.eup %5299 }
0x44a2   :  { %v3604_v28 = vmul.f32 %v5300_v33, %v3512_v56 }
0x4505   :  { %v3607_v6 = vpop.permute.xlu0 %3606 }
0x4506   :  { %v3609_v7 = vmul.f32 %v5300_v33, %v3607_v6 }
0x4508   :  { %3611 = vrot.lane.b32.xlu1 %v3609_v7, %s5336_s30 }
0x457a   :  { %v3612_v36 = vpop.permute.xlu1 %3611 }
0x457b   :  { %v3614_v13 = vadd.f32 %v3612_v36, %v3604_v28 }
0x457d   :  { %5301 = vtanh.f32 %v3614_v13 }
0x4587   :  { %v5302_v8 = vpop.eup %5301 }
0x4588   :  { %3617 = vrot.lane.b32.xlu0 %v5302_v8, %s5336_s30 }
0x45fa   :  { %v3618_v9 = vpop.permute.xlu0 %3617 }
0x45fb   :  { %v3620_v10 = vmul.f32 %v5300_v33, %v3618_v9 }
0x45fd   :  { %3622 = vrot.lane.b32.xlu1 %v3620_v10, %s5340_s4 }
0x466f   :  { %v3623_v37 = vpop.permute.xlu1 %3622 }
0x4670   :  { %3625 = vst.msk [vmem:[#allocation3 + $0x18] sm:$0xff] %vm176_vm1, %v3623_v37  ;;  %4771 = vmatmul.mubr.msk.f32.vlgmr.msra.gmra.mrb[58].mxu1 %vm176_vm1, %v3623_v37 }
0x4671   :  { %5047 = vmatpush3.bf16.msra.mxu1 %v6075_v5  ;;  %4792 = vmatprep.mubr.msk.f32.mxu1 %vm5339_vm3, %v5338_v21 }
0x4672   :  { %5048 = vmatprep.subr.bf16.mxu1 %v5337_v18 }
0x4675   :  { %5050 = vmatpush3.bf16.msra.mxu1 %v6086_v57 }
0x4743   :  { %v3694_v1 = vpop.f32.mrb[58].mxu1 }
0x4744   :  { %v3698_v15 = vadd.f32 %v3694_v1, %v2272_v14  ;;  %v4772_v17 = vpop.f32.mrb[59].mxu1 }
0x4746   :  { %5303 = vtanh.f32 %v3698_v15  ;;  %v4215_v19 = vmul.f32 -1.442695, %v3698_v15 }
0x4748   :  { %5305 = vpow2.f32 %v4215_v19  ;;  %v93_v19 = vld [vmem:[%s6309_s11] sm:$0xff] }
0x4750   :  { %v5304_v63 = vpop.eup %5303 }
0x4751   :  { %3708 = vrot.lane.b32.xlu0 %v5304_v63, %s5336_s30  ;;  %v3946_v63 = vld [vmem:[#allocation3 + $0x30] sm:$0xff] }
0x4752   :  { %v5306_v5 = vpop.eup %5305 }
0x4753   :  { %v3702_v20 = vadd.f32 1.0, %v5306_v5  ;;  %v94_v5 = vld [vmem:[%s6309_s11 + $0x8] sm:$0xff] }
0x4755   :  { %5307 = vrcp.f32 %v3702_v20  ;;  %v95_v20 = vld [vmem:[%s6309_s11 + $0x10] sm:$0xff] }
0x475f   :  { %v5308_v21 = vpop.eup %5307 }
0x4760   :  { %v3706_v57 = vmul.f32 %v5308_v21, %v3614_v13 }
0x47c3   :  { %v3709_v27 = vpop.permute.xlu0 %3708 }
0x47c4   :  { %v3711_v18 = vmul.f32 %v5308_v21, %v3709_v27  ;;  %v96_v27 = vld [vmem:[%s6309_s11 + $0x18] sm:$0xff] }
0x47c6   :  { %3713 = vrot.lane.b32.xlu1 %v3711_v18, %s5336_s30  ;;  %v5055_v18 = vpack.c.bf16 %v96_v27, %v95_v20 }
0x4838   :  { %v3714_v22 = vpop.permute.xlu1 %3713 }
0x4839   :  { %v3716_v43 = vadd.f32 %v3714_v22, %v3706_v57  ;;  %v97_v57 = vld [vmem:[%s6309_s11 + $0x20] sm:$0xff]  ;;  %v98_v22 = vld [vmem:[%s6309_s11 + $0x28] sm:$0xff] }
0x483b   :  { %5309 = vtanh.f32 %v3716_v43 }
0x4845   :  { %v5310_v31 = vpop.eup %5309 }
0x4846   :  { %3719 = vrot.lane.b32.xlu0 %v5310_v31, %s5336_s30  ;;  %v99_v31 = vld [vmem:[%s6309_s11 + $0x30] sm:$0xff] }
0x48b8   :  { %v3720_v42 = vpop.permute.xlu0 %3719 }
0x48b9   :  { %v3722_v49 = vmul.f32 %v5308_v21, %v3720_v42  ;;  %v5051_v21 = vpack.c.bf16 %v94_v5, %v93_v19  ;;  %v100_v42 = vld [vmem:[%s6309_s11 + $0x38] sm:$0xff] }
0x48bb   :  { %3724 = vrot.lane.b32.xlu1 %v3722_v49, %s5340_s4  ;;  %5052 = vmatprep.subr.bf16.mxu0 %v5051_v21  ;;  %v5063_v49 = vpack.c.bf16 %v100_v42, %v99_v31 }
0x492d   :  { %v3725_v23 = vpop.permute.xlu1 %3724 }
0x492e   :  { %3727 = vst.msk [vmem:[#allocation3 + $0x10] sm:$0xff] %vm176_vm1, %v3725_v23  ;;  %4782 = vmatmul.mubr.msk.f32.vlgmr.msra.gmra.mrb[40].mxu0 %vm176_vm1, %v3725_v23 }
0x492f   :  { %5054 = vmatpush3.bf16.msra.mxu0 %v5051_v21 }
0x4930   :  { %5056 = vmatprep.subr.bf16.mxu0 %v5055_v18 }
0x4933   :  { %5058 = vmatpush3.bf16.msra.mxu0 %v5055_v18 }
0x4a01   :  { %v3796_v24 = vpop.f32.mrb[40].mxu0 }
0x4a02   :  { %v3800_v25 = vadd.f32 %v3796_v24, %v2266_v34  ;;  %v4783_v12 = vpop.f32.mrb[41].mxu0 }
0x4a03   :  { %v3942_v12 = vld [vmem:[#allocation3 + $0x10] sm:$0xff] }
0x4a04   :  { %5311 = vtanh.f32 %v3800_v25  ;;  %v4217_v29 = vmul.f32 -1.442695, %v3800_v25 }
0x4a06   :  { %5313 = vpow2.f32 %v4217_v29  ;;  %v3945_v29 = vld [vmem:[#allocation3 + $0x28] sm:$0xff] }
0x4a0e   :  { %v5312_v26 = vpop.eup %5311 }
0x4a0f   :  { %3810 = vrot.lane.b32.xlu0 %v5312_v26, %s5336_s30  ;;  %v3943_v26 = vld [vmem:[#allocation3 + $0x18] sm:$0xff] }
0x4a10   :  { %v5314_v32 = vpop.eup %5313 }
0x4a11   :  { %v3804_v16 = vadd.f32 1.0, %v5314_v32  ;;  %v3947_v32 = vld [vmem:[#allocation3 + $0x38] sm:$0xff] }
0x4a13   :  { %5315 = vrcp.f32 %v3804_v16  ;;  %v3932_v16 = vld [vmem:[#allocation2] sm:$0xff] }
0x4a1d   :  { %v5316_v47 = vpop.eup %5315 }
0x4a1e   :  { %v3808_v38 = vmul.f32 %v5316_v47, %v3716_v43  ;;  %v5059_v43 = vpack.c.bf16 %v98_v22, %v97_v57 }
0x4a20   :  { %5060 = vmatprep.subr.bf16.mxu0 %v5059_v43 }
0x4a21   :  { %5062 = vmatpush3.bf16.msra.mxu0 %v5059_v43 }
0x4a22   :  { %5064 = vmatprep.subr.bf16.mxu0 %v5063_v49 }
0x4a25   :  { %5066 = vmatpush3.bf16.msra.mxu0 %v5063_v49 }
0x4a81   :  { %v3811_v2 = vpop.permute.xlu0 %3810 }
0x4a82   :  { %v3813_v35 = vmul.f32 %v5316_v47, %v3811_v2  ;;  %v3933_v2 = vld [vmem:[#allocation2 + $0x8] sm:$0xff] }
0x4a84   :  { %3815 = vrot.lane.b32.xlu1 %v3813_v35, %s5336_s30 }
0x4af6   :  { %v3816_v39 = vpop.permute.xlu1 %3815 }
0x4af7   :  { %v3818_v51 = vadd.f32 %v3816_v39, %v3808_v38 }
0x4af9   :  { %5317 = vtanh.f32 %v3818_v51 }
0x4b03   :  { %v5318_v40 = vpop.eup %5317 }
0x4b04   :  { %3821 = vrot.lane.b32.xlu0 %v5318_v40, %s5336_s30 }
0x4b76   :  { %v3822_v45 = vpop.permute.xlu0 %3821 }
0x4b77   :  { %v3824_v59 = vmul.f32 %v5316_v47, %v3822_v45 }
0x4b79   :  { %3826 = vrot.lane.b32.xlu1 %v3824_v59, %s5340_s4  ;;  %v3935_v59 = vld [vmem:[#allocation2 + $0x18] sm:$0xff] }
0x4beb   :  { %v3827_v41 = vpop.permute.xlu1 %3826 }
0x4bec   :  { %3829 = vst.msk [vmem:[#allocation3 + $0x8] sm:$0xff] %vm176_vm1, %v3827_v41  ;;  %4793 = vmatmul.mubr.msk.f32.vlgmr.msra.gmra.mrb[60].mxu1 %vm176_vm1, %v3827_v41 }
0x4bf3   :  { %v3941_v37 = vld [vmem:[#allocation3 + $0x8] sm:$0xff] }
0x4cbf   :  { %v3898_v56 = vpop.f32.mrb[60].mxu1 }
0x4cc0   :  { %v3902_v53 = vadd.f32 %v3898_v56, %v2260_v44  ;;  %v4794_v48 = vpop.f32.mrb[61].mxu1  ;;  %v3936_v44 = vld [vmem:[#allocation2 + $0x20] sm:$0xff] }
0x4cc2   :  { %5319 = vtanh.f32 %v3902_v53  ;;  %v4219_v60 = vmul.f32 -1.442695, %v3902_v53 }
0x4cc3   :  { %5321 = vtanh.f32 %v6136_v50 }
0x4cc4   :  { %5323 = vpow2.f32 %v4219_v60  ;;  %v3938_v60 = vld [vmem:[#allocation2 + $0x30] sm:$0xff] }
0x4cc5   :  { %5325 = vpow2.f32 %v4204_v46 }
0x4ccc   :  { %v5320_v52 = vpop.eup %5319 }
0x4ccd   :  { %3912 = vrot.lane.b32.xlu0 %v5320_v52, %s5336_s30  ;;  %v5322_v54 = vpop.eup %5321  ;;  %v3937_v52 = vld [vmem:[#allocation2 + $0x28] sm:$0xff] }
0x4cce   :  { %v5324_v62 = vpop.eup %5323 }
0x4ccf   :  { %v3906_v55 = vadd.f32 1.0, %v5324_v62  ;;  %v5326_v30 = vpop.eup %5325 }
0x4cd0   :  { %v3092_v11 = vadd.f32 1.0, %v5326_v30 }
0x4cd1   :  { %3098 = vrot.lane.b32.xlu0 %v5322_v54, %s5336_s30  ;;  %5327 = vrcp.f32 %v3906_v55 }
0x4cd2   :  { %5329 = vrcp.f32 %v3092_v11 }
0x4cdb   :  { %v5328_v0 = vpop.eup %5327 }
0x4cdc   :  { %v5330_v58 = vpop.eup %5329  ;;  %v3910_v7 = vmul.f32 %v5328_v0, %v3818_v51  ;;  %v3934_v51 = vld [vmem:[#allocation2 + $0x10] sm:$0xff] }
0x4cdd   :  { %v3096_v36 = vmul.f32 %v5330_v58, %v6111_v61  ;;  %v3944_v61 = vld [vmem:[#allocation3 + $0x20] sm:$0xff] }
0x4d3f   :  { %v3913_v3 = vpop.permute.xlu0 %3912 }
0x4d40   :  { %v3915_v4 = vmul.f32 %v5328_v0, %v3913_v3 }
0x4d42   :  { %3917 = vrot.lane.b32.xlu1 %v3915_v4, %s5336_s30 }
0x4d43   :  { %v3099_v33 = vpop.permute.xlu0 %3098 }
0x4d44   :  { %v3101_v6 = vmul.f32 %v5330_v58, %v3099_v33 }
0x4d46   :  { %3103 = vrot.lane.b32.xlu1 %v3101_v6, %s5336_s30 }
0x4db4   :  { %v3918_v50 = vpop.permute.xlu1 %3917 }
0x4db5   :  { %v3920_v28 = vadd.f32 %v3918_v50, %v3910_v7 }
0x4db7   :  { %5331 = vtanh.f32 %v3920_v28 }
0x4db8   :  { %v3104_v13 = vpop.permute.xlu1 %3103 }
0x4db9   :  { %v3106_v8 = vadd.f32 %v3104_v13, %v3096_v36 }
0x4dbb   :  { %5333 = vtanh.f32 %v3106_v8 }
0x4dc1   :  { %v5332_v9 = vpop.eup %5331 }
0x4dc2   :  { %3923 = vrot.lane.b32.xlu0 %v5332_v9, %s5336_s30 }
0x4dc5   :  { %v5334_v10 = vpop.eup %5333 }
0x4dc6   :  { %3109 = vrot.lane.b32.xlu0 %v5334_v10, %s5336_s30 }
0x4dca   :  { %3958 = vrot.lane.b32.xlu0 %v3941_v37, %s5336_s30 }
0x4e34   :  { %v3924_v14 = vpop.permute.xlu0 %3923 }
0x4e35   :  { %v3926_v1 = vmul.f32 %v5328_v0, %v3924_v14  ;;  %v4220_v0 = vld [vmem:[%s6310_s12] ss:$0 sm:$0xff] }
0x4e37   :  { %3928 = vrot.lane.b32.xlu1 %v3926_v1, %s5340_s4 }
0x4e38   :  { %v3110_v15 = vpop.permute.xlu0 %3109 }
0x4e39   :  { %v3112_v17 = vmul.f32 %v5330_v58, %v3110_v15 }
0x4e3b   :  { %3114 = vrot.lane.b32.xlu0 %v3112_v17, %s5340_s4 }
0x4e3c   :  { %v3959_v23 = vpop.permute.xlu0 %3958 }
0x4e3d   :  { %v3981_v38 = vsel %vm176_vm1, %v3933_v2, %v3959_v23 }
0x4e3f   :  { %3964 = vrot.lane.b32.xlu0 %v3944_v61, %s5336_s30 }
0x4e43   :  { %3968 = vrot.lane.b32.xlu0 %v3946_v63, %s5336_s30 }
0x4ea9   :  { %v3929_v34 = vpop.permute.xlu1 %3928 }
0x4eaa   :  { %3931 = vst.msk [vmem:[#allocation3] sm:$0xff] %vm176_vm1, %v3929_v34 }
0x4ead   :  { %v3115_v24 = vpop.permute.xlu0 %3114 }
0x4eae   :  { %3117 = vst.msk [vmem:[#allocation2 + $0x38] sm:$0xff] %vm176_vm1, %v3115_v24 }
0x4eb1   :  { %v3940_v25 = vld [vmem:[#allocation3] sm:$0xff]  ;;  %v3965_v40 = vpop.permute.xlu0 %3964 }
0x4eb2   :  { %3956 = vrot.lane.b32.xlu1 %v3940_v25, %s5336_s30  ;;  %v3984_v53 = vsel %vm176_vm1, %v3936_v44, %v3965_v40 }
0x4eb5   :  { %v3969_v48 = vpop.permute.xlu0 %3968  ;;  %v3939_v30 = vld [vmem:[#allocation2 + $0x38] sm:$0xff] }
0x4eb6   :  { %3960 = vrot.lane.b32.xlu1 %v3942_v12, %s5336_s30  ;;  %v3986_v62 = vsel %vm176_vm1, %v3938_v60, %v3969_v48 }
0x4eba   :  { %3962 = vrot.lane.b32.xlu1 %v3943_v26, %s5336_s30 }
0x4ebe   :  { %3966 = vrot.lane.b32.xlu1 %v3945_v29, %s5336_s30 }
0x4ec2   :  { %3970 = vrot.lane.b32.xlu1 %v3947_v32, %s5336_s30 }
0x4f24   :  { %v3957_v47 = vpop.permute.xlu1 %3956 }
0x4f25   :  { %v3980_v35 = vsel %vm176_vm1, %v3932_v16, %v3957_v47 }
0x4f26   :  { %4811 = vmatprep.mubr.msk.f32.mxu0 %vm2166_vm4, %v3980_v35 }
0x4f27   :  { %4812 = vmatmul.mubr.msk.f32.vlgmr.msra.gmra.mrb[42].mxu0 %vm2166_vm4, %v3981_v38 }
0x4f28   :  { %v3961_v39 = vpop.permute.xlu1 %3960 }
0x4f29   :  { %v3982_v45 = vsel %vm176_vm1, %v3934_v51, %v3961_v39 }
0x4f2a   :  { %4814 = vmatprep.mubr.msk.f32.mxu0 %vm2166_vm4, %v3982_v45 }
0x4f2c   :  { %v3963_v41 = vpop.permute.xlu1 %3962 }
0x4f2d   :  { %v3983_v56 = vsel %vm176_vm1, %v3935_v59, %v3963_v41 }
0x4f2e   :  { %4815 = vmatmul.mubr.msk.f32.gmra.mrb[44].mxu0 %vm2166_vm4, %v3983_v56 }
0x4f2f   :  { %4817 = vmatprep.mubr.msk.f32.mxu0 %vm2166_vm4, %v3984_v53 }
0x4f30   :  { %v3967_v54 = vpop.permute.xlu1 %3966 }
0x4f31   :  { %v3985_v46 = vsel %vm176_vm1, %v3937_v52, %v3967_v54 }
0x4f32   :  { %4818 = vmatmul.mubr.msk.f32.gmra.mrb[46].mxu0 %vm2166_vm4, %v3985_v46 }
0x4f33   :  { %4820 = vmatprep.mubr.msk.f32.mxu0 %vm2166_vm4, %v3986_v62 }
0x4f34   :  { %v3971_v55 = vpop.permute.xlu1 %3970 }
0x4f35   :  { %v3987_v11 = vsel %vm176_vm1, %v3939_v30, %v3971_v55 }
0x4f36   :  { %4821 = vmatmul.mubr.msk.f32.gmra.mrb[48].mxu0 %vm2166_vm4, %v3987_v11 }
0x4ffa   :  { %v4813_v3 = vpop.f32.mrb[42].mxu0 }
0x4ffb   :  { %v4090_v4 = vadd.f32 %v4813_v3, %v4220_v0  ;;  %v4084_v58 = vpop.f32.mrb[43].mxu0 }
0x4ffc   :  { %v4085_v33 = vadd.f32 %v4220_v0, %v4084_v58 }
0x4ffd   :  { %4124 = vst [vmem:[%s6311_s13 + $0x8] sm:$0xff] %v4090_v4 }
0x4ffe   :  { %4123 = vst [vmem:[%s6311_s13] sm:$0xff] %v4085_v33 }
0x5001   :  { %v4816_v6 = vpop.f32.mrb[44].mxu0 }
0x5002   :  { %v4100_v7 = vadd.f32 %v4816_v6, %v4220_v0  ;;  %v4094_v50 = vpop.f32.mrb[45].mxu0 }
0x5003   :  { %v4095_v28 = vadd.f32 %v4220_v0, %v4094_v50 }
0x5004   :  { %4126 = vst [vmem:[%s6311_s13 + $0x18] sm:$0xff] %v4100_v7 }
0x5005   :  { %4125 = vst [vmem:[%s6311_s13 + $0x10] sm:$0xff] %v4095_v28  ;;  %v4819_v36 = vpop.f32.mrb[46].mxu0 }
0x5006   :  { %v4110_v13 = vadd.f32 %v4819_v36, %v4220_v0  ;;  %v4104_v8 = vpop.f32.mrb[47].mxu0 }
0x5007   :  { %v4105_v9 = vadd.f32 %v4220_v0, %v4104_v8 }
0x5008   :  { %4128 = vst [vmem:[%s6311_s13 + $0x28] sm:$0xff] %v4110_v13 }
0x5009   :  { %4127 = vst [vmem:[%s6311_s13 + $0x20] sm:$0xff] %v4105_v9  ;;  %v4822_v10 = vpop.f32.mrb[48].mxu0 }
0x500a   :  { %v4120_v37 = vadd.f32 %v4822_v10, %v4220_v0  ;;  %v4114_v14 = vpop.f32.mrb[49].mxu0 }
0x500b   :  { %v4115_v1 = vadd.f32 %v4220_v0, %v4114_v14 }
0x500c   :  { %4130 = vst [vmem:[%s6311_s13 + $0x38] sm:$0xff] %v4120_v37 }
0x500d   :  { %4129 = vst [vmem:[%s6311_s13 + $0x30] sm:$0xff] %v4115_v1 }

</bundles_post_ra>
